<compile_context>
chip_gen: v7x
topology: tpu7x:2x2x1
jax: 0.10.0
libtpu: 0.0.40
codegen_flags: <defaults>
</compile_context>

<pallas_src>
import functools

import numpy as np
import jax
import jax.numpy as jnp
from jax import lax
from jax.experimental import pallas as pl
from jax.experimental.pallas import tpu as pltpu

_BN_EPS = 1e-5


def _round_up(x, m):
    return (x + m - 1) // m * m


def _device_kind():
    try:
        return jax.devices()[0].device_kind.lower()
    except Exception:
        return ""


_IS_V7 = "v7" in _device_kind()
_VMEM_LIMIT = (40 if _IS_V7 else 64) * 1024 * 1024      # scoped VMEM limit
_TILE_BUDGET = (28 if _IS_V7 else 48) * 1024 * 1024     # per-call tile budget
_W_RESIDENT = 8 * 1024 * 1024                           # resident-weight cap


# ----------------------------- Pallas kernels ------------------------------

def _conv_flat_kernel(x0_ref, x1_ref, w_ref, s_ref, o_ref, strip_ref, *,
                      offsets, relu):
    """Implicit-GEMM stride-1 conv: per-tap static-offset slices of a
    2*tm-row activation strip, one MXU matmul per tap, f32 accumulate."""
    tm = x0_ref.shape[0]
    strip_ref[0:tm, :] = x0_ref[...]
    strip_ref[tm:2 * tm, :] = x1_ref[...]
    acc = None
    for t, off in enumerate(offsets):
        part = jnp.dot(strip_ref[off:off + tm, :], w_ref[t],
                       preferred_element_type=jnp.float32)
        acc = part if acc is None else acc + part
    acc = acc + s_ref[...]
    if relu:
        acc = jnp.maximum(acc, 0.0)
    o_ref[...] = acc.astype(o_ref.dtype)


def _conv_flat_res_kernel(x0_ref, x1_ref, w_ref, s_ref, r_ref, o_ref,
                          strip_ref, *, offsets, relu):
    """Same as above + fused residual add before the ReLU."""
    tm = x0_ref.shape[0]
    strip_ref[0:tm, :] = x0_ref[...]
    strip_ref[tm:2 * tm, :] = x1_ref[...]
    acc = None
    for t, off in enumerate(offsets):
        part = jnp.dot(strip_ref[off:off + tm, :], w_ref[t],
                       preferred_element_type=jnp.float32)
        acc = part if acc is None else acc + part
    acc = acc + s_ref[...] + r_ref[...].astype(jnp.float32)
    if relu:
        acc = jnp.maximum(acc, 0.0)
    o_ref[...] = acc.astype(o_ref.dtype)


def _matmul_kernel(a_ref, b_ref, s_ref, o_ref, *, relu):
    """o = maybe_relu(A @ B + shift); used for the small stride-2 convs."""
    acc = jnp.dot(a_ref[...], b_ref[...], preferred_element_type=jnp.float32)
    acc = acc + s_ref[...]
    if relu:
        acc = jnp.maximum(acc, 0.0)
    o_ref[...] = acc.astype(o_ref.dtype)


# ----------------------------- tile selection -------------------------------

def _pick_flat_tiles(m, halo, cin, ntaps, nw, has_res):
    tn = nw
    while ntaps * cin * tn * 2 > _W_RESIDENT and tn % 256 == 0:
        tn //= 2

    def vmem(tm):
        b = 4 * tm * cin * 2          # x0 + x1 blocks, double-buffered, bf16
        b += 2 * tm * cin * 2         # strip scratch
        b += 2 * ntaps * cin * tn * 2  # resident tap-stacked weight
        b += 2 * tn * 4 * 2           # shift
        b += 2 * tm * tn * 2          # bf16 output
        if has_res:
            b += 2 * tm * tn * 2
        return b

    tm_min = _round_up(max(halo, 16), 16)
    cap = 1024
    while cap > 64 and vmem(max(cap, tm_min)) > _TILE_BUDGET:
        cap //= 2
    n_chunks = max(1, -(-m // cap))
    tm = max(tm_min, _round_up(-(-m // n_chunks), 16))
    return tm, tn


def _pick_mm_tiles(m, k, n):
    if k * n * 2 <= _W_RESIDENT:
        tn = n
    elif n % 256 == 0:
        tn = 256
    elif n % 128 == 0:
        tn = 128
    else:
        tn = n

    def vmem(tm):
        return (2 * tm * k * 2 + 2 * k * tn * 2 + 2 * tn * 4 * 2
                + 2 * tm * tn * 2)

    cap = 1024
    while cap > 64 and vmem(cap) > _TILE_BUDGET:
        cap //= 2
    n_chunks = max(1, -(-m // cap))
    tm = _round_up(max(-(-m // n_chunks), 16), 16)
    return tm, tn


# ------------------------- flat (stride-1) conv path ------------------------

def _flat_conv_wide(xpad, w3, shift, kh, kw, *, relu, residual=None):
    """Stride-1 conv on an already spatially padded NHWC input.

    xpad : (B, Hp, Wp, Cin)      w3 : (kh*kw, Cin, Nw) bf16 (BN folded)
    shift: (1, Nw) f32           residual : optional (B, Ho, Wo, Nw)
    Returns the 'wide' output (B, Ho, Wp, Nw) bf16; columns >= Wp-kw+1 are
    junk and must be cropped by the caller.
    """
    B, Hp, Wp, Cin = xpad.shape
    ntaps, _, Nw = w3.shape
    Ho = Hp - kh + 1
    M = Ho * Wp
    halo = (kh - 1) * Wp + (kw - 1)
    has_res = residual is not None
    tm, tn = _pick_flat_tiles(M, halo, Cin, ntaps, Nw, has_res)
    Mp = _round_up(M, tm)
    Lp = Mp + tm

    xf = xpad.astype(jnp.bfloat16).reshape(B, Hp * Wp, Cin)
    xf = jnp.pad(xf, ((0, 0), (0, Lp - Hp * Wp), (0, 0)))
    offsets = tuple(i * Wp + j for i in range(kh) for j in range(kw))

    operands = [xf, xf, w3, shift]
    in_specs = [
        pl.BlockSpec((None, tm, Cin), lambda b, n, m: (b, m, 0)),
        pl.BlockSpec((None, tm, Cin), lambda b, n, m: (b, m + 1, 0)),
        pl.BlockSpec((ntaps, Cin, tn), lambda b, n, m: (0, 0, n)),
        pl.BlockSpec((1, tn), lambda b, n, m: (0, n)),
    ]
    if has_res:
        r = residual.astype(jnp.bfloat16)
        r = jnp.pad(r, ((0, 0), (0, 0), (0, Wp - r.shape[2]), (0, 0)))
        r = r.reshape(B, M, Nw)
        r = jnp.pad(r, ((0, 0), (0, Mp - M), (0, 0)))
        operands.append(r)
        in_specs.append(pl.BlockSpec((None, tm, tn), lambda b, n, m: (b, m, n)))
        kernel = functools.partial(_conv_flat_res_kernel, offsets=offsets,
                                   relu=relu)
    else:
        kernel = functools.partial(_conv_flat_kernel, offsets=offsets,
                                   relu=relu)

    out = pl.pallas_call(
        kernel,
        out_shape=jax.ShapeDtypeStruct((B, Mp, Nw), jnp.bfloat16),
        grid_spec=pltpu.PrefetchScalarGridSpec(
            num_scalar_prefetch=0,
            grid=(B, Nw // tn, Mp // tm),      # M innermost -> weight resident
            in_specs=in_specs,
            out_specs=pl.BlockSpec((None, tm, tn), lambda b, n, m: (b, m, n)),
            scratch_shapes=[pltpu.VMEM((2 * tm, Cin), jnp.bfloat16)]),
        compiler_params=pltpu.CompilerParams(
            dimension_semantics=("parallel", "parallel", "parallel"),
            vmem_limit_bytes=_VMEM_LIMIT),
    )(*operands)
    return out[:, :M, :].reshape(B, Ho, Wp, Nw)


def conv2d_s1(x, w3, shift, *, kh, kw, pad, relu, residual=None):
    """Stride-1 Conv2d (+BN folded, +optional fused residual, +ReLU)."""
    xpad = jnp.pad(x.astype(jnp.bfloat16),
                   ((0, 0), (pad, pad), (pad, pad), (0, 0)))
    y = _flat_conv_wide(xpad, w3, shift, kh, kw, relu=relu, residual=residual)
    return y[:, :, :y.shape[2] - (kw - 1), :]


def conv_transpose2d(x, w3, shift, *, k, s, p, op, relu):
    """Sub-pixel ConvTranspose2d: one TxT stride-1 flat conv whose N stacks
    the s^2 output phases, then a pixel shuffle + crop."""
    B, H, W, _ = x.shape
    Ho = (H - 1) * s - 2 * p + k + op
    Wo = (W - 1) * s - 2 * p + k + op
    T = -(-k // s)
    m_lo = -(-(p - (s - 1)) // s)
    pad_lo = (T - 1) - m_lo
    pad_hi = (k + op - p - 1) // s
    assert pad_lo >= 0 and pad_hi >= 0
    cout = w3.shape[2] // (s * s)
    xpad = jnp.pad(x.astype(jnp.bfloat16),
                   ((0, 0), (pad_lo, pad_hi), (pad_lo, pad_hi), (0, 0)))
    y = _flat_conv_wide(xpad, w3, shift, T, T, relu=relu)
    Mh = y.shape[1]
    Mw = y.shape[2] - (T - 1)
    y = y[:, :, :Mw, :].reshape(B, Mh, Mw, s, s, cout)
    y = jnp.transpose(y, (0, 1, 3, 2, 4, 5)).reshape(B, Mh * s, Mw * s, cout)
    off = p - m_lo * s
    return y[:, off:off + Ho, off:off + Wo, :]


# --------------------- im2col path (small stride-2 convs) -------------------

def _im2col(x, kh, kw, stride, pad):
    x = jnp.pad(x, ((0, 0), (pad, pad), (pad, pad), (0, 0)))
    B, Hp, Wp, C = x.shape
    Ho = (Hp - kh) // stride + 1
    Wo = (Wp - kw) // stride + 1
    cols = []
    for i in range(kh):
        for j in range(kw):
            cols.append(x[:, i:i + stride * (Ho - 1) + 1:stride,
                           j:j + stride * (Wo - 1) + 1:stride, :])
    p = jnp.stack(cols, axis=4)                 # (B, Ho, Wo, C, kh*kw)
    return p.reshape(B * Ho * Wo, C * kh * kw), (B, Ho, Wo)


def fused_matmul(a, wmat, shift, *, relu):
    m, k = a.shape
    _, n = wmat.shape
    tm, tn = _pick_mm_tiles(m, k, n)
    mp = _round_up(m, tm)
    a_p = a.astype(jnp.bfloat16)
    if mp != m:
        a_p = jnp.pad(a_p, ((0, mp - m), (0, 0)))
    out = pl.pallas_call(
        functools.partial(_matmul_kernel, relu=relu),
        out_shape=jax.ShapeDtypeStruct((mp, n), jnp.bfloat16),
        grid_spec=pltpu.PrefetchScalarGridSpec(
            num_scalar_prefetch=0,
            grid=(n // tn, mp // tm),           # N outer, M inner
            in_specs=[pl.BlockSpec((tm, k), lambda j, i: (i, 0)),
                      pl.BlockSpec((k, tn), lambda j, i: (0, j)),
                      pl.BlockSpec((1, tn), lambda j, i: (0, j))],
            out_specs=pl.BlockSpec((tm, tn), lambda j, i: (i, j))),
        compiler_params=pltpu.CompilerParams(
            dimension_semantics=("parallel", "parallel"),
            vmem_limit_bytes=_VMEM_LIMIT),
    )(a_p, wmat, shift)
    return out[:m] if mp != m else out


def conv2d_im2col(x, wmat, shift, *, kh, kw, stride, pad, relu):
    patches, (B, Ho, Wo) = _im2col(x.astype(jnp.bfloat16), kh, kw, stride, pad)
    k8 = wmat.shape[0]
    if k8 != patches.shape[1]:
        patches = jnp.pad(patches, ((0, 0), (0, k8 - patches.shape[1])))
    out = fused_matmul(patches, wmat, shift, relu=relu)
    return out.reshape(B, Ho, Wo, wmat.shape[1])


def maxpool2d(x, *, kernel=3, stride=2, padding=1):
    neg = jnp.array(-jnp.inf, x.dtype)
    xp = jnp.pad(x, ((0, 0), (padding, padding), (padding, padding), (0, 0)),
                 constant_values=neg)
    B, Hp, Wp, C = xp.shape
    Ho = (Hp - kernel) // stride + 1
    Wo = (Wp - kernel) // stride + 1
    out = None
    for i in range(kernel):
        for j in range(kernel):
            sl = xp[:, i:i + stride * (Ho - 1) + 1:stride,
                     j:j + stride * (Wo - 1) + 1:stride, :]
            out = sl if out is None else jnp.maximum(out, sl)
    return out


# ------------------- parameter preparation (done once) ----------------------

def _prep_conv_flat(w, scale, shift):
    """(Cout,Cin,kh,kw) + BN -> tap-stacked (kh*kw, Cin, Cout) bf16 weight."""
    cout, cin, kh, kw = w.shape
    w3 = jnp.transpose(w * scale[:, None, None, None], (2, 3, 1, 0))
    w3 = w3.reshape(kh * kw, cin, cout).astype(jnp.bfloat16)
    return {"w3": w3,
            "shift": jnp.reshape(shift, (1, cout)).astype(jnp.float32)}


def _prep_conv_im2col(w, scale, shift):
    cout, cin, kh, kw = w.shape
    wmat = (w * scale[:, None, None, None]).reshape(cout, cin * kh * kw).T
    k = cin * kh * kw
    k8 = _round_up(k, 8)
    wmat = jnp.pad(wmat, ((0, k8 - k), (0, 0))).astype(jnp.bfloat16)
    return {"wmat": wmat,
            "shift": jnp.reshape(shift, (1, cout)).astype(jnp.float32)}


def _prep_convT(w, b, *, stride):
    """(Cin,Cout,k,k) ConvTranspose2d -> tap-stacked phase matrix
    W3[jh*T+jw, ci, (r*s+c)*Cout+co] = w[ci, co, r+s*(T-1-jh), c+s*(T-1-jw)]."""
    w = np.asarray(w, np.float32)
    b = np.asarray(b, np.float32)
    cin, cout, kh, kw = w.shape
    s = stride
    T = -(-kh // s)
    w_all = np.zeros((T, T, cin, s, s, cout), np.float32)
    for r in range(s):
        for jh in range(T):
            a = r + s * (T - 1 - jh)
            if a >= kh:
                continue
            for c in range(s):
                for jw in range(T):
                    d = c + s * (T - 1 - jw)
                    if d >= kw:
                        continue
                    w_all[jh, jw, :, r, c, :] = w[:, :, a, d]
    w3 = jnp.asarray(w_all.reshape(T * T, cin, s * s * cout)).astype(jnp.bfloat16)
    shift = jnp.asarray(np.tile(b, s * s)).reshape(1, s * s * cout)
    return {"w3": w3, "shift": shift.astype(jnp.float32)}


# ------------------------- deterministic parameters -------------------------

class _KeyGen:
    def __init__(self, seed):
        self._key = jax.random.PRNGKey(seed)

    def __call__(self):
        self._key, sub = jax.random.split(self._key)
        return sub


def _init_conv_w(kg, cout, cin, kh, kw):
    fan_in = cin * kh * kw
    return (jax.random.normal(kg(), (cout, cin, kh, kw), jnp.float32)
            * np.sqrt(2.0 / fan_in))


def _init_bn(kg, c):
    gamma = 1.0 + 0.1 * jax.random.normal(kg(), (c,), jnp.float32)
    beta = 0.1 * jax.random.normal(kg(), (c,), jnp.float32)
    mean = 0.1 * jax.random.normal(kg(), (c,), jnp.float32)
    var = 1.0 + 0.1 * jax.random.uniform(kg(), (c,), jnp.float32)
    scale = gamma / jnp.sqrt(var + _BN_EPS)
    shift = beta - mean * scale
    return scale, shift


def _init_convT(kg, cin, cout, k):
    w = (jax.random.normal(kg(), (cin, cout, k, k), jnp.float32)
         * np.sqrt(1.0 / (cin * k * k)))
    b = 0.05 * jax.random.normal(kg(), (cout,), jnp.float32)
    return w, b


def _init_convb(kg, c, k):
    w = _init_conv_w(kg, c, c, k, k)
    b = 0.05 * jax.random.normal(kg(), (c,), jnp.float32)
    return w, b


_BLOCK_PLAN = ((64, 64, 1), (64, 64, 1), (64, 128, 2), (128, 128, 1),
               (128, 256, 2), (256, 256, 1), (256, 512, 2), (512, 512, 1))


def build_params(seed=0):
    """Deterministic synthetic params, already folded / laid out / bf16-cast.
    Dicts contain arrays only (static geometry stays Python-side)."""
    kg = _KeyGen(seed)
    P = {"stem": _prep_conv_im2col(_init_conv_w(kg, 64, 3, 7, 7),
                                   *_init_bn(kg, 64))}
    blocks = []
    for cin, cout, stride in _BLOCK_PLAN:
        w1 = _init_conv_w(kg, cout, cin, 3, 3)
        bn1 = _init_bn(kg, cout)
        blk = {"conv1": (_prep_conv_flat(w1, *bn1) if stride == 1
                         else _prep_conv_im2col(w1, *bn1)),
               "conv2": _prep_conv_flat(_init_conv_w(kg, cout, cout, 3, 3),
                                        *_init_bn(kg, cout))}
        if stride != 1 or cin != cout:
            blk["down"] = _prep_conv_im2col(_init_conv_w(kg, cout, cin, 1, 1),
                                            *_init_bn(kg, cout))
        blocks.append(blk)
    P["blocks"] = blocks
    # decoder
    P["ct1"] = _prep_convT(*_init_convT(kg, 512, 256, 7), stride=4)
    # TODO(synk): double_conv is not defined in the provided snippet; assumed
    #   nn.Sequential(Conv2d(c, c, k, stride=1, padding=k // 2), ReLU) x 2.
    ones = lambda c: jnp.ones((c,), jnp.float32)
    for name, c in (("dc1a", 256), ("dc1b", 256)):
        w, b = _init_convb(kg, c, 5)
        P[name] = _prep_conv_flat(w, ones(c), b)
    P["ct2"] = _prep_convT(*_init_convT(kg, 256, 128, 7), stride=4)
    for name, c in (("dc2a", 128), ("dc2b", 128)):
        w, b = _init_convb(kg, c, 5)
        P[name] = _prep_conv_flat(w, ones(c), b)
    P["ct3"] = _prep_convT(*_init_convT(kg, 128, 64, 5), stride=4)
    P["ct4"] = _prep_convT(*_init_convT(kg, 64, 3, 3), stride=2)
    return P


# --------------------------------- forward ----------------------------------

def _basic_block(x, blk, stride):
    if stride == 1:
        out = conv2d_s1(x, blk["conv1"]["w3"], blk["conv1"]["shift"],
                        kh=3, kw=3, pad=1, relu=True)
        identity = x
    else:
        out = conv2d_im2col(x, blk["conv1"]["wmat"], blk["conv1"]["shift"],
                            kh=3, kw=3, stride=stride, pad=1, relu=True)
        identity = conv2d_im2col(x, blk["down"]["wmat"], blk["down"]["shift"],
                                 kh=1, kw=1, stride=stride, pad=0, relu=False)
    # conv2 + BN + residual add + ReLU fused into one Pallas epilogue.
    return conv2d_s1(out, blk["conv2"]["w3"], blk["conv2"]["shift"],
                     kh=3, kw=3, pad=1, relu=True, residual=identity)


def resnet_pretrained_ds_forward(x_nchw, params):
    """NCHW in / NCHW out (PyTorch convention); NHWC bf16 internally."""
    x = jnp.transpose(x_nchw, (0, 2, 3, 1)).astype(jnp.bfloat16)
    st = params["stem"]
    x = conv2d_im2col(x, st["wmat"], st["shift"], kh=7, kw=7, stride=2, pad=3,
                      relu=True)
    x = maxpool2d(x, kernel=3, stride=2, padding=1)
    for (cin, cout, stride), blk in zip(_BLOCK_PLAN, params["blocks"]):
        x = _basic_block(x, blk, stride)
    ct = params["ct1"]
    x = conv_transpose2d(x, ct["w3"], ct["shift"], k=7, s=4, p=0, op=1,
                         relu=True)
    for name in ("dc1a", "dc1b"):
        l = params[name]
        x = conv2d_s1(x, l["w3"], l["shift"], kh=5, kw=5, pad=2, relu=True)
    ct = params["ct2"]
    x = conv_transpose2d(x, ct["w3"], ct["shift"], k=7, s=4, p=2, op=1,
                         relu=True)
    for name in ("dc2a", "dc2b"):
        l = params[name]
        x = conv2d_s1(x, l["w3"], l["shift"], kh=5, kw=5, pad=2, relu=True)
    ct = params["ct3"]
    x = conv_transpose2d(x, ct["w3"], ct["shift"], k=5, s=4, p=2, op=0,
                         relu=True)
    ct = params["ct4"]
    x = conv_transpose2d(x, ct["w3"], ct["shift"], k=3, s=2, p=2, op=1,
                         relu=False)
    return jnp.transpose(x, (0, 3, 1, 2)).astype(jnp.float32)


# ----------------------------------- main ------------------------------------

if __name__ == "__main__":
    # --- check 1: flat stride-1 conv (multiple M blocks) vs lax.conv --------
    kx, kw_, ks, kb = jax.random.split(jax.random.PRNGKey(1), 4)
    x = jax.random.normal(kx, (1, 40, 30, 64), jnp.float32)
    w = 0.1 * jax.random.normal(kw_, (64, 64, 3, 3), jnp.float32)
    scale = 1.0 + 0.1 * jax.random.normal(ks, (64,), jnp.float32)
    shift = 0.1 * jax.random.normal(kb, (64,), jnp.float32)
    prep = _prep_conv_flat(w, scale, shift)
    got = conv2d_s1(x, prep["w3"], prep["shift"], kh=3, kw=3, pad=1, relu=True)
    x16 = x.astype(jnp.bfloat16).astype(jnp.float32)
    w16 = (w * scale[:, None, None, None]).astype(jnp.bfloat16).astype(jnp.float32)
    ref = lax.conv_general_dilated(
        x16, w16, (1, 1), ((1, 1), (1, 1)),
        dimension_numbers=("NHWC", "OIHW", "NHWC"),
        precision=lax.Precision.HIGHEST)
    ref = jnp.maximum(ref + shift, 0.0)
    np.testing.assert_allclose(np.asarray(got.astype(jnp.float32)),
                               np.asarray(ref), rtol=2e-2, atol=2e-2)

    # --- check 2: flat conv with fused residual + ReLU (batch 2) ------------
    kx2, kr2 = jax.random.split(jax.random.PRNGKey(2))
    x2 = jax.random.normal(kx2, (2, 10, 13, 64), jnp.float32)
    r2 = jax.random.normal(kr2, (2, 10, 13, 64), jnp.float32)
    got = conv2d_s1(x2, prep["w3"], prep["shift"], kh=3, kw=3, pad=1,
                    relu=True, residual=r2)
    x16 = x2.astype(jnp.bfloat16).astype(jnp.float32)
    r16 = r2.astype(jnp.bfloat16).astype(jnp.float32)
    ref = lax.conv_general_dilated(
        x16, w16, (1, 1), ((1, 1), (1, 1)),
        dimension_numbers=("NHWC", "OIHW", "NHWC"),
        precision=lax.Precision.HIGHEST)
    ref = jnp.maximum(ref + shift + r16, 0.0)
    np.testing.assert_allclose(np.asarray(got.astype(jnp.float32)),
                               np.asarray(ref), rtol=2e-2, atol=2e-2)

    # --- check 3: im2col stride-2 conv vs lax.conv ---------------------------
    kx3, kw3 = jax.random.split(jax.random.PRNGKey(3))
    xc = jax.random.normal(kx3, (2, 9, 9, 5), jnp.float32)
    wc = 0.2 * jax.random.normal(kw3, (7, 5, 3, 3), jnp.float32)
    sc3 = jnp.linspace(0.8, 1.2, 7, dtype=jnp.float32)
    sh3 = jnp.linspace(-0.1, 0.1, 7, dtype=jnp.float32)
    prep3 = _prep_conv_im2col(wc, sc3, sh3)
    got = conv2d_im2col(xc, prep3["wmat"], prep3["shift"], kh=3, kw=3,
                        stride=2, pad=1, relu=True)
    x16 = xc.astype(jnp.bfloat16).astype(jnp.float32)
    w16c = (wc * sc3[:, None, None, None]).astype(jnp.bfloat16).astype(jnp.float32)
    ref = lax.conv_general_dilated(
        x16, w16c, (2, 2), ((1, 1), (1, 1)),
        dimension_numbers=("NHWC", "OIHW", "NHWC"),
        precision=lax.Precision.HIGHEST)
    ref = jnp.maximum(ref + sh3, 0.0)
    np.testing.assert_allclose(np.asarray(got.astype(jnp.float32)),
                               np.asarray(ref), rtol=2e-2, atol=2e-2)

    # --- check 4: sub-pixel conv-transpose (two configs) vs lax reference ---
    for (k, s, p, op, cin, cout, hw) in ((5, 4, 2, 1, 64, 5, (4, 5)),
                                         (3, 2, 2, 1, 64, 3, (7, 6))):
        kx4, kw4 = jax.random.split(jax.random.PRNGKey(10 + k))
        xt = jax.random.normal(kx4, (1, hw[0], hw[1], cin), jnp.float32)
        wt = 0.1 * jax.random.normal(kw4, (cin, cout, k, k), jnp.float32)
        bias = jnp.linspace(-0.1, 0.1, cout, dtype=jnp.float32)
        prep4 = _prep_convT(wt, bias, stride=s)
        got = conv_transpose2d(xt, prep4["w3"], prep4["shift"], k=k, s=s, p=p,
                               op=op, relu=False)
        x16 = xt.astype(jnp.bfloat16).astype(jnp.float32)
        w16t = wt.astype(jnp.bfloat16).astype(jnp.float32)
        rhs = jnp.transpose(jnp.flip(w16t, (2, 3)), (1, 0, 2, 3))
        ref = lax.conv_general_dilated(
            x16, rhs, (1, 1),
            padding=((k - 1 - p, k - 1 - p + op), (k - 1 - p, k - 1 - p + op)),
            lhs_dilation=(s, s), dimension_numbers=("NHWC", "OIHW", "NHWC"),
            precision=lax.Precision.HIGHEST) + bias
        np.testing.assert_allclose(np.asarray(got.astype(jnp.float32)),
                                   np.asarray(ref), rtol=2e-2, atol=2e-2)

    # --- full forward ---------------------------------------------------------
    params = build_params(seed=0)
    xin = jax.random.normal(jax.random.PRNGKey(0), (1, 3, 32, 32), jnp.float32)
    fwd = jax.jit(resnet_pretrained_ds_forward)
    out = jax.block_until_ready(fwd(xin, params))
    assert out.shape == (1, 3, 248, 248), out.shape
    assert np.isfinite(np.asarray(out)).all()
    print("KERNEL_OK")
</pallas_src>

<mosaic_0001>
module attributes {stable_mosaic.version = 11 : i64} {
  func.func @_conv_flat_kernel(%arg0: i32, %arg1: i32, %arg2: i32, %arg3: memref<1x640x64xbf16, #tpu.memory_space<vmem>>, %arg4: memref<1x640x64xbf16, #tpu.memory_space<vmem>>, %arg5: memref<9x64x64xbf16, #tpu.memory_space<vmem>>, %arg6: memref<1x64xf32, #tpu.memory_space<vmem>>, %arg7: memref<1x640x64xbf16, #tpu.memory_space<vmem>>, %arg8: memref<1280x64xbf16, #tpu.memory_space<vmem>>) attributes {dimension_semantics = [#tpu.dimension_semantics<parallel>, #tpu.dimension_semantics<parallel>, #tpu.dimension_semantics<parallel>], iteration_bounds = array<i64: 1, 1, 2>, scalar_prefetch = 0 : i64, scratch_operands = 1 : i64, tpu.core_type = #tpu.core_type<tc>, window_params = [{transform_indices = @transform_0, window_bounds = array<i64: 1, 640, 64>}, {transform_indices = @transform_1, window_bounds = array<i64: 1, 640, 64>}, {transform_indices = @transform_2, window_bounds = array<i64: 9, 64, 64>}, {transform_indices = @transform_3, window_bounds = array<i64: 1, 64>}, {transform_indices = @transform_4, window_bounds = array<i64: 1, 640, 64>}]} {
    %c0 = arith.constant 0 : index
    %c0_0 = arith.constant 0 : index
    %c0_1 = arith.constant 0 : index
    %0 = vector.load %arg3[%c0, %c0_0, %c0_1] : memref<1x640x64xbf16, #tpu.memory_space<vmem>>, vector<1x640x64xbf16>
    %1 = vector.shape_cast %0 : vector<1x640x64xbf16> to vector<640x64xbf16>
    %c0_2 = arith.constant 0 : index
    %c0_3 = arith.constant 0 : index
    %2 = vector.load %arg8[%c0_2, %c0_3] : memref<1280x64xbf16, #tpu.memory_space<vmem>>, vector<640x64xbf16>
    tpu.vector_store %arg8[%c0_2, %c0_3], %1 {strides = array<i32>} : memref<1280x64xbf16, #tpu.memory_space<vmem>>, vector<640x64xbf16>,
    %c0_4 = arith.constant 0 : index
    %c0_5 = arith.constant 0 : index
    %c0_6 = arith.constant 0 : index
    %3 = vector.load %arg4[%c0_4, %c0_5, %c0_6] : memref<1x640x64xbf16, #tpu.memory_space<vmem>>, vector<1x640x64xbf16>
    %4 = vector.shape_cast %3 : vector<1x640x64xbf16> to vector<640x64xbf16>
    %c640 = arith.constant 640 : index
    %c0_7 = arith.constant 0 : index
    %5 = vector.load %arg8[%c640, %c0_7] : memref<1280x64xbf16, #tpu.memory_space<vmem>>, vector<640x64xbf16>
    tpu.vector_store %arg8[%c640, %c0_7], %4 {strides = array<i32>} : memref<1280x64xbf16, #tpu.memory_space<vmem>>, vector<640x64xbf16>,
    %c0_8 = arith.constant 0 : index
    %c0_9 = arith.constant 0 : index
    %6 = vector.load %arg8[%c0_8, %c0_9] : memref<1280x64xbf16, #tpu.memory_space<vmem>>, vector<640x64xbf16>
    %c0_10 = arith.constant 0 : index
    %c0_11 = arith.constant 0 : index
    %c0_12 = arith.constant 0 : index
    %7 = vector.load %arg5[%c0_10, %c0_11, %c0_12] : memref<9x64x64xbf16, #tpu.memory_space<vmem>>, vector<1x64x64xbf16>
    %8 = vector.shape_cast %7 : vector<1x64x64xbf16> to vector<64x64xbf16>
    %cst = arith.constant dense<0.000000e+00> : vector<640x64xf32>
    %9 = tpu.matmul %6, %8, %cst {dimension_numbers = #tpu.dot_dimension_numbers<[1], [0], [0], [1], [0, 0, 1, 1], [], []>} : vector<640x64xbf16>, vector<64x64xbf16>, vector<640x64xf32> -> vector<640x64xf32>
    %c1 = arith.constant 1 : index
    %c0_13 = arith.constant 0 : index
    %10 = vector.load %arg8[%c1, %c0_13] : memref<1280x64xbf16, #tpu.memory_space<vmem>>, vector<640x64xbf16>
    %c1_14 = arith.constant 1 : index
    %c0_15 = arith.constant 0 : index
    %c0_16 = arith.constant 0 : index
    %11 = vector.load %arg5[%c1_14, %c0_15, %c0_16] : memref<9x64x64xbf16, #tpu.memory_space<vmem>>, vector<1x64x64xbf16>
    %12 = vector.shape_cast %11 : vector<1x64x64xbf16> to vector<64x64xbf16>
    %cst_17 = arith.constant dense<0.000000e+00> : vector<640x64xf32>
    %13 = tpu.matmul %10, %12, %cst_17 {dimension_numbers = #tpu.dot_dimension_numbers<[1], [0], [0], [1], [0, 0, 1, 1], [], []>} : vector<640x64xbf16>, vector<64x64xbf16>, vector<640x64xf32> -> vector<640x64xf32>
    %14 = arith.addf %9, %13 : vector<640x64xf32>
    %c2 = arith.constant 2 : index
    %c0_18 = arith.constant 0 : index
    %15 = vector.load %arg8[%c2, %c0_18] : memref<1280x64xbf16, #tpu.memory_space<vmem>>, vector<640x64xbf16>
    %c2_19 = arith.constant 2 : index
    %c0_20 = arith.constant 0 : index
    %c0_21 = arith.constant 0 : index
    %16 = vector.load %arg5[%c2_19, %c0_20, %c0_21] : memref<9x64x64xbf16, #tpu.memory_space<vmem>>, vector<1x64x64xbf16>
    %17 = vector.shape_cast %16 : vector<1x64x64xbf16> to vector<64x64xbf16>
    %cst_22 = arith.constant dense<0.000000e+00> : vector<640x64xf32>
    %18 = tpu.matmul %15, %17, %cst_22 {dimension_numbers = #tpu.dot_dimension_numbers<[1], [0], [0], [1], [0, 0, 1, 1], [], []>} : vector<640x64xbf16>, vector<64x64xbf16>, vector<640x64xf32> -> vector<640x64xf32>
    %19 = arith.addf %14, %18 : vector<640x64xf32>
    %c32 = arith.constant 32 : index
    %c0_23 = arith.constant 0 : index
    %20 = vector.load %arg8[%c32, %c0_23] : memref<1280x64xbf16, #tpu.memory_space<vmem>>, vector<640x64xbf16>
    %c3 = arith.constant 3 : index
    %c0_24 = arith.constant 0 : index
    %c0_25 = arith.constant 0 : index
    %21 = vector.load %arg5[%c3, %c0_24, %c0_25] : memref<9x64x64xbf16, #tpu.memory_space<vmem>>, vector<1x64x64xbf16>
    %22 = vector.shape_cast %21 : vector<1x64x64xbf16> to vector<64x64xbf16>
    %cst_26 = arith.constant dense<0.000000e+00> : vector<640x64xf32>
    %23 = tpu.matmul %20, %22, %cst_26 {dimension_numbers = #tpu.dot_dimension_numbers<[1], [0], [0], [1], [0, 0, 1, 1], [], []>} : vector<640x64xbf16>, vector<64x64xbf16>, vector<640x64xf32> -> vector<640x64xf32>
    %24 = arith.addf %19, %23 : vector<640x64xf32>
    %c33 = arith.constant 33 : index
    %c0_27 = arith.constant 0 : index
    %25 = vector.load %arg8[%c33, %c0_27] : memref<1280x64xbf16, #tpu.memory_space<vmem>>, vector<640x64xbf16>
    %c4 = arith.constant 4 : index
    %c0_28 = arith.constant 0 : index
    %c0_29 = arith.constant 0 : index
    %26 = vector.load %arg5[%c4, %c0_28, %c0_29] : memref<9x64x64xbf16, #tpu.memory_space<vmem>>, vector<1x64x64xbf16>
    %27 = vector.shape_cast %26 : vector<1x64x64xbf16> to vector<64x64xbf16>
    %cst_30 = arith.constant dense<0.000000e+00> : vector<640x64xf32>
    %28 = tpu.matmul %25, %27, %cst_30 {dimension_numbers = #tpu.dot_dimension_numbers<[1], [0], [0], [1], [0, 0, 1, 1], [], []>} : vector<640x64xbf16>, vector<64x64xbf16>, vector<640x64xf32> -> vector<640x64xf32>
    %29 = arith.addf %24, %28 : vector<640x64xf32>
    %c34 = arith.constant 34 : index
    %c0_31 = arith.constant 0 : index
    %30 = vector.load %arg8[%c34, %c0_31] : memref<1280x64xbf16, #tpu.memory_space<vmem>>, vector<640x64xbf16>
    %c5 = arith.constant 5 : index
    %c0_32 = arith.constant 0 : index
    %c0_33 = arith.constant 0 : index
    %31 = vector.load %arg5[%c5, %c0_32, %c0_33] : memref<9x64x64xbf16, #tpu.memory_space<vmem>>, vector<1x64x64xbf16>
    %32 = vector.shape_cast %31 : vector<1x64x64xbf16> to vector<64x64xbf16>
    %cst_34 = arith.constant dense<0.000000e+00> : vector<640x64xf32>
    %33 = tpu.matmul %30, %32, %cst_34 {dimension_numbers = #tpu.dot_dimension_numbers<[1], [0], [0], [1], [0, 0, 1, 1], [], []>} : vector<640x64xbf16>, vector<64x64xbf16>, vector<640x64xf32> -> vector<640x64xf32>
    %34 = arith.addf %29, %33 : vector<640x64xf32>
    %c64 = arith.constant 64 : index
    %c0_35 = arith.constant 0 : index
    %35 = vector.load %arg8[%c64, %c0_35] : memref<1280x64xbf16, #tpu.memory_space<vmem>>, vector<640x64xbf16>
    %c6 = arith.constant 6 : index
    %c0_36 = arith.constant 0 : index
    %c0_37 = arith.constant 0 : index
    %36 = vector.load %arg5[%c6, %c0_36, %c0_37] : memref<9x64x64xbf16, #tpu.memory_space<vmem>>, vector<1x64x64xbf16>
    %37 = vector.shape_cast %36 : vector<1x64x64xbf16> to vector<64x64xbf16>
    %cst_38 = arith.constant dense<0.000000e+00> : vector<640x64xf32>
    %38 = tpu.matmul %35, %37, %cst_38 {dimension_numbers = #tpu.dot_dimension_numbers<[1], [0], [0], [1], [0, 0, 1, 1], [], []>} : vector<640x64xbf16>, vector<64x64xbf16>, vector<640x64xf32> -> vector<640x64xf32>
    %39 = arith.addf %34, %38 : vector<640x64xf32>
    %c65 = arith.constant 65 : index
    %c0_39 = arith.constant 0 : index
    %40 = vector.load %arg8[%c65, %c0_39] : memref<1280x64xbf16, #tpu.memory_space<vmem>>, vector<640x64xbf16>
    %c7 = arith.constant 7 : index
    %c0_40 = arith.constant 0 : index
    %c0_41 = arith.constant 0 : index
    %41 = vector.load %arg5[%c7, %c0_40, %c0_41] : memref<9x64x64xbf16, #tpu.memory_space<vmem>>, vector<1x64x64xbf16>
    %42 = vector.shape_cast %41 : vector<1x64x64xbf16> to vector<64x64xbf16>
    %cst_42 = arith.constant dense<0.000000e+00> : vector<640x64xf32>
    %43 = tpu.matmul %40, %42, %cst_42 {dimension_numbers = #tpu.dot_dimension_numbers<[1], [0], [0], [1], [0, 0, 1, 1], [], []>} : vector<640x64xbf16>, vector<64x64xbf16>, vector<640x64xf32> -> vector<640x64xf32>
    %44 = arith.addf %39, %43 : vector<640x64xf32>
    %c66 = arith.constant 66 : index
    %c0_43 = arith.constant 0 : index
    %45 = vector.load %arg8[%c66, %c0_43] : memref<1280x64xbf16, #tpu.memory_space<vmem>>, vector<640x64xbf16>
    %c8 = arith.constant 8 : index
    %c0_44 = arith.constant 0 : index
    %c0_45 = arith.constant 0 : index
    %46 = vector.load %arg5[%c8, %c0_44, %c0_45] : memref<9x64x64xbf16, #tpu.memory_space<vmem>>, vector<1x64x64xbf16>
    %47 = vector.shape_cast %46 : vector<1x64x64xbf16> to vector<64x64xbf16>
    %cst_46 = arith.constant dense<0.000000e+00> : vector<640x64xf32>
    %48 = tpu.matmul %45, %47, %cst_46 {dimension_numbers = #tpu.dot_dimension_numbers<[1], [0], [0], [1], [0, 0, 1, 1], [], []>} : vector<640x64xbf16>, vector<64x64xbf16>, vector<640x64xf32> -> vector<640x64xf32>
    %49 = arith.addf %44, %48 : vector<640x64xf32>
    %c0_47 = arith.constant 0 : index
    %c0_48 = arith.constant 0 : index
    %50 = vector.load %arg6[%c0_47, %c0_48] : memref<1x64xf32, #tpu.memory_space<vmem>>, vector<1x64xf32>
    %51 = vector.broadcast %50 : vector<1x64xf32> to vector<640x64xf32>
    %52 = arith.addf %49, %51 : vector<640x64xf32>
    %cst_49 = arith.constant 0.000000e+00 : f32
    %53 = vector.broadcast %cst_49 : f32 to vector<640x64xf32>
    %54 = arith.maximumf %52, %53 : vector<640x64xf32>
    %55 = arith.truncf %54 : vector<640x64xf32> to vector<640x64xbf16>
    %c0_50 = arith.constant 0 : index
    %c0_51 = arith.constant 0 : index
    %c0_52 = arith.constant 0 : index
    %56 = vector.load %arg7[%c0_50, %c0_51, %c0_52] : memref<1x640x64xbf16, #tpu.memory_space<vmem>>, vector<1x640x64xbf16>
    %57 = vector.shape_cast %56 : vector<1x640x64xbf16> to vector<640x64xbf16>
    %58 = vector.shape_cast %55 : vector<640x64xbf16> to vector<1x640x64xbf16>
    tpu.vector_store %arg7[%c0_50, %c0_51, %c0_52], %58 {strides = array<i32>} : memref<1x640x64xbf16, #tpu.memory_space<vmem>>, vector<1x640x64xbf16>,
    return
  }
  func.func @transform_0(%arg0: i32, %arg1: i32, %arg2: i32) -> (i32, i32, i32) {
    %c0_i32 = arith.constant 0 : i32
    %c0_i32_0 = arith.constant 0 : i32
    return %arg0, %arg2, %c0_i32 : i32, i32, i32
  }
  func.func @transform_1(%arg0: i32, %arg1: i32, %arg2: i32) -> (i32, i32, i32) {
    %c1_i32 = arith.constant 1 : i32
    %0 = arith.addi %arg2, %c1_i32 : i32
    %c0_i32 = arith.constant 0 : i32
    %c0_i32_0 = arith.constant 0 : i32
    return %arg0, %0, %c0_i32 : i32, i32, i32
  }
  func.func @transform_2(%arg0: i32, %arg1: i32, %arg2: i32) -> (i32, i32, i32) {
    %c0_i32 = arith.constant 0 : i32
    %c0_i32_0 = arith.constant 0 : i32
    %c0_i32_1 = arith.constant 0 : i32
    return %c0_i32, %c0_i32_0, %arg1 : i32, i32, i32
  }
  func.func @transform_3(%arg0: i32, %arg1: i32, %arg2: i32) -> (i32, i32) {
    %c0_i32 = arith.constant 0 : i32
    %c0_i32_0 = arith.constant 0 : i32
    return %c0_i32, %arg1 : i32, i32
  }
  func.func @transform_4(%arg0: i32, %arg1: i32, %arg2: i32) -> (i32, i32, i32) {
    %c0_i32 = arith.constant 0 : i32
    return %arg0, %arg2, %arg1 : i32, i32, i32
  }
}

</mosaic_0001>

<bundles_post_ra>
// kernel: tpu_custom_call.1
= control target key start
LH: loop header
LB: loop body
LE: loop exit
PB: predicated region body
PF: predicated region fallthrough
CT: control target
= control target key end

     0   :  { %s13509_s0 = inlined_call_operand.hbm [shape: bf16[1,1920,64], index: 0, kind: input, shape index: {}]   ;;  %s13510_s1 = inlined_call_operand.hbm [shape: bf16[1,1920,64], index: 1, kind: input, shape index: {}]   ;;  %s13511_s2 = inlined_call_operand.hbm [shape: bf16[9,64,64], index: 2, kind: input, shape index: {}]   ;;  %s13512_s3 = inlined_call_operand.hbm [shape: f32[1,64], index: 3, kind: input, shape index: {}]   ;;  %s13513_s4 = inlined_call_operand.hbm [shape: bf16[1,1280,64], index: 4, kind: output, shape index: {}]  }
   0x1   :  { %13561 = sst [smem:[#allocation46_spill]] %s13509_s0 }
   0x2   :  { %13562 = sst [smem:[#allocation47_spill]] %s13511_s2 }
   0x3   :  { %13563 = sst [smem:[#allocation48_spill]] %s13512_s3 }
   0x4   :  { %9 = vsyncpa [#allocation4], 0 }
   0x5   :  { %11 = vsyncpa [#allocation4 + $0x1], 0 }
   0x6   :  { %12 = vsyncpa [#allocation7], 0 }
   0x7   :  { %14 = vsyncpa [#allocation7 + $0x1], 0 }
   0x8   :  { %15 = vsyncpa [#allocation10], 0 }
   0x9   :  { %16 = vsyncpa [#allocation5], 0 }
   0xa   :  { %18 = vsyncpa [#allocation5 + $0x1], 0  ;;  %s11438_s15 = smov 0   ;;  %s11440_s16 = smov 0  }
   0xb   :  { %s11442_s17 = smov 0   ;;  %s11444_s18 = smov 0  }
   0xc   :  { %s11446_s19 = smov 0   ;;  %s11448_s20 = smov 0  }
   0xd   :  { %s11450_s21 = smov 0   ;;  %s11452_s22 = smov 0  }
   0xe   :  { %s11454_s23 = smov 0  }
   0xf LB: > { %13564 = sst [smem:[#allocation17_spill]] %s11398_s22  ;;  %s11482_s24 = sadd.s32 4294967295, %s11402_s23   ;;  %s11402_s23 = sphi %s11454_s23, %s24_s23   ;;  %s11398_s22 = sphi %s11452_s22, %s13648_s22   ;;  %s11394_s21 = sphi %s11450_s21, %s13647_s21   ;;  %s11390_s20 = sphi %s11448_s20, %s13654_s20   ;;  %s11386_s19 = sphi %s11446_s19, %s13653_s19   ;;  %s11382_s18 = sphi %s11444_s18, %s13652_s18   ;;  %s11378_s17 = sphi %s11442_s17, %s13651_s17   ;;  %s11374_s16 = sphi %s11440_s16, %s13650_s16   ;;  %s11370_s15 = sphi %s11438_s15, %s13649_s15  }
  0x10   : > { %s8403_s25 = sadd.s32 4294967294, %s11402_s23   ;;  %p65_p0 = scmp.ne.s32.totalorder %s11386_s19, %s11382_s18 }
  0x11   : > { %p13514_p1 = scmp.eq.s32.totalorder %s11482_s24, 0  ;;  %p95_p2 = scmp.ne.s32.totalorder %s11374_s16, %s11370_s15 }
  0x12   : > { %p181_p5 = scmp.eq.s32.totalorder %s8403_s25, 1  ;;  %p8404_p7 = scmp.ge.s32.totalorder %s11402_s23, 1 }
  0x13   : > { %p11492_p4 = por %p13514_p1, %p65_p0  ;;  %p11498_p6 = por %p95_p2, %p13514_p1 }
  0x14   : > { %p11503_p8 = por %p181_p5, %p65_p0  ;;  %p188_p9 = scmp.lt.s32.totalorder %s11402_s23, 3 }
  0x15   : > { %s13565_s26 = scalar_select %p11492_p4, 1, 0 }
  0x16   : > { %s13566_s27 = scalar_select %p11498_p6, 1, 0 }
  0x17   : > { %s13567_s28 = scalar_select %p11503_p8, 1, 0 }
  0x18   : > { %p11508_p10 = pnand %p8404_p7, %p188_p9  ;;  %s11404_s30 = smov [#allocation8]  }
  0x19   : > { %13568 = sst [smem:[#allocation18_spill]] %s13567_s28  ;;  %s202_s5 = sshll.u32 %s11404_s30, 4  ;;  %s11512_s5 = int_to_ptr.vmem [resolvable:$true] %s202_s5 }
  0x1a   : > { %p10909_p11 = pneg %p11508_p10  ;;  %s11405_s7 = smov [#allocation9]  }
  0x1b   : > { %s218_s8 = sshll.u32 %s11405_s7, 4  ;;  %s13571_s2 = sld [smem:[#allocation47_spill]]  ;;  %s11523_s8 = int_to_ptr.vmem [resolvable:$true] %s218_s8 }
  0x1c   : > { %p11519_p13 = pnand %p10909_p11, %p13514_p1 }
  0x1e   : > { %p11169_p2 = pneg %p11519_p13 }
  0x21   : > { %s11167_s11 = scalar_lea.hbm %s13571_s2, 4608 }
  0x22   : > { %p11168_p0 = scmp.ne.s32.totalorder %s13571_s2, %s11167_s11  ;;  %p11174_p9 = scmp.lt.u32.totalorder %s11167_s11, %s13571_s2 }
  0x24   : > { %p11170_p5 = pnand %p11169_p2, %p11168_p0 }
  0x26   : > { %p11171_p7 = pneg %p11170_p5 }
  0x28   : > { %p11176_p11 = pnand %p11174_p9, %p11171_p7 }
  0x2a   : > { %11179 = shalt.err (!%p11176_p11)
}
  0x2b   : > { %s11180_s25 = scalar_lea.vmem %s11512_s5, 4608  ;;  %p11188_p8 = scmp.lt.s32.totalorder %s11512_s5, %s11512_s5 }
  0x2c   : > { %p11181_p12 = scmp.ne.s32.totalorder %s11512_s5, %s11180_s25  ;;  %p11189_p0 = scmp.lt.s32.totalorder %s11180_s25, %s11180_s25 }
  0x2e   : > { %p11183_p1 = pnand %p11181_p12, %p11169_p2  ;;  %p11190_p5 = por %p11189_p0, %p11188_p8 }
  0x30   : > { %p11184_p3 = pneg %p11183_p1 }
  0x32   : > { %p11191_p6 = pnand %p11190_p5, %p11184_p3 }
  0x34   : > { %11194 = shalt.err (!%p11191_p6)
}
  0x35   : > { %s13517_s30 = smov 64   ;;  %s13519_s7 = smov 4  }
  0x36   : > { %10912 = dma.hbm_to_vmem [thread:$0]  (!%p11519_p13), %s13571_s2, 4608, %s11512_s5, [#allocation7], %s13517_s30, %s13517_s30, %s13519_s7  }
  0x37   : > { %s13572_s3 = sld [smem:[#allocation48_spill]] }
  0x3d   : > { %s11195_s13 = scalar_lea.hbm %s13572_s3, 16 }
  0x3e   : > { %p11196_p1 = scmp.ne.s32.totalorder %s13572_s3, %s11195_s13  ;;  %p11202_p8 = scmp.lt.u32.totalorder %s11195_s13, %s13572_s3 }
  0x40   : > { %p11198_p3 = pnand %p11196_p1, %p11169_p2 }
  0x42   : > { %p11199_p6 = pneg %p11198_p3 }
  0x44   : > { %p11204_p12 = pnand %p11202_p8, %p11199_p6 }
  0x46   : > { %11207 = shalt.err (!%p11204_p12)
}
  0x47   : > { %s11208_s5 = scalar_lea.vmem %s11523_s8, 16  ;;  %s11215_s9 = scalar_lea.vmem %s11523_s8, 32 }
  0x48   : > { %p11209_p7 = scmp.ne.s32.totalorder %s11523_s8, %s11208_s5  ;;  %p11216_p0 = scmp.lt.s32.totalorder %s11523_s8, %s11523_s8 }
  0x49   : > { %p11217_p5 = scmp.lt.s32.totalorder %s11215_s9, %s11208_s5 }
  0x4a   : > { %p11211_p9 = pnand %p11209_p7, %p11169_p2 }
  0x4b   : > { %p11218_p1 = por %p11217_p5, %p11216_p0 }
  0x4c   : > { %p11212_p11 = pneg %p11211_p9 }
  0x4e   : > { %p11219_p3 = pnand %p11218_p1, %p11212_p11 }
  0x50   : > { %11222 = shalt.err (!%p11219_p3)
}
  0x51   : > { %10915 = dma.hbm_to_vmem [thread:$0]  (!%p11519_p13), %s13572_s3, 16, %s11523_s8, [#allocation10]  }
  0x52   : > { %s36_s11 = sadd.s32 1, %s11398_s22  ;;  %s52_s12 = sadd.s32 1, %s11390_s20 }
  0x53   : > { %p37_p2 = scmp.ge.s32.totalorder %s36_s11, 2  ;;  %p59_p6 = scmp.ne.s32.totalorder %s11390_s20, %s11386_s19 }
  0x54   : > { %p13524_p8 = scmp.eq.s32.totalorder %s11402_s23, 0  ;;  %p13523_p12 = scmp.lt.s32.totalorder %s11402_s23, 2 }
  0x55   : > { %s11587_s6 = scalar_select %p37_p2, 0, %s36_s11  }
  0x56   : > { %p61_p7 = por %p13524_p8, %p59_p6  ;;  %p13574_p9 = scmp.eq.s32.totalorder %s11482_s24, 1 }
  0x57   : > { %13573 = sst [smem:[#allocation19_spill]] %s11587_s6  ;;  %s48_s8 = ssub.s32 %s11398_s22, %s11587_s6 }
  0x58   : > { %p11593_p11 = por %p13574_p9, %p59_p6  ;;  %s76_s14 = sadd.s32 1, %s11587_s6 }
  0x59   : > { %p50_p13 = scmp.eq.s32.totalorder %s48_s8, 0  ;;  %s11600_s15 = ssub.s32 %s36_s11, %s76_s14 }
  0x5a   : > { %s13575_s13 = scalar_select %p11593_p11, 1, 0 }
  0x5b   : > { %s229_s25 = sand.u32 1, %s11390_s20   ;;  %s13521_s28 = smul.u32 5120, %s11398_s22 }
  0x5c   : > { %s11605_s5 = scalar_select %p50_p13, %s11390_s20, %s52_s12  }
  0x5d   : > { %s10891_s9 = smul.u32 320, %s229_s25  ;;  %p11610_p5 = pnand %p13523_p12, %p61_p7 }
  0x5e   : > { %13576 = sst [smem:[#allocation20_spill]] %s11605_s5  ;;  %s13578_s0 = sld [smem:[#allocation46_spill]] }
  0x5f   : > { %s233_s12 = scalar_lea.vmem [#allocation3], %s10891_s9  ;;  %s11623_s14 = scalar_lea.sflag [#allocation4], %s229_s25 }
  0x60   : > { %s242_s8 = sshll.u32 %s233_s12, 4  ;;  %p11225_p3 = pneg %p11610_p5  ;;  %s11621_s8 = int_to_ptr.vmem [resolvable:$true] %s242_s8 }
  0x64   : > { %s11619_s11 = scalar_lea.hbm %s13578_s0, %s13521_s28  ;;  %s11228_s28 = scalar_lea.hbm %s13578_s0, 15360 }
  0x65   : > { %s11223_s2 = scalar_lea.hbm %s11619_s11, 5120  ;;  %p11229_p7 = scmp.lt.u32.totalorder %s11619_s11, %s13578_s0 }
  0x66   : > { %p11224_p1 = scmp.ne.s32.totalorder %s11619_s11, %s11223_s2  ;;  %p11230_p9 = scmp.lt.u32.totalorder %s11228_s28, %s11223_s2 }
  0x67   : > { %p11232_p12 = scmp.lt.u32.totalorder %s11223_s2, %s11619_s11 }
  0x68   : > { %p11226_p2 = pnand %p11225_p3, %p11224_p1  ;;  %p11231_p13 = por %p11230_p9, %p11229_p7 }
  0x6a   : > { %p11227_p6 = pneg %p11226_p2  ;;  %p11233_p8 = por %p11232_p12, %p11231_p13 }
  0x6c   : > { %p11234_p0 = pnand %p11233_p8, %p11227_p6 }
  0x6e   : > { %11237 = shalt.err (!%p11234_p0)
}
  0x6f   : > { %s11238_s25 = scalar_lea.vmem %s11621_s8, 5120  ;;  %s11408_s9 = smov [#allocation3]  }
  0x70   : > { %p11239_p1 = scmp.ne.s32.totalorder %s11621_s8, %s11238_s25  ;;  %s11243_s12 = sshll.u32 %s11408_s9, 4  ;;  %s11244_s12 = int_to_ptr.vmem [resolvable:$false] %s11243_s12 }
  0x71   : > { %s11245_s3 = scalar_lea.vmem %s11244_s12, 10240  ;;  %p11246_p4 = scmp.lt.s32.totalorder %s11621_s8, %s11244_s12 }
  0x72   : > { %p11241_p2 = pnand %p11239_p1, %p11225_p3  ;;  %p11247_p7 = scmp.lt.s32.totalorder %s11245_s3, %s11238_s25 }
  0x74   : > { %p11242_p11 = pneg %p11241_p2  ;;  %p11248_p9 = por %p11247_p7, %p11246_p4 }
  0x76   : > { %p11249_p12 = pnand %p11248_p9, %p11242_p11 }
  0x78   : > { %11252 = shalt.err (!%p11249_p12)
}
  0x79   : > { %s13579_s2 = smov 4   ;;  %s13580_s6 = smov 64  }
  0x7a   : > { %10919 = dma.hbm_to_vmem [thread:$0]  (!%p11610_p5), %s11619_s11, 5120, %s11621_s8, %s11623_s14, %s13580_s6, %s13580_s6, %s13579_s2  }
  0x7b   : > { %s82_s28 = sadd.s32 1, %s11378_s17  ;;  %p89_p4 = scmp.ne.s32.totalorder %s11378_s17, %s11374_s16 }
  0x7c   : > { %p13581_p8 = scmp.eq.s32.totalorder %s11600_s15, 0  ;;  %p13582_p11 = scmp.eq.s32.totalorder %s11402_s23, 0 }
  0x7d   : > { %s252_s30 = sand.u32 1, %s11402_s23   ;;  %s254_s7 = sand.u32 1, %s11378_s17  }
  0x7e   : > { %s11660_s10 = scalar_select %p13581_p8, %s11378_s17, %s82_s28  }
  0x7f   : > { %p91_p0 = por %p89_p4, %p13582_p11  ;;  %s13583_s25 = smul.u32 5120, %s11398_s22 }
  0x80   : > { %s10892_s0 = smul.u32 320, %s254_s7  ;;  %p13584_p3 = scmp.lt.s32.totalorder %s11402_s23, 2 }
  0x81   : > { %s8311_s3 = scalar_lea.hbm %s13510_s1, %s13583_s25  ;;  %s11681_s14 = scalar_lea.sflag [#allocation7], %s252_s30 }
  0x82   : > { %p11673_p6 = pnand %p13584_p3, %p91_p0  ;;  %s11677_s15 = scalar_lea.hbm %s8311_s3, 5120 }
  0x83   : > { %s256_s11 = scalar_lea.vmem [#allocation6], %s10892_s0  ;;  %s11283_s28 = scalar_lea.hbm %s8311_s3, 10240 }
  0x84   : > { %s266_s8 = sshll.u32 %s256_s11, 4  ;;  %p11254_p5 = scmp.ne.s32.totalorder %s11677_s15, %s11283_s28  ;;  %s11679_s8 = int_to_ptr.vmem [resolvable:$true] %s266_s8 }
  0x85   : > { %p11255_p13 = pneg %p11673_p6  ;;  %s11258_s9 = scalar_lea.hbm %s13510_s1, 15360 }
  0x86   : > { %p11259_p7 = scmp.lt.u32.totalorder %s11677_s15, %s13510_s1  ;;  %p11260_p9 = scmp.lt.u32.totalorder %s11258_s9, %s11283_s28 }
  0x87   : > { %p11256_p1 = pnand %p11255_p13, %p11254_p5  ;;  %p11262_p4 = scmp.lt.u32.totalorder %s11283_s28, %s11677_s15 }
  0x88   : > { %p11261_p12 = por %p11260_p9, %p11259_p7 }
  0x89   : > { %p11257_p2 = pneg %p11256_p1 }
  0x8a   : > { %p11263_p8 = por %p11262_p4, %p11261_p12 }
  0x8c   : > { %p11264_p11 = pnand %p11263_p8, %p11257_p2 }
  0x8e   : > { %11267 = shalt.err (!%p11264_p11)
}
  0x8f   : > { %s11268_s0 = scalar_lea.vmem %s11679_s8, 5120  ;;  %s11409_s30 = smov [#allocation6]  }
  0x90   : > { %p11269_p0 = scmp.ne.s32.totalorder %s11679_s8, %s11268_s0  ;;  %s11273_s3 = sshll.u32 %s11409_s30, 4  ;;  %s11274_s3 = int_to_ptr.vmem [resolvable:$false] %s11273_s3 }
  0x91   : > { %s11275_s22 = scalar_lea.vmem %s11274_s3, 10240  ;;  %p11276_p1 = scmp.lt.s32.totalorder %s11679_s8, %s11274_s3 }
  0x92   : > { %p11271_p3 = pnand %p11269_p0, %p11255_p13  ;;  %p11277_p7 = scmp.lt.s32.totalorder %s11275_s22, %s11268_s0 }
  0x94   : > { %p11272_p5 = pneg %p11271_p3  ;;  %p11278_p9 = por %p11277_p7, %p11276_p1 }
  0x96   : > { %p11279_p12 = pnand %p11278_p9, %p11272_p5 }
  0x98   : > { %11282 = shalt.err (!%p11279_p12)
}
  0x99   : > { %10922 = dma.hbm_to_vmem [thread:$0]  (!%p11673_p6), %s11677_s15, 5120, %s11679_s8, %s11681_s14, %s13580_s6, %s13580_s6, %s13579_s2  }
  0x9a   : > { %278 = sbr.rel (%p11508_p10) target bundleno = 1149 (0x47d), region = 36 }
  0xa1   : > { %s11714_s11 = sand.u32 1, %s11386_s19   ;;  %p13586_p13 = scmp.ne.s32.totalorder %s13565_s26, 0 }
  0xa2   : > { %s10893_s28 = smul.u32 320, %s11714_s11  ;;  %s281_s7 = scalar_lea.sflag [#allocation4], %s11714_s11 }
  0xa4   : > { %s11720_s5 = scalar_lea.vmem [#allocation3], %s10893_s28 }
  0xa5   : > { %11349 = dma.done.wait (%p13586_p13), %s281_s7, 5120  }
  0xa6   : > { %11351 = vsyncadd (%p13586_p13), %s281_s7, 4294962176  ;;  %s289_s29 = sand.u32 1, %s11482_s24   ;;  %s291_s2 = sand.u32 1, %s11374_s16  }
  0xa7   : > { %s10894_s6 = smul.u32 320, %s291_s2  ;;  %s290_s15 = scalar_lea.sflag [#allocation7], %s289_s29 }
  0xa8   : > { %p13587_p10 = scmp.ne.s32.totalorder %s13566_s27, 0 }
  0xa9   : > { %s11728_s8 = scalar_lea.vmem [#allocation6], %s10894_s6 }
  0xaa   : > { %11353 = dma.done.wait (%p13587_p10), %s290_s15, 5120  }
  0xab   : > { %11355 = vsyncadd (%p13587_p10), %s290_s15, 4294962176  ;;  %p13588_p6 = scmp.eq.s32.totalorder %s11482_s24, 0 }
  0xad   : > { %11357 = dma.done.wait (%p13588_p6), [#allocation7], 4608   ;;  %p13589_p2 = pmov %p13588_p6 }
  0xaf   : > { %11359 = vsyncadd (%p13589_p2), [#allocation7], 4294962688  ;;  %p13590_p4 = pmov %p13589_p2 }
  0xb0   : > { %p13591_p8 = pmov %p13589_p2 }
  0xb1   : > { %11361 = dma.done.wait (%p13590_p4), [#allocation10], 16  }
  0xb2   : > { %11363 = vsyncadd (%p13591_p8), [#allocation10], 4294967280  ;;  %vm656_vm0 = vcmask 523264   ;;  %v11046_v0 = vld [vmem:[#allocation8 + $0x20] sm:$0xff]   ;;  %v11048_v2 = vld [vmem:[#allocation8 + $0x28] sm:$0xff]   ;;  %vm2445_vm2 = vcmask 1046528  }
  0xb3   : > { %v11047_v1 = vld [vmem:[#allocation8 + $0x80] sm:$0xff]   ;;  %9451 = vmatprep.subr.bf16.mxu1 %v11046_v0  ;;  %v11049_v3 = vld [vmem:[#allocation8 + $0x88] sm:$0xff]   ;;  %v11050_v4 = vld [vmem:[#allocation8 + $0x30] sm:$0xff]   ;;  %vm1115_vm1 = vsmask.f32 7424  ;;  %vm8163_vm3 = vcmask 519168  }
  0xb4   : > { %9803 = vmatprep.subr.bf16.mxu0 %v11047_v1  ;;  %9452 = vmatpush3.bf16.msra.mxu1 %v11046_v0  ;;  %v11051_v5 = vld [vmem:[#allocation8 + $0x90] sm:$0xff]   ;;  %v11052_v6 = vld [vmem:[#allocation8 + $0x38] sm:$0xff]   ;;  %v11054_v8 = vld [vmem:[%s11720_s5] sm:$0xff]   ;;  %s13171_s24 = scalar_lea.vmem [#allocation11], %s10893_s28  ;;  %s9054_s26 = smul.u32 5120, %s11394_s21 }
  0xb5   : > { %9804 = vmatpush3.bf16.msra.mxu0 %v11047_v1  ;;  %9453 = vmatprep.subr.bf16.mxu1 %v11048_v2  ;;  %v11053_v7 = vld [vmem:[#allocation8 + $0x98] sm:$0xff]   ;;  %v11055_v9 = vld [vmem:[%s11720_s5 + $0x8] sm:$0xff]   ;;  %657 = vst.msk [vmem:[#allocation2] sm:$0xff] %vm656_vm0, %v11054_v8  ;;  %v11056_v10 = vld [vmem:[%s11720_s5 + $0x10] sm:$0xff]   ;;  %s8261_s27 = sshll.u32 %s13171_s24, 4  ;;  %s8245_s21 = scalar_lea.sflag [#allocation5], %s11714_s11  ;;  %s13445_s27 = int_to_ptr.vmem [resolvable:$true] %s8261_s27 }
  0xb6   : > { %9805 = vmatprep.subr.bf16.mxu0 %v11049_v3  ;;  %658 = vst.msk [vmem:[#allocation2 + $0x8] sm:$0xff] %vm656_vm0, %v11055_v9  ;;  %v11057_v11 = vld [vmem:[%s11720_s5 + $0x18] sm:$0xff]   ;;  %v11748_v12 = vld [vmem:[#allocation8] sm:$0xff]   ;;  %659 = vst.msk [vmem:[#allocation2 + $0x10] sm:$0xff] %vm656_vm0, %v11056_v10  ;;  %s13443_s9 = scalar_lea.hbm %s13513_s4, %s9054_s26  ;;  %s11284_s12 = scalar_lea.vmem %s13445_s27, 5120 }
  0xb7   : > { %660 = vst.msk [vmem:[#allocation2 + $0x18] sm:$0xff] %vm656_vm0, %v11057_v11  ;;  %v11059_v13 = vld [vmem:[%s11720_s5 + $0x20] sm:$0xff]   ;;  %v11061_v15 = vld [vmem:[%s11720_s5 + $0x28] sm:$0xff]   ;;  %v11062_v16 = vld [vmem:[%s11720_s5 + $0x30] sm:$0xff]   ;;  %p11285_p11 = scmp.ne.s32.totalorder %s13445_s27, %s11284_s12  ;;  %p13642_p0 = scmp.ne.s32.totalorder %s13575_s13, 0 }
  0xb8   : > { %9454 = vmatpush3.bf16.msra.mxu1 %v11048_v2  ;;  %v11753_v14 = vld [vmem:[#allocation8 + $0xa0] sm:$0xff]   ;;  %661 = vst.msk [vmem:[#allocation2 + $0x20] sm:$0xff] %vm656_vm0, %v11059_v13  ;;  %662 = vst.msk [vmem:[#allocation2 + $0x28] sm:$0xff] %vm656_vm0, %v11061_v15  ;;  %v11063_v17 = vld [vmem:[%s11720_s5 + $0x38] sm:$0xff]   ;;  %s11410_s0 = smov [#allocation11]  }
  0xb9   : > { %9806 = vmatpush3.bf16.msra.mxu0 %v11049_v3  ;;  %9455 = vmatprep.subr.bf16.mxu1 %v11050_v4  ;;  %663 = vst.msk [vmem:[#allocation2 + $0x30] sm:$0xff] %vm656_vm0, %v11062_v16  ;;  %664 = vst.msk [vmem:[#allocation2 + $0x38] sm:$0xff] %vm656_vm0, %v11063_v17  ;;  %v11064_v26 = vld [vmem:[%s11720_s5 + $0x40] sm:$0xff]   ;;  %v11066_v41 = vld [vmem:[%s11720_s5 + $0x48] sm:$0xff]   ;;  %p11286_p3 = pnand %p11285_p11, %p13642_p0  ;;  %s11288_s30 = sshll.u32 %s11410_s0, 4  ;;  %s11289_s30 = int_to_ptr.vmem [resolvable:$false] %s11288_s30 }
  0xba   : > { %9807 = vmatprep.subr.bf16.mxu0 %v11051_v5  ;;  %665 = vst.msk [vmem:[#allocation2 + $0x40] sm:$0xff] %vm656_vm0, %v11064_v26  ;;  %v11065_v47 = vld [vmem:[#allocation8 + $0xa8] sm:$0xff]   ;;  %v11067_v48 = vld [vmem:[%s11720_s5 + $0x50] sm:$0xff]   ;;  %666 = vst.msk [vmem:[#allocation2 + $0x48] sm:$0xff] %vm656_vm0, %v11066_v41  ;;  %s11290_s3 = scalar_lea.vmem %s11289_s30, 10240  ;;  %p11291_p1 = scmp.lt.s32.totalorder %s13445_s27, %s11289_s30 }
  0xbb   : > { %v11068_v53 = vld [vmem:[%s11720_s5 + $0x58] sm:$0xff]   ;;  %667 = vst.msk [vmem:[#allocation2 + $0x50] sm:$0xff] %vm656_vm0, %v11067_v48  ;;  %v11069_v61 = vld [vmem:[%s11720_s5 + $0x60] sm:$0xff]   ;;  %v11070_v62 = vld [vmem:[%s11720_s5 + $0x68] sm:$0xff]   ;;  %p11287_p5 = pneg %p11286_p3  ;;  %p11292_p7 = scmp.lt.s32.totalorder %s11290_s3, %s11284_s12 }
  0xbc   : > { %9456 = vmatpush3.bf16.msra.mxu1 %v11050_v4  ;;  %v1057_v18 = vld [vmem:[#allocation2] sm:$0xff]  ;;  %668 = vst.msk [vmem:[#allocation2 + $0x58] sm:$0xff] %vm656_vm0, %v11068_v53  ;;  %v11071_v0 = vld [vmem:[#allocation8 + $0x8] sm:$0xff]   ;;  %669 = vst.msk [vmem:[#allocation2 + $0x60] sm:$0xff] %vm656_vm0, %v11069_v61 }
  0xbd   : > { %9808 = vmatpush3.bf16.msra.mxu0 %v11051_v5  ;;  %9457 = vmatprep.subr.bf16.mxu1 %v11052_v6  ;;  %v1058_v19 = vld [vmem:[#allocation2 + $0x8] sm:$0xff]  ;;  %v1117_v20 = vshrl.u32 %v1057_v18, 16  ;;  %v1119_v21 = vshll.u32 %v1057_v18, 16  ;;  %v3730_v24 = vld [vmem:[#allocation2 + $0x10] sm:$0xff]  ;;  %670 = vst.msk [vmem:[#allocation2 + $0x68] sm:$0xff] %vm656_vm0, %v11070_v62  ;;  %v11075_v16 = vld [vmem:[%s11720_s5 + $0x80] sm:$0xff]   ;;  %p11293_p9 = por %p11292_p7, %p11291_p1 }
  0xbe   : > { %9809 = vmatprep.subr.bf16.mxu0 %v11053_v7  ;;  %v1124_v22 = vshll.u32 %v1058_v19, 16  ;;  %v1128_v23 = vshrl.u32 %v1058_v19, 16  ;;  %v11764_v25 = vld [vmem:[#allocation2 + $0x18] sm:$0xff]  ;;  %v3781_v29 = vshrl.u32 %v3730_v24, 16  ;;  %v3783_v30 = vshll.u32 %v3730_v24, 16  ;;  %v11076_v17 = vld [vmem:[%s11720_s5 + $0x88] sm:$0xff]  }
  0xbf   : > { %v1121_v27 = vrot.slane %v1119_v21, 1  ;;  %v3788_v31 = vshll.u32 %v11764_v25, 16  ;;  %v3792_v32 = vshrl.u32 %v11764_v25, 16  ;;  %v11769_v33 = vld [vmem:[#allocation2 + $0x20] sm:$0xff]  ;;  %v11773_v39 = vld [vmem:[#allocation2 + $0x28] sm:$0xff]  ;;  %673 = vst.msk [vmem:[#allocation2 + $0x80] sm:$0xff] %vm656_vm0, %v11075_v16  ;;  %p11294_p12 = pnand %p11293_p9, %p11287_p5 }
  0xc0   : > { %9458 = vmatpush3.bf16.msra.mxu1 %v11052_v6  ;;  %v1126_v28 = vrot.slane %v1124_v22, 1  ;;  %v3785_v36 = vrot.slane %v3783_v30, 1  ;;  %v3796_v37 = vshll.u32 %v11769_v33, 16  ;;  %v3800_v40 = vshrl.u32 %v11769_v33, 16  ;;  %v11779_v46 = vld [vmem:[#allocation2 + $0x30] sm:$0xff]  ;;  %v11785_v52 = vld [vmem:[#allocation2 + $0x38] sm:$0xff] }
  0xc1   : > { %9810 = vmatpush3.bf16.msra.mxu0 %v11053_v7  ;;  %9539 = vmatprep.subr.bf16.mxu1 %v11748_v12  ;;  %v1122_v34 = vor.u32 %v1121_v27, %v1117_v20  ;;  %v3790_v38 = vrot.slane %v3788_v31, 1  ;;  %v3804_v50 = vshll.u32 %v11773_v39, 16  ;;  %v3808_v51 = vshrl.u32 %v11773_v39, 16  ;;  %v11805_v3 = vld [vmem:[#allocation2 + $0x40] sm:$0xff]  ;;  %v11072_v6 = vld [vmem:[%s11720_s5 + $0x70] sm:$0xff]   ;;  %v11812_v9 = vld [vmem:[#allocation2 + $0x48] sm:$0xff] }
  0xc2   : > { %9891 = vmatprep.subr.bf16.mxu0 %v11753_v14  ;;  %v1130_v35 = vor.u32 %v1128_v23, %v1126_v28  ;;  %v3786_v43 = vor.u32 %v3785_v36, %v3781_v29  ;;  %v3798_v45 = vrot.slane %v3796_v37, 1  ;;  %v3812_v56 = vshll.u32 %v11779_v46, 16  ;;  %v11073_v7 = vld [vmem:[#allocation8 + $0xb0] sm:$0xff]   ;;  %671 = vst.msk [vmem:[#allocation2 + $0x70] sm:$0xff] %vm656_vm0, %v11072_v6  ;;  %674 = vst.msk [vmem:[#allocation2 + $0x88] sm:$0xff] %vm656_vm0, %v11076_v17  ;;  %v11078_v27 = vld [vmem:[#allocation8 + $0xb8] sm:$0xff]  }
  0xc3   : > { %v1127_v42 = vsel %vm1115_vm1, %v1122_v34, %v1126_v28  ;;  %v3794_v49 = vor.u32 %v3792_v32, %v3790_v38  ;;  %v3816_v57 = vshrl.u32 %v11779_v46, 16  ;;  %v3806_v59 = vrot.slane %v3804_v50, 1  ;;  %v11829_v20 = vld [vmem:[#allocation2 + $0x50] sm:$0xff]  ;;  %v11833_v24 = vld [vmem:[#allocation2 + $0x58] sm:$0xff]  ;;  %v11852_v41 = vld [vmem:[#allocation2 + $0x60] sm:$0xff] }
  0xc4   : > { %v1135_v44 = vsel %vm1115_vm1, %v1130_v35, %v3785_v36  ;;  %9459 = vmatprep.mubr.msk.bf16.mxu1 %vm656_vm0, %v1127_v42  ;;  %v3791_v54 = vsel %vm1115_vm1, %v3786_v43, %v3790_v38  ;;  %v3802_v55 = vor.u32 %v3800_v40, %v3798_v45  ;;  %v3820_v60 = vshll.u32 %v11785_v52, 16  ;;  %v11077_v23 = vld [vmem:[%s11720_s5 + $0x90] sm:$0xff]   ;;  %v11079_v30 = vld [vmem:[%s11720_s5 + $0x98] sm:$0xff]   ;;  %v11080_v35 = vld [vmem:[%s11720_s5 + $0xa0] sm:$0xff]  }
  0xc5   : > { %9460 = vmatmul.mubr.msk.bf16.vlgmr.msra.gmra.mrb[0].mxu1 %vm656_vm0, %v1135_v44  ;;  %9811 = vmatprep.mubr.msk.bf16.mxu0 %vm656_vm0, %v3791_v54  ;;  %v3799_v58 = vsel %vm1115_vm1, %v3794_v49, %v3798_v45  ;;  %v3814_v63 = vrot.slane %v3812_v56, 1  ;;  %v3810_v2 = vor.u32 %v3808_v51, %v3806_v59  ;;  %v3828_v8 = vshll.u32 %v11805_v3, 16  ;;  %675 = vst.msk [vmem:[#allocation2 + $0x90] sm:$0xff] %vm656_vm0, %v11077_v23  ;;  %v11081_v36 = vld [vmem:[%s11720_s5 + $0xa8] sm:$0xff]   ;;  %v11082_v38 = vld [vmem:[%s11720_s5 + $0xb0] sm:$0xff]   ;;  %v11856_v45 = vld [vmem:[#allocation8 + $0xc0] sm:$0xff]  }
  0xc6   : > { %9540 = vmatpush3.bf16.msra.mxu1 %v11748_v12  ;;  %9812 = vmatmul.mubr.msk.bf16.vlgmr.msra.gmra.mrb[0].mxu0 %vm656_vm0, %v3799_v58  ;;  %v3807_v1 = vsel %vm1115_vm1, %v3802_v55, %v3806_v59  ;;  %v3822_v5 = vrot.slane %v3820_v60, 1  ;;  %v3824_v11 = vshrl.u32 %v11785_v52, 16  ;;  %v11074_v12 = vld [vmem:[%s11720_s5 + $0x78] sm:$0xff]   ;;  %v3836_v15 = vshll.u32 %v11812_v9, 16  ;;  %676 = vst.msk [vmem:[#allocation2 + $0x98] sm:$0xff] %vm656_vm0, %v11079_v30  ;;  %677 = vst.msk [vmem:[#allocation2 + $0xa0] sm:$0xff] %vm656_vm0, %v11080_v35 }
  0xc7   : > { %9463 = vmatprep.mubr.msk.bf16.mxu1 %vm656_vm0, %v3791_v54  ;;  %9892 = vmatpush3.bf16.msra.mxu0 %v11753_v14  ;;  %v3818_v4 = vor.u32 %v3816_v57, %v3814_v63  ;;  %v3815_v10 = vsel %vm1115_vm1, %v3810_v2, %v3814_v63  ;;  %v3832_v14 = vshrl.u32 %v11805_v3, 16  ;;  %672 = vst.msk [vmem:[#allocation2 + $0x78] sm:$0xff] %vm656_vm0, %v11074_v12  ;;  %v3830_v18 = vrot.slane %v3828_v8, 1  ;;  %v11083_v42 = vld [vmem:[#allocation8 + $0x10] sm:$0xff]   ;;  %v11085_v48 = vld [vmem:[%s11720_s5 + $0xb8] sm:$0xff]   ;;  %v11086_v56 = vld [vmem:[%s11720_s5 + $0xc0] sm:$0xff]  }
  0xc8   : > { %9815 = vmatprep.mubr.msk.bf16.mxu0 %vm656_vm0, %v3807_v1  ;;  %9893 = vmatprep.subr.bf16.mxu0 %v11065_v47  ;;  %v3826_v19 = vor.u32 %v3824_v11, %v3822_v5  ;;  %v3838_v22 = vrot.slane %v3836_v15, 1  ;;  %v3844_v26 = vshll.u32 %v11829_v20, 16  ;;  %v3840_v29 = vshrl.u32 %v11812_v9, 16  ;;  %678 = vst.msk [vmem:[#allocation2 + $0xa8] sm:$0xff] %vm656_vm0, %v11081_v36  ;;  %679 = vst.msk [vmem:[#allocation2 + $0xb0] sm:$0xff] %vm656_vm0, %v11082_v38  ;;  %v11088_v61 = vld [vmem:[%s11720_s5 + $0xd0] sm:$0xff]  }
  0xc9   : > { %9541 = vmatprep.subr.bf16.mxu1 %v11071_v0  ;;  %v3823_v13 = vsel %vm1115_vm1, %v3818_v4, %v3822_v5  ;;  %v3834_v21 = vor.u32 %v3832_v14, %v3830_v18  ;;  %v3848_v32 = vshrl.u32 %v11829_v20, 16  ;;  %v3852_v34 = vshll.u32 %v11833_v24, 16  ;;  %680 = vst.msk [vmem:[#allocation2 + $0xb8] sm:$0xff] %vm656_vm0, %v11085_v48  ;;  %v11875_v60 = vld [vmem:[#allocation2 + $0x70] sm:$0xff]  ;;  %681 = vst.msk [vmem:[#allocation2 + $0xc0] sm:$0xff] %vm656_vm0, %v11086_v56  ;;  %v11090_v4 = vld [vmem:[%s11720_s5 + $0xe0] sm:$0xff]  }
  0xca   : > { %9542 = vmatpush3.bf16.msra.mxu1 %v11071_v0  ;;  %v3831_v28 = vsel %vm1115_vm1, %v3826_v19, %v3830_v18  ;;  %v3846_v37 = vrot.slane %v3844_v26, 1  ;;  %v3842_v40 = vor.u32 %v3840_v29, %v3838_v22  ;;  %v3856_v49 = vshrl.u32 %v11833_v24, 16  ;;  %683 = vst.msk [vmem:[#allocation2 + $0xd0] sm:$0xff] %vm656_vm0, %v11088_v61  ;;  %685 = vst.msk [vmem:[#allocation2 + $0xe0] sm:$0xff] %vm656_vm0, %v11090_v4  ;;  %v11091_v11 = vld [vmem:[%s11720_s5 + $0xe8] sm:$0xff]   ;;  %v11900_v15 = vld [vmem:[#allocation2 + $0x80] sm:$0xff] }
  0xcb   : > { %9894 = vmatpush3.bf16.msra.mxu0 %v11065_v47  ;;  %v3839_v31 = vsel %vm1115_vm1, %v3834_v21, %v3838_v22  ;;  %v3854_v44 = vrot.slane %v3852_v34, 1  ;;  %v11858_v47 = vld [vmem:[#allocation2 + $0x68] sm:$0xff]  ;;  %9543 = vmatprep.subr.bf16.mxu1 %v11083_v42  ;;  %v3860_v50 = vshll.u32 %v11852_v41, 16  ;;  %v3864_v54 = vshrl.u32 %v11852_v41, 16  ;;  %686 = vst.msk [vmem:[#allocation2 + $0xe8] sm:$0xff] %vm656_vm0, %v11091_v11  ;;  %v11093_v16 = vld [vmem:[%s11720_s5 + $0xf8] sm:$0xff]  }
  0xcc   : > { %9895 = vmatprep.subr.bf16.mxu0 %v11073_v7  ;;  %v3850_v43 = vor.u32 %v3848_v32, %v3846_v37  ;;  %v3847_v51 = vsel %vm1115_vm1, %v3842_v40, %v3846_v37  ;;  %v3868_v55 = vshll.u32 %v11858_v47, 16  ;;  %v3876_v2 = vshll.u32 %v11875_v60, 16  ;;  %v11094_v19 = vld [vmem:[%s11720_s5 + $0x100] sm:$0xff]   ;;  %v11905_v21 = vld [vmem:[#allocation2 + $0x88] sm:$0xff]  ;;  %688 = vst.msk [vmem:[#allocation2 + $0xf8] sm:$0xff] %vm656_vm0, %v11093_v16  ;;  %v11095_v22 = vld [vmem:[#allocation8 + $0x18] sm:$0xff]  }
  0xcd   : > { %9464 = vmatmul.mubr.msk.bf16.gmra.mrb[4].mxu1 %vm656_vm0, %v3799_v58  ;;  %v3862_v57 = vrot.slane %v3860_v50, 1  ;;  %v11087_v58 = vld [vmem:[%s11720_s5 + $0xc8] sm:$0xff]   ;;  %v3858_v59 = vor.u32 %v3856_v49, %v3854_v44  ;;  %v3872_v6 = vshrl.u32 %v11858_v47, 16  ;;  %v3892_v23 = vshll.u32 %v11900_v15, 16  ;;  %689 = vst.msk [vmem:[#allocation2 + $0x100] sm:$0xff] %vm656_vm0, %v11094_v19  ;;  %v11098_v32 = vld [vmem:[%s11720_s5 + $0x110] sm:$0xff]  }
  0xce   : > { %9467 = vmatprep.mubr.msk.bf16.mxu1 %vm656_vm0, %v3807_v1  ;;  %9816 = vmatmul.mubr.msk.bf16.gmra.mrb[4].mxu0 %vm656_vm0, %v3815_v10  ;;  %v3855_v53 = vsel %vm1115_vm1, %v3850_v43, %v3854_v44  ;;  %v3870_v63 = vrot.slane %v3868_v55, 1  ;;  %v11879_v0 = vld [vmem:[#allocation2 + $0x78] sm:$0xff]  ;;  %682 = vst.msk [vmem:[#allocation2 + $0xc8] sm:$0xff] %vm656_vm0, %v11087_v58  ;;  %v3878_v12 = vrot.slane %v3876_v2, 1  ;;  %v3896_v29 = vshrl.u32 %v11900_v15, 16  ;;  %v11923_v37 = vld [vmem:[#allocation2 + $0x90] sm:$0xff] }
  0xcf   : > { %9819 = vmatprep.mubr.msk.bf16.mxu0 %vm656_vm0, %v3823_v13  ;;  %9896 = vmatpush3.bf16.msra.mxu0 %v11073_v7  ;;  %v3866_v62 = vor.u32 %v3864_v54, %v3862_v57  ;;  %v11089_v1 = vld [vmem:[%s11720_s5 + $0xd8] sm:$0xff]   ;;  %v3863_v5 = vsel %vm1115_vm1, %v3858_v59, %v3862_v57  ;;  %v3880_v7 = vshrl.u32 %v11875_v60, 16  ;;  %v3900_v30 = vshll.u32 %v11905_v21, 16  ;;  %691 = vst.msk [vmem:[#allocation2 + $0x110] sm:$0xff] %vm656_vm0, %v11098_v32  ;;  %v11100_v43 = vld [vmem:[%s11720_s5 + $0x120] sm:$0xff]   ;;  %v11101_v54 = vld [vmem:[%s11720_s5 + $0x128] sm:$0xff]  }
  0xd0   : > { %9897 = vmatprep.subr.bf16.mxu0 %v11078_v27  ;;  %9544 = vmatpush3.bf16.msra.mxu1 %v11083_v42  ;;  %684 = vst.msk [vmem:[#allocation2 + $0xd8] sm:$0xff] %vm656_vm0, %v11089_v1  ;;  %v3874_v14 = vor.u32 %v3872_v6, %v3870_v63  ;;  %v3894_v34 = vrot.slane %v3892_v23, 1  ;;  %v11099_v35 = vld [vmem:[%s11720_s5 + $0x118] sm:$0xff]   ;;  %v3908_v44 = vshll.u32 %v11923_v37, 16  ;;  %v3904_v49 = vshrl.u32 %v11905_v21, 16  ;;  %693 = vst.msk [vmem:[#allocation2 + $0x120] sm:$0xff] %vm656_vm0, %v11100_v43 }
  0xd1   : > { %v3871_v8 = vsel %vm1115_vm1, %v3866_v62, %v3870_v63  ;;  %v3882_v17 = vor.u32 %v3880_v7, %v3878_v12  ;;  %9545 = vmatprep.subr.bf16.mxu1 %v11095_v22  ;;  %v3902_v40 = vrot.slane %v3900_v30, 1  ;;  %692 = vst.msk [vmem:[#allocation2 + $0x118] sm:$0xff] %vm656_vm0, %v11099_v35  ;;  %v11927_v42 = vld [vmem:[#allocation2 + $0x98] sm:$0xff]  ;;  %v11102_v55 = vld [vmem:[%s11720_s5 + $0x130] sm:$0xff]   ;;  %694 = vst.msk [vmem:[#allocation2 + $0x128] sm:$0xff] %vm656_vm0, %v11101_v54 }
  0xd2   : > { %v3879_v26 = vsel %vm1115_vm1, %v3874_v14, %v3878_v12  ;;  %v3898_v38 = vor.u32 %v3896_v29, %v3894_v34  ;;  %v3910_v56 = vrot.slane %v3908_v44, 1  ;;  %695 = vst.msk [vmem:[#allocation2 + $0x130] sm:$0xff] %vm656_vm0, %v11102_v55  ;;  %v11103_v57 = vld [vmem:[%s11720_s5 + $0x138] sm:$0xff]   ;;  %v11946_v59 = vld [vmem:[#allocation2 + $0xa0] sm:$0xff]  ;;  %v11949_v1 = vld [vmem:[#allocation2 + $0xa8] sm:$0xff]  ;;  %v3920_v4 = vshrl.u32 %v11927_v42, 16 }
  0xd3   : > { %9898 = vmatpush3.bf16.msra.mxu0 %v11078_v27  ;;  %v3888_v27 = vshrl.u32 %v11879_v0, 16  ;;  %v3906_v58 = vor.u32 %v3904_v49, %v3902_v40  ;;  %v11104_v61 = vld [vmem:[%s11728_s8] sm:$0xff]   ;;  %696 = vst.msk [vmem:[#allocation2 + $0x138] sm:$0xff] %vm656_vm0, %v11103_v57  ;;  %v3928_v7 = vshrl.u32 %v11946_v59, 16  ;;  %v11971_v23 = vld [vmem:[#allocation2 + $0xb8] sm:$0xff]  ;;  %v4737_v44 = vrot.slane %v11773_v39, 1 }
  0xd4   : > { %9979 = vmatprep.subr.bf16.mxu0 %v11856_v45  ;;  %9546 = vmatpush3.bf16.msra.mxu1 %v11095_v22  ;;  %v3903_v50 = vsel %vm1115_vm1, %v3898_v38, %v3902_v40  ;;  %v11952_v2 = vld [vmem:[#allocation8 + $0x40] sm:$0xff]   ;;  %1017 = vst.msk [vmem:[#allocation2 + $0x140] sm:$0xff] %vm656_vm0, %v11104_v61  ;;  %v3936_v22 = vshrl.u32 %v11949_v1, 16  ;;  %v11096_v55 = vld [vmem:[#allocation8 + $0xc8] sm:$0xff]   ;;  %v12014_v57 = vld [vmem:[#allocation2 + $0xd0] sm:$0xff] }
  0xd5   : > { %9468 = vmatmul.mubr.msk.bf16.gmra.mrb[8].mxu1 %vm656_vm0, %v3815_v10  ;;  %v3884_v10 = vshll.u32 %v11879_v0, 16  ;;  %9627 = vmatprep.subr.bf16.mxu1 %v11952_v2  ;;  %v3911_v6 = vsel %vm1115_vm1, %v3906_v58, %v3910_v56  ;;  %v11995_v43 = vld [vmem:[#allocation2 + $0xc8] sm:$0xff] }
  0xd6   : > { %9471 = vmatprep.mubr.msk.bf16.mxu1 %vm656_vm0, %v3823_v13  ;;  %9820 = vmatmul.mubr.msk.bf16.gmra.mrb[8].mxu0 %vm656_vm0, %v3831_v28  ;;  %v11092_v13 = vld [vmem:[%s11720_s5 + $0xf0] sm:$0xff]  }
  0xd7   : > { %9823 = vmatprep.mubr.msk.bf16.mxu0 %vm656_vm0, %v3839_v31  ;;  %v3886_v18 = vrot.slane %v3884_v10, 1  ;;  %687 = vst.msk [vmem:[#allocation2 + $0xf0] sm:$0xff] %vm656_vm0, %v11092_v13  ;;  %v11966_v13 = vld [vmem:[#allocation2 + $0xb0] sm:$0xff] }
  0xd8   : > { %v1296_v29 = vshrl.u32 %v11966_v13, 16 }
  0xd9   : > { %v3890_v36 = vor.u32 %v3888_v27, %v3886_v18 }
  0xdb   : > { %v3895_v48 = vsel %vm1115_vm1, %v3890_v36, %v3894_v34  ;;  %v11990_v36 = vld [vmem:[#allocation2 + $0xc0] sm:$0xff] }
  0xdd   : > { %9472 = vmatmul.mubr.msk.bf16.gmra.mrb[12].mxu1 %vm656_vm0, %v3831_v28  ;;  %v3887_v28 = vsel %vm1115_vm1, %v3882_v17, %v3886_v18  ;;  %v4681_v17 = vld [vmem:[#allocation2 + $0x10] sm:$0xfe]  ;;  %v3940_v18 = vshll.u32 %v11966_v13, 16 }
  0xde   : > { %9475 = vmatprep.mubr.msk.bf16.mxu1 %vm656_vm0, %v3839_v31  ;;  %9824 = vmatmul.mubr.msk.bf16.gmra.mrb[12].mxu0 %vm656_vm0, %v3847_v51  ;;  %v11097_v31 = vld [vmem:[%s11720_s5 + $0x108] sm:$0xff]   ;;  %v4732_v27 = vrot.slane %v4681_v17, 1  ;;  %v12040_v17 = vld [vmem:[#allocation2 + $0xe0] sm:$0xff] }
  0xdf   : > { %9827 = vmatprep.mubr.msk.bf16.mxu0 %vm656_vm0, %v3855_v53  ;;  %690 = vst.msk [vmem:[#allocation2 + $0x108] sm:$0xff] %vm656_vm0, %v11097_v31  ;;  %v11979_v30 = vrot.slane %v3940_v18, 1  ;;  %v1300_v31 = vshll.u32 %v11971_v23, 16 }
  0xe1   : > { %13592 = vst [vmem:[#allocation21_spill] sm:$0xff] %v11979_v30  ;;  %v1298_v38 = vor.u32 %v11979_v30, %v1296_v29  ;;  %v1302_v40 = vrot.slane %v1300_v31, 1  ;;  %v11109_v29 = vld [vmem:[%s11728_s8 + $0x8] sm:$0xff]  }
  0xe2   : > { %1018 = vst.msk [vmem:[#allocation2 + $0x148] sm:$0xff] %vm656_vm0, %v11109_v29 }
  0xe3   : > { %v1303_v49 = vsel %vm1115_vm1, %v1298_v38, %v1302_v40  ;;  %v1344_v38 = vshrl.u32 %v12040_v17, 16 }
  0xe5   : > { %9476 = vmatmul.mubr.msk.bf16.gmra.mrb[16].mxu1 %vm656_vm0, %v3847_v51  ;;  %v3912_v51 = vshrl.u32 %v11923_v37, 16 }
  0xe6   : > { %9479 = vmatprep.mubr.msk.bf16.mxu1 %vm656_vm0, %v3855_v53  ;;  %9828 = vmatmul.mubr.msk.bf16.gmra.mrb[16].mxu0 %vm656_vm0, %v3863_v5  ;;  %v3916_v53 = vshll.u32 %v11927_v42, 16 }
  0xe7   : > { %9831 = vmatprep.mubr.msk.bf16.mxu0 %vm656_vm0, %v3871_v8  ;;  %v3914_v62 = vor.u32 %v3912_v51, %v3910_v56  ;;  %v1316_v51 = vshll.u32 %v11995_v43, 16 }
  0xe8   : > { %v3918_v63 = vrot.slane %v3916_v53, 1 }
  0xe9   : > { %v1318_v61 = vrot.slane %v1316_v51, 1  ;;  %v4747_v51 = vrot.slane %v11829_v20, 1 }
  0xea   : > { %v3919_v10 = vsel %vm1115_vm1, %v3914_v62, %v3918_v63  ;;  %v3922_v12 = vor.u32 %v3920_v4, %v3918_v63  ;;  %v4739_v62 = vrot.slane %v11779_v46, 1  ;;  %v12022_v63 = vld [vmem:[#allocation2 + $0xd8] sm:$0xff]  ;;  %v4741_v4 = vrot.slane %v11785_v52, 1 }
  0xec   : > { %v12033_v46 = vsel %vm2445_vm2, %v4737_v44, %v4739_v62  ;;  %v12037_v52 = vsel %vm2445_vm2, %v4739_v62, %v4741_v4 }
  0xed   : > { %9480 = vmatmul.mubr.msk.bf16.gmra.mrb[20].mxu1 %vm656_vm0, %v3863_v5  ;;  %v3924_v5 = vshll.u32 %v11946_v59, 16 }
  0xee   : > { %9483 = vmatprep.mubr.msk.bf16.mxu1 %vm656_vm0, %v3871_v8  ;;  %9832 = vmatmul.mubr.msk.bf16.gmra.mrb[20].mxu0 %vm656_vm0, %v3879_v26  ;;  %v3932_v8 = vshll.u32 %v11949_v1, 16 }
  0xef   : > { %9835 = vmatprep.mubr.msk.bf16.mxu0 %vm656_vm0, %v3887_v28  ;;  %v3926_v11 = vrot.slane %v3924_v5, 1  ;;  %v1324_v5 = vshll.u32 %v12014_v57, 16 }
  0xf0   : > { %v3934_v16 = vrot.slane %v3932_v8, 1  ;;  %v1320_v8 = vshrl.u32 %v11995_v43, 16 }
  0xf1   : > { %v3930_v14 = vor.u32 %v3928_v7, %v3926_v11  ;;  %v3927_v19 = vsel %vm1115_vm1, %v3922_v12, %v3926_v11  ;;  %v1332_v11 = vshll.u32 %v12022_v63, 16  ;;  %v1326_v12 = vrot.slane %v1324_v5, 1 }
  0xf2   : > { %v3938_v32 = vor.u32 %v3936_v22, %v3934_v16  ;;  %v4743_v22 = vrot.slane %v11805_v3, 1 }
  0xf4   : > { %v3943_v34 = vsel %vm1115_vm1, %v3938_v32, %v11979_v30  ;;  %v1336_v32 = vshrl.u32 %v12022_v63, 16  ;;  %v11131_v30 = vld [vmem:[#allocation2 + $0x20] sm:$0xff] }
  0xf5   : > { %9484 = vmatmul.mubr.msk.bf16.gmra.mrb[24].mxu1 %vm656_vm0, %v3879_v26  ;;  %v3935_v26 = vsel %vm1115_vm1, %v3930_v14, %v3934_v16  ;;  %v11108_v14 = vld [vmem:[#allocation8 + $0xd8] sm:$0xff]   ;;  %v1322_v16 = vor.u32 %v1320_v8, %v1318_v61  ;;  %v12092_v8 = vld [vmem:[#allocation2 + $0x100] sm:$0xff] }
  0xf6   : > { %9487 = vmatprep.mubr.msk.bf16.mxu1 %vm656_vm0, %v3887_v28  ;;  %9836 = vmatmul.mubr.msk.bf16.gmra.mrb[24].mxu0 %vm656_vm0, %v3895_v48  ;;  %v4733_v28 = vrot.slane %v11764_v25, 1  ;;  %v11988_v25 = vrot.slane %v11769_v33, 1  ;;  %v1304_v33 = vshrl.u32 %v11971_v23, 16 }
  0xf7   : > { %9839 = vmatprep.mubr.msk.bf16.mxu0 %vm656_vm0, %v3903_v50  ;;  %v1327_v31 = vsel %vm1115_vm1, %v1322_v16, %v1326_v12  ;;  %v1372_v16 = vshll.u32 %v12092_v8, 16 }
  0xf8   : > { %v4734_v35 = vsel %vm2445_vm2, %v4732_v27, %v4733_v28  ;;  %v4736_v53 = vsel %vm2445_vm2, %v4733_v28, %v11988_v25  ;;  %v12009_v54 = vsel %vm2445_vm2, %v11988_v25, %v4737_v44  ;;  %v1306_v56 = vor.u32 %v1304_v33, %v1302_v40  ;;  %v12068_v33 = vld [vmem:[#allocation2 + $0xf0] sm:$0xff] }
  0xf9   : > { %v4745_v27 = vrot.slane %v11812_v9, 1  ;;  %v1340_v28 = vshll.u32 %v12040_v17, 16  ;;  %v12060_v40 = vsel %vm2445_vm2, %v4741_v4, %v4743_v22  ;;  %v1360_v4 = vshrl.u32 %v12068_v33, 16 }
  0xfb   : > { %v12065_v9 = vsel %vm2445_vm2, %v4743_v22, %v4745_v27  ;;  %v1342_v44 = vrot.slane %v1340_v28, 1 }
  0xfd   : > { %9488 = vmatmul.mubr.msk.bf16.gmra.mrb[28].mxu1 %vm656_vm0, %v3895_v48  ;;  %v1308_v48 = vshll.u32 %v11990_v36, 16 }
  0xfe   : > { %9491 = vmatprep.mubr.msk.bf16.mxu1 %vm656_vm0, %v3903_v50  ;;  %9840 = vmatmul.mubr.msk.bf16.gmra.mrb[28].mxu0 %vm656_vm0, %v3911_v6  ;;  %v1312_v50 = vshrl.u32 %v11990_v36, 16 }
  0xff   : > { %9843 = vmatprep.mubr.msk.bf16.mxu0 %vm656_vm0, %v3919_v10  ;;  %v12011_v39 = vrot.slane %v1308_v48, 1 }
 0x101   : > { %13593 = vst [vmem:[#allocation22_spill] sm:$0xff] %v12011_v39  ;;  %v1314_v58 = vor.u32 %v1312_v50, %v12011_v39  ;;  %v1311_v7 = vsel %vm1115_vm1, %v1306_v56, %v12011_v39  ;;  %v1356_v56 = vshll.u32 %v12068_v33, 16 }
 0x105   : > { %9492 = vmatmul.mubr.msk.bf16.gmra.mrb[32].mxu1 %vm656_vm0, %v3911_v6  ;;  %v11106_v6 = vld [vmem:[#allocation8 + $0xd0] sm:$0xff]  }
 0x106   : > { %9495 = vmatprep.mubr.msk.bf16.mxu1 %vm656_vm0, %v3919_v10  ;;  %9844 = vmatmul.mubr.msk.bf16.gmra.mrb[32].mxu0 %vm656_vm0, %v3927_v19  ;;  %v1328_v10 = vshrl.u32 %v12014_v57, 16 }
 0x107   : > { %9847 = vmatprep.mubr.msk.bf16.mxu0 %vm656_vm0, %v3935_v26 }
 0x108   : > { %v1330_v18 = vor.u32 %v1328_v10, %v1326_v12  ;;  %v12099_v12 = vld [vmem:[#allocation2 + $0x108] sm:$0xff] }
 0x109   : > { %v1380_v28 = vshll.u32 %v12099_v12, 16 }
 0x10d   : > { %9496 = vmatmul.mubr.msk.bf16.gmra.mrb[36].mxu1 %vm656_vm0, %v3927_v19  ;;  %v1334_v19 = vrot.slane %v1332_v11, 1  ;;  %v4751_v11 = vrot.slane %v11852_v41, 1 }
 0x10e   : > { %9499 = vmatprep.mubr.msk.bf16.mxu1 %vm656_vm0, %v3935_v26  ;;  %9848 = vmatmul.mubr.msk.bf16.gmra.mrb[36].mxu0 %vm656_vm0, %v3943_v34  ;;  %v12047_v26 = vld [vmem:[#allocation2 + $0xe8] sm:$0xff] }
 0x10f   : > { %9899 = vmatprep.mubr.msk.bf16.mxu0 %vm656_vm0, %v4734_v35  ;;  %v1335_v35 = vsel %vm1115_vm1, %v1330_v18, %v1334_v19  ;;  %v1348_v3 = vshll.u32 %v12047_v26, 16  ;;  %v1338_v48 = vor.u32 %v1336_v32, %v1334_v19  ;;  %v1374_v32 = vrot.slane %v1372_v16, 1  ;;  %v12150_v16 = vld [vmem:[#allocation2 + $0x128] sm:$0xff] }
 0x111   : > { %v1350_v50 = vrot.slane %v1348_v3, 1  ;;  %v1382_v3 = vrot.slane %v1380_v28, 1 }
 0x115   : > { %9500 = vmatmul.mubr.msk.bf16.gmra.mrb[40].mxu1 %vm656_vm0, %v3943_v34  ;;  %v11110_v34 = vld [vmem:[%s11728_s8 + $0x10] sm:$0xff]  }
 0x116   : > { %9503 = vmatprep.mubr.msk.bf16.mxu1 %vm656_vm0, %v1303_v49  ;;  %9900 = vmatmul.mubr.msk.bf16.vlgmr.msra.gmra.mrb[0].mxu0 %vm656_vm0, %v4736_v53  ;;  %1019 = vst.msk [vmem:[#allocation2 + $0x150] sm:$0xff] %vm656_vm0, %v11110_v34  ;;  %v1346_v49 = vor.u32 %v1344_v38, %v1342_v44  ;;  %v12075_v53 = vld [vmem:[#allocation2 + $0xf8] sm:$0xff] }
 0x117   : > { %9980 = vmatpush3.bf16.msra.mxu0 %v11856_v45  ;;  %9903 = vmatprep.mubr.msk.bf16.mxu0 %vm656_vm0, %v12009_v54  ;;  %v1319_v45 = vsel %vm1115_vm1, %v1314_v58, %v1318_v61  ;;  %v1343_v58 = vsel %vm1115_vm1, %v1338_v48, %v1342_v44  ;;  %v1352_v61 = vshrl.u32 %v12047_v26, 16  ;;  %v1364_v5 = vshll.u32 %v12075_v53, 16  ;;  %v12120_v44 = vld [vmem:[#allocation8 + $0xe0] sm:$0xff]  }
 0x118   : > { %9981 = vmatprep.subr.bf16.mxu0 %v11096_v55  ;;  %v1351_v62 = vsel %vm1115_vm1, %v1346_v49, %v1350_v50  ;;  %v1368_v19 = vshrl.u32 %v12075_v53, 16  ;;  %v4755_v48 = vrot.slane %v11875_v60, 1  ;;  %v12125_v49 = vld [vmem:[#allocation2 + $0x118] sm:$0xff] }
 0x119   : > { %v1366_v10 = vrot.slane %v1364_v5, 1 }
 0x11b   : > { %9982 = vmatpush3.bf16.msra.mxu0 %v11096_v55  ;;  %v4749_v55 = vrot.slane %v11833_v24, 1  ;;  %v1358_v24 = vrot.slane %v1356_v56, 1  ;;  %v1370_v34 = vor.u32 %v1368_v19, %v1366_v10  ;;  %v1384_v56 = vshrl.u32 %v12099_v12, 16 }
 0x11c   : > { %9983 = vmatprep.subr.bf16.mxu0 %v11106_v6 }
 0x11d   : > { %9504 = vmatmul.mubr.msk.bf16.gmra.mrb[44].mxu1 %vm656_vm0, %v1311_v7  ;;  %v12089_v20 = vsel %vm2445_vm2, %v4747_v51, %v4749_v55  ;;  %v1354_v7 = vor.u32 %v1352_v61, %v1350_v50  ;;  %v12109_v29 = vsel %vm2445_vm2, %v4749_v55, %v4751_v11  ;;  %v4757_v50 = vrot.slane %v11879_v0, 1 }
 0x11e   : > { %9507 = vmatprep.mubr.msk.bf16.mxu1 %vm656_vm0, %v1319_v45  ;;  %9904 = vmatmul.mubr.msk.bf16.gmra.mrb[4].mxu0 %vm656_vm0, %v12033_v46  ;;  %v1362_v45 = vor.u32 %v1360_v4, %v1358_v24  ;;  %v1375_v55 = vsel %vm1115_vm1, %v1370_v34, %v1374_v32  ;;  %v1412_v34 = vshll.u32 %v12150_v16, 16 }
 0x11f   : > { %9907 = vmatprep.mubr.msk.bf16.mxu0 %vm656_vm0, %v12037_v52  ;;  %9984 = vmatpush3.bf16.msra.mxu0 %v11106_v6  ;;  %v12085_v6 = vsel %vm2445_vm2, %v4745_v27, %v4747_v51  ;;  %v1359_v18 = vsel %vm1115_vm1, %v1354_v7, %v1358_v24  ;;  %v1376_v27 = vshrl.u32 %v12092_v8, 16  ;;  %v12140_v5 = vsel %vm2445_vm2, %v4755_v48, %v4757_v50 }
 0x120   : > { %9985 = vmatprep.subr.bf16.mxu0 %v11108_v14  ;;  %v1367_v22 = vsel %vm1115_vm1, %v1362_v45, %v1366_v10  ;;  %v1386_v7 = vor.u32 %v1384_v56, %v1382_v3  ;;  %v12143_v45 = vld [vmem:[#allocation2 + $0x120] sm:$0xff] }
 0x121   : > { %v1378_v38 = vor.u32 %v1376_v27, %v1374_v32  ;;  %v1404_v19 = vshll.u32 %v12143_v45, 16  ;;  %v1400_v27 = vshrl.u32 %v12125_v49, 16  ;;  %v1408_v32 = vshrl.u32 %v12143_v45, 16 }
 0x123   : > { %9986 = vmatpush3.bf16.msra.mxu0 %v11108_v14  ;;  %v4753_v14 = vrot.slane %v11858_v47, 1 }
 0x124   : > { %10067 = vmatprep.subr.bf16.mxu0 %v12120_v44 }
 0x125   : > { %9508 = vmatmul.mubr.msk.bf16.gmra.mrb[48].mxu1 %vm656_vm0, %v1327_v31  ;;  %v12113_v31 = vsel %vm2445_vm2, %v4751_v11, %v4753_v14  ;;  %v12136_v4 = vsel %vm2445_vm2, %v4753_v14, %v4755_v48  ;;  %v4759_v14 = vrot.slane %v11900_v15, 1  ;;  %v1406_v48 = vrot.slane %v1404_v19, 1 }
 0x126   : > { %9511 = vmatprep.mubr.msk.bf16.mxu1 %vm656_vm0, %v1335_v35  ;;  %9908 = vmatmul.mubr.msk.bf16.gmra.mrb[8].mxu0 %vm656_vm0, %v12060_v40  ;;  %v12116_v35 = vld [vmem:[#allocation2 + $0x110] sm:$0xff] }
 0x127   : > { %9911 = vmatprep.mubr.msk.bf16.mxu0 %vm656_vm0, %v12065_v9  ;;  %v1388_v51 = vshll.u32 %v12116_v35, 16  ;;  %v1392_v61 = vshrl.u32 %v12116_v35, 16  ;;  %v1410_v56 = vor.u32 %v1408_v32, %v1406_v48 }
 0x129   : > { %v1390_v24 = vrot.slane %v1388_v51, 1 }
 0x12b   : > { %v1394_v10 = vor.u32 %v1392_v61, %v1390_v24  ;;  %v12174_v61 = vld [vmem:[#allocation2 + $0x138] sm:$0xff] }
 0x12c   : > { %v1428_v19 = vshll.u32 %v12174_v61, 16 }
 0x12d   : > { %9512 = vmatmul.mubr.msk.bf16.gmra.mrb[52].mxu1 %vm656_vm0, %v1343_v58  ;;  %v1383_v58 = vsel %vm1115_vm1, %v1378_v38, %v1382_v3  ;;  %v12160_v38 = vsel %vm2445_vm2, %v4757_v50, %v4759_v14  ;;  %v4763_v50 = vrot.slane %v11923_v37, 1 }
 0x12e   : > { %9515 = vmatprep.mubr.msk.bf16.mxu1 %vm656_vm0, %v1351_v62  ;;  %9912 = vmatmul.mubr.msk.bf16.gmra.mrb[12].mxu0 %vm656_vm0, %v12085_v6  ;;  %v1396_v62 = vshll.u32 %v12125_v49, 16 }
 0x12f   : > { %9915 = vmatprep.mubr.msk.bf16.mxu0 %vm656_vm0, %v12089_v20 }
 0x130   : > { %v1398_v11 = vrot.slane %v1396_v62, 1  ;;  %v4765_v62 = vrot.slane %v11927_v42, 1 }
 0x132   : > { %v1399_v28 = vsel %vm1115_vm1, %v1394_v10, %v1398_v11  ;;  %v1402_v51 = vor.u32 %v1400_v27, %v1398_v11  ;;  %v1416_v10 = vshrl.u32 %v12150_v16, 16  ;;  %v12188_v27 = vsel %vm2445_vm2, %v4763_v50, %v4765_v62 }
 0x135   : > { %9516 = vmatmul.mubr.msk.bf16.gmra.mrb[56].mxu1 %vm656_vm0, %v1359_v18  ;;  %v4761_v18 = vrot.slane %v11905_v21, 1 }
 0x136   : > { %9519 = vmatprep.mubr.msk.bf16.mxu1 %vm656_vm0, %v1367_v22  ;;  %9916 = vmatmul.mubr.msk.bf16.gmra.mrb[16].mxu0 %vm656_vm0, %v12109_v29  ;;  %v1391_v22 = vsel %vm1115_vm1, %v1386_v7, %v1390_v24  ;;  %v1407_v7 = vsel %vm1115_vm1, %v1402_v51, %v1406_v48  ;;  %v1430_v48 = vrot.slane %v1428_v19, 1  ;;  %v12193_v51 = vld [vmem:[#allocation2 + $0x140] sm:$0x1] }
 0x137   : > { %9919 = vmatprep.mubr.msk.bf16.mxu0 %vm656_vm0, %v12113_v31  ;;  %v12164_v3 = vsel %vm2445_vm2, %v4759_v14, %v4761_v18  ;;  %13594 = vst [vmem:[#allocation23_spill] sm:$0xff] %v12193_v51 }
 0x13d   : > { %9520 = vmatmul.mubr.msk.bf16.gmra.mrb[60].mxu1 %vm656_vm0, %v1375_v55  ;;  %v12167_v55 = vld [vmem:[#allocation2 + $0x130] sm:$0xff] }
 0x13e   : > { %9523 = vmatprep.mubr.msk.bf16.mxu1 %vm656_vm0, %v1383_v58  ;;  %9920 = vmatmul.mubr.msk.bf16.gmra.mrb[20].mxu0 %vm656_vm0, %v12136_v4  ;;  %v1414_v58 = vrot.slane %v1412_v34, 1  ;;  %v1420_v24 = vshll.u32 %v12167_v55, 16  ;;  %v1424_v14 = vshrl.u32 %v12167_v55, 16 }
 0x13f   : > { %9923 = vmatprep.mubr.msk.bf16.mxu0 %vm656_vm0, %v12140_v5 }
 0x140   : > { %v1415_v11 = vsel %vm1115_vm1, %v1410_v56, %v1414_v58  ;;  %v1418_v32 = vor.u32 %v1416_v10, %v1414_v58  ;;  %v4769_v56 = vrot.slane %v11949_v1, 1  ;;  %v1436_v58 = vshll.u32 %v12193_v51, 16 }
 0x142   : > { %v1438_v19 = vrot.slane %v1436_v58, 1 }
 0x145   : > { %9524 = vmatmul.mubr.msk.bf16.gmra.mrb[64].mxu1 %vm656_vm0, %v1391_v22  ;;  %v12184_v22 = vsel %vm2445_vm2, %v4761_v18, %v4763_v50  ;;  %v4767_v18 = vrot.slane %v11946_v59, 1 }
 0x146   : > { %9527 = vmatprep.mubr.msk.bf16.mxu1 %vm656_vm0, %v1399_v28  ;;  %9924 = vmatmul.mubr.msk.bf16.gmra.mrb[24].mxu0 %vm656_vm0, %v12160_v38  ;;  %v1422_v28 = vrot.slane %v1420_v24, 1  ;;  %v1432_v24 = vshrl.u32 %v12174_v61, 16 }
 0x147   : > { %9927 = vmatprep.mubr.msk.bf16.mxu0 %vm656_vm0, %v12164_v3  ;;  %v12204_v10 = vsel %vm2445_vm2, %v4765_v62, %v4767_v18  ;;  %v4773_v62 = vrot.slane %v11971_v23, 1 }
 0x148   : > { %v1426_v34 = vor.u32 %v1424_v14, %v1422_v28  ;;  %v1423_v50 = vsel %vm1115_vm1, %v1418_v32, %v1422_v28  ;;  %v1434_v14 = vor.u32 %v1432_v24, %v1430_v48  ;;  %v4771_v28 = vrot.slane %v11966_v13, 1 }
 0x149   : > { %v4777_v24 = vrot.slane %v11995_v43, 1 }
 0x14a   : > { %v1439_v32 = vsel %vm1115_vm1, %v1434_v14, %v1438_v19  ;;  %v12243_v19 = vld [vmem:[#allocation2 + $0x10] sm:$0xff] }
 0x14d   : > { %9528 = vmatmul.mubr.msk.bf16.gmra.mrb[68].mxu1 %vm656_vm0, %v1407_v7  ;;  %v1431_v7 = vsel %vm1115_vm1, %v1426_v34, %v1430_v48  ;;  %v12219_v34 = vsel %vm2445_vm2, %v4769_v56, %v4771_v28  ;;  %v12223_v48 = vsel %vm2445_vm2, %v4771_v28, %v4773_v62  ;;  %v11111_v28 = vld [vmem:[#allocation8 + $0x50] sm:$0xff]  }
 0x14e   : > { %9531 = vmatprep.mubr.msk.bf16.mxu1 %vm656_vm0, %v1415_v11  ;;  %9928 = vmatmul.mubr.msk.bf16.gmra.mrb[28].mxu0 %vm656_vm0, %v12184_v22  ;;  %v12208_v11 = vsel %vm2445_vm2, %v4767_v18, %v4769_v56  ;;  %v11127_v18 = vld [vmem:[#allocation2] sm:$0xff]  ;;  %v11107_v56 = vld [vmem:[#allocation8 + $0x48] sm:$0xff]  }
 0x14f   : > { %9931 = vmatprep.mubr.msk.bf16.mxu0 %vm656_vm0, %v12188_v27 }
 0x155   : > { %9532 = vmatmul.mubr.msk.bf16.gmra.mrb[72].mxu1 %vm656_vm0, %v1423_v50  ;;  %v4775_v50 = vrot.slane %v11990_v36, 1 }
 0x156   : > { %9535 = vmatprep.mubr.msk.bf16.mxu1 %vm656_vm0, %v1431_v7  ;;  %9932 = vmatmul.mubr.msk.bf16.gmra.mrb[32].mxu0 %vm656_vm0, %v12204_v10  ;;  %v12235_v7 = vld [vmem:[#allocation2 + $0x8] sm:$0xff] }
 0x157   : > { %9935 = vmatprep.mubr.msk.bf16.mxu0 %vm656_vm0, %v12208_v11  ;;  %v12233_v58 = vsel %vm2445_vm2, %v4773_v62, %v4775_v50  ;;  %v12240_v14 = vsel %vm2445_vm2, %v4775_v50, %v4777_v24  ;;  %v4779_v62 = vrot.slane %v12014_v57, 1  ;;  %v12256_v50 = vld [vmem:[#allocation2 + $0x18] sm:$0xff] }
 0x15d   : > { %9536 = vmatmul.mubr.msk.bf16.gmra.mrb[76].mxu1 %vm656_vm0, %v1439_v32  ;;  %v4781_v32 = vrot.slane %v12022_v63, 1 }
 0x15e   : > { %9547 = vmatprep.mubr.msk.bf16.mxu1 %vm656_vm0, %v11127_v18  ;;  %9936 = vmatmul.mubr.msk.bf16.gmra.mrb[36].mxu0 %vm656_vm0, %v12219_v34  ;;  %v12254_v18 = vsel %vm2445_vm2, %v4777_v24, %v4779_v62  ;;  %v4783_v24 = vrot.slane %v12040_v17, 1 }
 0x15f   : > { %9939 = vmatprep.mubr.msk.bf16.mxu0 %vm656_vm0, %v12223_v48  ;;  %13595 = vst [vmem:[#allocation24_spill] sm:$0xff] %v12254_v18  ;;  %v12261_v39 = vsel %vm2445_vm2, %v4779_v62, %v4781_v32  ;;  %v11132_v62 = vld [vmem:[#allocation2 + $0x28] sm:$0xff] }
 0x160   : > { %13596 = vst [vmem:[#allocation25_spill] sm:$0xff] %v12261_v39  ;;  %v12271_v51 = vsel %vm2445_vm2, %v4781_v32, %v4783_v24  ;;  %v4789_v32 = vrot.slane %v12075_v53, 1 }
 0x161   : > { %13597 = vst [vmem:[#allocation26_spill] sm:$0xff] %v12271_v51 }
 0x165   : > { %9548 = vmatmul.mubr.msk.bf16.vlgmr.msra.gmra.mrb[0].mxu1 %vm656_vm0, %v12235_v7 }
 0x166   : > { %9628 = vmatpush3.bf16.msra.mxu1 %v11952_v2  ;;  %9551 = vmatprep.mubr.msk.bf16.mxu1 %vm656_vm0, %v12243_v19  ;;  %v11113_v2 = vld [vmem:[#allocation8 + $0x58] sm:$0xff]  }
 0x167   : > { %9940 = vmatmul.mubr.msk.bf16.gmra.mrb[40].mxu0 %vm656_vm0, %v12233_v58  ;;  %9629 = vmatprep.subr.bf16.mxu1 %v11107_v56 }
 0x168   : > { %9943 = vmatprep.mubr.msk.bf16.mxu0 %vm656_vm0, %v12240_v14 }
 0x16a   : > { %9630 = vmatpush3.bf16.msra.mxu1 %v11107_v56  ;;  %v4785_v56 = vrot.slane %v12047_v26, 1 }
 0x16b   : > { %9631 = vmatprep.subr.bf16.mxu1 %v11111_v28 }
 0x16d   : > { %9552 = vmatmul.mubr.msk.bf16.gmra.mrb[4].mxu1 %vm656_vm0, %v12256_v50 }
 0x16e   : > { %9555 = vmatprep.mubr.msk.bf16.mxu1 %vm656_vm0, %v11131_v30  ;;  %9632 = vmatpush3.bf16.msra.mxu1 %v11111_v28  ;;  %v12275_v30 = vsel %vm2445_vm2, %v4783_v24, %v4785_v56  ;;  %v11133_v28 = vld [vmem:[#allocation2 + $0x30] sm:$0xff] }
 0x16f   : > { %9944 = vmatmul.mubr.msk.bf16.gmra.mrb[44].mxu0 %vm656_vm0, %v12254_v18  ;;  %9633 = vmatprep.subr.bf16.mxu1 %v11113_v2  ;;  %13598 = vst [vmem:[#allocation27_spill] sm:$0xff] %v12275_v30  ;;  %v11137_v18 = vld [vmem:[#allocation2 + $0x50] sm:$0xff] }
 0x170   : > { %9947 = vmatprep.mubr.msk.bf16.mxu0 %vm656_vm0, %v12261_v39 }
 0x172   : > { %9634 = vmatpush3.bf16.msra.mxu1 %v11113_v2  ;;  %v4787_v2 = vrot.slane %v12068_v33, 1 }
 0x174   : > { %v12285_v39 = vsel %vm2445_vm2, %v4785_v56, %v4787_v2  ;;  %v12289_v24 = vsel %vm2445_vm2, %v4787_v2, %v4789_v32  ;;  %v4793_v56 = vrot.slane %v12099_v12, 1 }
 0x175   : > { %9556 = vmatmul.mubr.msk.bf16.gmra.mrb[8].mxu1 %vm656_vm0, %v11132_v62  ;;  %13599 = vst [vmem:[#allocation28_spill] sm:$0xff] %v12285_v39  ;;  %v11134_v62 = vld [vmem:[#allocation2 + $0x38] sm:$0xff]  ;;  %13600 = vst [vmem:[#allocation29_spill] sm:$0xff] %v12289_v24 }
 0x176   : > { %9559 = vmatprep.mubr.msk.bf16.mxu1 %vm656_vm0, %v11133_v28  ;;  %v11135_v28 = vld [vmem:[#allocation2 + $0x40] sm:$0xff] }
 0x177   : > { %9948 = vmatmul.mubr.msk.bf16.gmra.mrb[48].mxu0 %vm656_vm0, %v12271_v51 }
 0x178   : > { %9951 = vmatprep.mubr.msk.bf16.mxu0 %vm656_vm0, %v12275_v30  ;;  %v4791_v30 = vrot.slane %v12092_v8, 1 }
 0x17a   : > { %v12299_v51 = vsel %vm2445_vm2, %v4789_v32, %v4791_v30  ;;  %v12303_v2 = vsel %vm2445_vm2, %v4791_v30, %v4793_v56  ;;  %v4795_v32 = vrot.slane %v12116_v35, 1 }
 0x17b   : > { %13601 = vst [vmem:[#allocation30_spill] sm:$0xff] %v12299_v51  ;;  %13602 = vst [vmem:[#allocation31_spill] sm:$0xff] %v12303_v2 }
 0x17c   : > { %v12316_v30 = vsel %vm2445_vm2, %v4793_v56, %v4795_v32  ;;  %v4801_v56 = vrot.slane %v12150_v16, 1 }
 0x17d   : > { %9560 = vmatmul.mubr.msk.bf16.gmra.mrb[12].mxu1 %vm656_vm0, %v11134_v62  ;;  %v11136_v62 = vld [vmem:[#allocation2 + $0x48] sm:$0xff]  ;;  %13603 = vst [vmem:[#allocation32_spill] sm:$0xff] %v12316_v30 }
 0x17e   : > { %9563 = vmatprep.mubr.msk.bf16.mxu1 %vm656_vm0, %v11135_v28  ;;  %v12305_v28 = vld [vmem:[#allocation8 + $0x60] sm:$0xff]  }
 0x17f   : > { %9952 = vmatmul.mubr.msk.bf16.gmra.mrb[52].mxu0 %vm656_vm0, %v12285_v39  ;;  %9715 = vmatprep.subr.bf16.mxu1 %v12305_v28  ;;  %v12482_v39 = vld [vmem:[#allocation2 + $0xa0] sm:$0xff] }
 0x180   : > { %9955 = vmatprep.mubr.msk.bf16.mxu0 %vm656_vm0, %v12289_v24  ;;  %v11138_v24 = vld [vmem:[#allocation2 + $0x58] sm:$0xff]  ;;  %13615 = vst [vmem:[#allocation44_spill] sm:$0xff] %v12482_v39 }
 0x185   : > { %9564 = vmatmul.mubr.msk.bf16.gmra.mrb[16].mxu1 %vm656_vm0, %v11136_v62  ;;  %v4797_v62 = vrot.slane %v12125_v49, 1 }
 0x186   : > { %9567 = vmatprep.mubr.msk.bf16.mxu1 %vm656_vm0, %v11137_v18 }
 0x187   : > { %9956 = vmatmul.mubr.msk.bf16.gmra.mrb[56].mxu0 %vm656_vm0, %v12299_v51  ;;  %v12320_v18 = vsel %vm2445_vm2, %v4795_v32, %v4797_v62  ;;  %v12346_v32 = vrot.slane %v12174_v61, 1 }
 0x188   : > { %9959 = vmatprep.mubr.msk.bf16.mxu0 %vm656_vm0, %v12303_v2  ;;  %13604 = vst [vmem:[#allocation33_spill] sm:$0xff] %v12320_v18  ;;  %v4799_v2 = vrot.slane %v12143_v45, 1 }
 0x189   : > { %13607 = vst [vmem:[#allocation36_spill] sm:$0xff] %v12346_v32 }
 0x18a   : > { %v12331_v51 = vsel %vm2445_vm2, %v4797_v62, %v4799_v2 }
 0x18b   : > { %13605 = vst [vmem:[#allocation34_spill] sm:$0xff] %v12331_v51 }
 0x18d   : > { %9568 = vmatmul.mubr.msk.bf16.gmra.mrb[20].mxu1 %vm656_vm0, %v11138_v24  ;;  %v12336_v24 = vsel %vm2445_vm2, %v4799_v2, %v4801_v56  ;;  %v12361_v2 = vld [vmem:[#allocation2 + $0x148] sm:$0xff] }
 0x18e   : > { %9571 = vmatprep.mubr.msk.bf16.mxu1 %vm656_vm0, %v11852_v41  ;;  %13606 = vst [vmem:[#allocation35_spill] sm:$0xff] %v12336_v24  ;;  %v4803_v41 = vrot.slane %v12167_v55, 1 }
 0x18f   : > { %9960 = vmatmul.mubr.msk.bf16.gmra.mrb[60].mxu0 %vm656_vm0, %v12316_v30  ;;  %v12478_v30 = vld [vmem:[#allocation2 + $0x98] sm:$0xff] }
 0x190   : > { %9963 = vmatprep.mubr.msk.bf16.mxu0 %vm656_vm0, %v12320_v18  ;;  %v12349_v62 = vsel %vm2445_vm2, %v4801_v56, %v4803_v41  ;;  %v12470_v18 = vld [vmem:[#allocation2 + $0x90] sm:$0xff]  ;;  %13614 = vst [vmem:[#allocation43_spill] sm:$0xff] %v12478_v30 }
 0x191   : > { %13608 = vst [vmem:[#allocation37_spill] sm:$0xff] %v12349_v62  ;;  %13613 = vst [vmem:[#allocation42_spill] sm:$0xff] %v12470_v18 }
 0x195   : > { %9572 = vmatmul.mubr.msk.bf16.gmra.mrb[24].mxu1 %vm656_vm0, %v11858_v47  ;;  %v12355_v47 = vsel %vm2445_vm2, %v4803_v41, %v12346_v32 }
 0x196   : > { %9575 = vmatprep.mubr.msk.bf16.mxu1 %vm656_vm0, %v11875_v60  ;;  %13609 = vst [vmem:[#allocation38_spill] sm:$0xff] %v12355_v47  ;;  %v12357_v60 = vld [vmem:[#allocation2 + $0x140] sm:$0xff] }
 0x197   : > { %9964 = vmatmul.mubr.msk.bf16.gmra.mrb[64].mxu0 %vm656_vm0, %v12331_v51  ;;  %v4807_v56 = vrot.slane %v12357_v60, 1  ;;  %v12466_v51 = vld [vmem:[#allocation2 + $0x88] sm:$0xff] }
 0x198   : > { %9967 = vmatprep.mubr.msk.bf16.mxu0 %vm656_vm0, %v12336_v24  ;;  %v3770_v24 = vld [vmem:[#allocation2 + $0x150] sm:$0x1]  ;;  %13612 = vst [vmem:[#allocation41_spill] sm:$0xff] %v12466_v51 }
 0x199   : > { %v4808_v41 = vsel %vm2445_vm2, %v12346_v32, %v4807_v56  ;;  %v12381_v32 = vld [vmem:[#allocation2 + $0x20] sm:$0xff] }
 0x19d   : > { %9576 = vmatmul.mubr.msk.bf16.gmra.mrb[28].mxu1 %vm656_vm0, %v11879_v0  ;;  %v4809_v0 = vrot.slane %v12361_v2, 1 }
 0x19e   : > { %9579 = vmatprep.mubr.msk.bf16.mxu1 %vm656_vm0, %v11900_v15 }
 0x19f   : > { %9968 = vmatmul.mubr.msk.bf16.gmra.mrb[68].mxu0 %vm656_vm0, %v12349_v62  ;;  %v4810_v15 = vsel %vm2445_vm2, %v4807_v56, %v4809_v0  ;;  %v11119_v56 = vld [vmem:[%s11728_s8 + $0x18] sm:$0xff]  }
 0x1a0   : > { %9971 = vmatprep.mubr.msk.bf16.mxu0 %vm656_vm0, %v12355_v47  ;;  %v4811_v47 = vrot.slane %v3770_v24, 1  ;;  %v11114_v24 = vld [vmem:[#allocation8 + $0xe8] sm:$0xff]   ;;  %1020 = vst.msk [vmem:[#allocation2 + $0x158] sm:$0xff] %vm656_vm0, %v11119_v56  ;;  %v12458_v56 = vld [vmem:[#allocation2 + $0x80] sm:$0xff] }
 0x1a1   : > { %13611 = vst [vmem:[#allocation40_spill] sm:$0xff] %v12458_v56 }
 0x1a2   : > { %v4812_v62 = vsel %vm2445_vm2, %v4809_v0, %v4811_v47  ;;  %v12417_v47 = vld [vmem:[#allocation2 + $0x50] sm:$0xff]  ;;  %v12427_v0 = vld [vmem:[#allocation2 + $0x58] sm:$0xff] }
 0x1a5   : > { %9580 = vmatmul.mubr.msk.bf16.gmra.mrb[32].mxu1 %vm656_vm0, %v11905_v21  ;;  %v12388_v21 = vld [vmem:[#allocation2 + $0x28] sm:$0xff] }
 0x1a6   : > { %9583 = vmatprep.mubr.msk.bf16.mxu1 %vm656_vm0, %v11923_v37  ;;  %v12392_v37 = vld [vmem:[#allocation2 + $0x30] sm:$0xff] }
 0x1a7   : > { %9972 = vmatmul.mubr.msk.bf16.gmra.mrb[72].mxu0 %vm656_vm0, %v4808_v41  ;;  %v12431_v41 = vld [vmem:[#allocation2 + $0x60] sm:$0xff] }
 0x1a8   : > { %9975 = vmatprep.mubr.msk.bf16.mxu0 %vm656_vm0, %v4810_v15  ;;  %v12439_v15 = vld [vmem:[#allocation2 + $0x68] sm:$0xff] }
 0x1ad   : > { %9584 = vmatmul.mubr.msk.bf16.gmra.mrb[36].mxu1 %vm656_vm0, %v11927_v42  ;;  %v11116_v42 = vld [vmem:[#allocation8 + $0xf0] sm:$0xff]  }
 0x1ae   : > { %9587 = vmatprep.mubr.msk.bf16.mxu1 %vm656_vm0, %v11946_v59  ;;  %v12401_v59 = vld [vmem:[#allocation2 + $0x38] sm:$0xff] }
 0x1af   : > { %9976 = vmatmul.mubr.msk.bf16.gmra.mrb[76].mxu0 %vm656_vm0, %v4812_v62  ;;  %v11118_v62 = vld [vmem:[#allocation8 + $0xf8] sm:$0xff]  }
 0x1b0   : > { %9987 = vmatprep.mubr.msk.bf16.mxu0 %vm656_vm0, %v12381_v32 }
 0x1b5   : > { %9588 = vmatmul.mubr.msk.bf16.gmra.mrb[40].mxu1 %vm656_vm0, %v11949_v1  ;;  %v12405_v1 = vld [vmem:[#allocation2 + $0x40] sm:$0xff] }
 0x1b6   : > { %9591 = vmatprep.mubr.msk.bf16.mxu1 %vm656_vm0, %v11966_v13 }
 0x1b7   : > { %9988 = vmatmul.mubr.msk.bf16.vlgmr.msra.gmra.mrb[0].mxu0 %vm656_vm0, %v12388_v21 }
 0x1b8   : > { %10068 = vmatpush3.bf16.msra.mxu0 %v12120_v44  ;;  %9991 = vmatprep.mubr.msk.bf16.mxu0 %vm656_vm0, %v12392_v37  ;;  %v12413_v44 = vld [vmem:[#allocation2 + $0x48] sm:$0xff] }
 0x1b9   : > { %10069 = vmatprep.subr.bf16.mxu0 %v11114_v24 }
 0x1bc   : > { %10070 = vmatpush3.bf16.msra.mxu0 %v11114_v24  ;;  %v12443_v24 = vld [vmem:[#allocation2 + $0x70] sm:$0xff] }
 0x1bd   : > { %9592 = vmatmul.mubr.msk.bf16.gmra.mrb[44].mxu1 %vm656_vm0, %v11971_v23  ;;  %10071 = vmatprep.subr.bf16.mxu0 %v11116_v42 }
 0x1be   : > { %9595 = vmatprep.mubr.msk.bf16.mxu1 %vm656_vm0, %v11990_v36 }
 0x1bf   : > { %9992 = vmatmul.mubr.msk.bf16.gmra.mrb[4].mxu0 %vm656_vm0, %v12401_v59 }
 0x1c0   : > { %9995 = vmatprep.mubr.msk.bf16.mxu0 %vm656_vm0, %v12405_v1  ;;  %10072 = vmatpush3.bf16.msra.mxu0 %v11116_v42  ;;  %v12449_v42 = vld [vmem:[#allocation8 + $0x100] sm:$0xff]  }
 0x1c1   : > { %10073 = vmatprep.subr.bf16.mxu0 %v11118_v62 }
 0x1c4   : > { %10074 = vmatpush3.bf16.msra.mxu0 %v11118_v62  ;;  %v12454_v62 = vld [vmem:[#allocation2 + $0x78] sm:$0xff] }
 0x1c5   : > { %9596 = vmatmul.mubr.msk.bf16.gmra.mrb[48].mxu1 %vm656_vm0, %v11995_v43  ;;  %10155 = vmatprep.subr.bf16.mxu0 %v12449_v42  ;;  %13610 = vst [vmem:[#allocation39_spill] sm:$0xff] %v12454_v62 }
 0x1c6   : > { %9599 = vmatprep.mubr.msk.bf16.mxu1 %vm656_vm0, %v12014_v57 }
 0x1c7   : > { %9996 = vmatmul.mubr.msk.bf16.gmra.mrb[8].mxu0 %vm656_vm0, %v12413_v44 }
 0x1c8   : > { %9999 = vmatprep.mubr.msk.bf16.mxu0 %vm656_vm0, %v12417_v47 }
 0x1cd   : > { %9600 = vmatmul.mubr.msk.bf16.gmra.mrb[52].mxu1 %vm656_vm0, %v12022_v63 }
 0x1ce   : > { %9603 = vmatprep.mubr.msk.bf16.mxu1 %vm656_vm0, %v12040_v17 }
 0x1cf   : > { %10000 = vmatmul.mubr.msk.bf16.gmra.mrb[12].mxu0 %vm656_vm0, %v12427_v0 }
 0x1d0   : > { %10003 = vmatprep.mubr.msk.bf16.mxu0 %vm656_vm0, %v12431_v41 }
 0x1d5   : > { %9604 = vmatmul.mubr.msk.bf16.gmra.mrb[56].mxu1 %vm656_vm0, %v12047_v26 }
 0x1d6   : > { %9607 = vmatprep.mubr.msk.bf16.mxu1 %vm656_vm0, %v12068_v33 }
 0x1d7   : > { %10004 = vmatmul.mubr.msk.bf16.gmra.mrb[16].mxu0 %vm656_vm0, %v12439_v15 }
 0x1d8   : > { %10007 = vmatprep.mubr.msk.bf16.mxu0 %vm656_vm0, %v12443_v24 }
 0x1dd   : > { %9608 = vmatmul.mubr.msk.bf16.gmra.mrb[60].mxu1 %vm656_vm0, %v12075_v53 }
 0x1de   : > { %9611 = vmatprep.mubr.msk.bf16.mxu1 %vm656_vm0, %v12092_v8 }
 0x1df   : > { %10008 = vmatmul.mubr.msk.bf16.gmra.mrb[20].mxu0 %vm656_vm0, %v12454_v62  ;;  %v2447_v62 = vrot.slane %v12235_v7, 1 }
 0x1e0   : > { %10011 = vmatprep.mubr.msk.bf16.mxu0 %vm656_vm0, %v12458_v56  ;;  %v2394_v56 = vld [vmem:[#allocation2] sm:$0xfe] }
 0x1e5   : > { %9612 = vmatmul.mubr.msk.bf16.gmra.mrb[64].mxu1 %vm656_vm0, %v12099_v12 }
 0x1e6   : > { %9615 = vmatprep.mubr.msk.bf16.mxu1 %vm656_vm0, %v12116_v35 }
 0x1e7   : > { %10012 = vmatmul.mubr.msk.bf16.gmra.mrb[24].mxu0 %vm656_vm0, %v12466_v51  ;;  %v12490_v51 = vld [vmem:[#allocation2 + $0xa8] sm:$0xff] }
 0x1e8   : > { %10015 = vmatprep.mubr.msk.bf16.mxu0 %vm656_vm0, %v12470_v18  ;;  %13616 = vst [vmem:[#allocation45_spill] sm:$0xff] %v12490_v51  ;;  %v2446_v18 = vrot.slane %v2394_v56, 1 }
 0x1ed   : > { %9616 = vmatmul.mubr.msk.bf16.gmra.mrb[68].mxu1 %vm656_vm0, %v12125_v49 }
 0x1ee   : > { %9619 = vmatprep.mubr.msk.bf16.mxu1 %vm656_vm0, %v12143_v45 }
 0x1ef   : > { %10016 = vmatmul.mubr.msk.bf16.gmra.mrb[28].mxu0 %vm656_vm0, %v12478_v30  ;;  %v2449_v30 = vrot.slane %v12243_v19, 1  ;;  %v11125_v19 = vld [vmem:[#allocation8 + $0x118] sm:$0xff]  }
 0x1f0   : > { %10019 = vmatprep.mubr.msk.bf16.mxu0 %vm656_vm0, %v12482_v39  ;;  %v2448_v39 = vsel %vm2445_vm2, %v2446_v18, %v2447_v62  ;;  %v11117_v18 = vld [vmem:[#allocation8 + $0x68] sm:$0xff]  }
 0x1f1   : > { %v2450_v7 = vsel %vm2445_vm2, %v2447_v62, %v2449_v30  ;;  %v6126_v62 = vshrl.u32 %v12427_v0, 16 }
 0x1f5   : > { %9620 = vmatmul.mubr.msk.bf16.gmra.mrb[72].mxu1 %vm656_vm0, %v12150_v16 }
 0x1f6   : > { %9623 = vmatprep.mubr.msk.bf16.mxu1 %vm656_vm0, %v12167_v55 }
 0x1f7   : > { %10020 = vmatmul.mubr.msk.bf16.gmra.mrb[32].mxu0 %vm656_vm0, %v12490_v51  ;;  %v2451_v51 = vrot.slane %v12256_v50, 1 }
 0x1f8   : > { %10023 = vmatprep.mubr.msk.bf16.mxu0 %vm656_vm0, %v11966_v13 }
 0x1f9   : > { %v2452_v13 = vsel %vm2445_vm2, %v2449_v30, %v2451_v51  ;;  %v11126_v30 = vld [vmem:[%s11728_s8 + $0x20] sm:$0xff]  }
 0x1fa   : > { %1021 = vst.msk [vmem:[#allocation2 + $0x160] sm:$0xff] %vm656_vm0, %v11126_v30 }
 0x1fd   : > { %9624 = vmatmul.mubr.msk.bf16.gmra.mrb[76].mxu1 %vm656_vm0, %v12174_v61 }
 0x1fe   : > { %9635 = vmatprep.mubr.msk.bf16.mxu1 %vm656_vm0, %v2448_v39  ;;  %v11122_v39 = vld [vmem:[#allocation8 + $0x78] sm:$0xff]  }
 0x1ff   : > { %10024 = vmatmul.mubr.msk.bf16.gmra.mrb[36].mxu0 %vm656_vm0, %v11971_v23  ;;  %v11120_v23 = vld [vmem:[#allocation8 + $0x70] sm:$0xff]  }
 0x200   : > { %10027 = vmatprep.mubr.msk.bf16.mxu0 %vm656_vm0, %v11990_v36  ;;  %v2454_v36 = vsel %vm2445_vm2, %v2451_v51, %v11988_v25  ;;  %v6069_v25 = vshll.u32 %v12381_v32, 16 }
 0x205   : > { %9636 = vmatmul.mubr.msk.bf16.vlgmr.msra.gmra.mrb[0].mxu1 %vm656_vm0, %v2450_v7  ;;  %v6134_v7 = vshrl.u32 %v12431_v41, 16 }
 0x206   : > { %9716 = vmatpush3.bf16.msra.mxu1 %v12305_v28  ;;  %9639 = vmatprep.mubr.msk.bf16.mxu1 %vm656_vm0, %v2452_v13  ;;  %v6138_v13 = vshll.u32 %v12439_v15, 16 }
 0x207   : > { %10028 = vmatmul.mubr.msk.bf16.gmra.mrb[40].mxu0 %vm656_vm0, %v11995_v43  ;;  %9717 = vmatprep.subr.bf16.mxu1 %v11117_v18  ;;  %v12529_v43 = vld [vmem:[#allocation8 + $0x80] sm:$0xff]  }
 0x208   : > { %10031 = vmatprep.mubr.msk.bf16.mxu0 %vm656_vm0, %v12014_v57  ;;  %v6067_v57 = vshrl.u32 %v12381_v32, 16 }
 0x20a   : > { %9718 = vmatpush3.bf16.msra.mxu1 %v11117_v18  ;;  %v13618_v18 = vld [vmem:[#allocation25_spill] sm:$0xff] }
 0x20b   : > { %9719 = vmatprep.subr.bf16.mxu1 %v11120_v23 }
 0x20d   : > { %9640 = vmatmul.mubr.msk.bf16.gmra.mrb[4].mxu1 %vm656_vm0, %v2454_v36 }
 0x20e   : > { %9643 = vmatprep.mubr.msk.bf16.mxu1 %vm656_vm0, %v12009_v54  ;;  %9720 = vmatpush3.bf16.msra.mxu1 %v11120_v23  ;;  %v12583_v54 = vld [vmem:[#allocation2 + $0x150] sm:$0xff] }
 0x20f   : > { %10032 = vmatmul.mubr.msk.bf16.gmra.mrb[44].mxu0 %vm656_vm0, %v12022_v63  ;;  %9721 = vmatprep.subr.bf16.mxu1 %v11122_v39  ;;  %v6071_v63 = vrot.slane %v6069_v25, 1  ;;  %v6140_v25 = vrot.slane %v6138_v13, 1 }
 0x210   : > { %10035 = vmatprep.mubr.msk.bf16.mxu0 %vm656_vm0, %v12040_v17 }
 0x212   : > { %9722 = vmatpush3.bf16.msra.mxu1 %v11122_v39 }
 0x213   : > { %10243 = vmatprep.subr.bf16.mxu1 %v12529_v43 }
 0x215   : > { %9644 = vmatmul.mubr.msk.bf16.gmra.mrb[8].mxu1 %vm656_vm0, %v12033_v46  ;;  %v6074_v46 = vshll.u32 %v12388_v21, 16 }
 0x216   : > { %9647 = vmatprep.mubr.msk.bf16.mxu1 %vm656_vm0, %v12037_v52  ;;  %v6072_v52 = vor.u32 %v6071_v63, %v6067_v57  ;;  %v6146_v57 = vshll.u32 %v12443_v24, 16 }
 0x217   : > { %10036 = vmatmul.mubr.msk.bf16.gmra.mrb[48].mxu0 %vm656_vm0, %v12047_v26  ;;  %v6076_v17 = vrot.slane %v6074_v46, 1  ;;  %v6082_v26 = vshll.u32 %v12392_v37, 16  ;;  %v6142_v46 = vshrl.u32 %v12439_v15, 16 }
 0x218   : > { %10039 = vmatprep.mubr.msk.bf16.mxu0 %vm656_vm0, %v12068_v33 }
 0x219   : > { %v6077_v33 = vsel %vm1115_vm1, %v6072_v52, %v6076_v17  ;;  %v13619_v52 = vld [vmem:[#allocation26_spill] sm:$0xff] }
 0x21d   : > { %9648 = vmatmul.mubr.msk.bf16.gmra.mrb[12].mxu1 %vm656_vm0, %v12060_v40  ;;  %v12594_v40 = vld [vmem:[#allocation2 + $0x158] sm:$0xff] }
 0x21e   : > { %9651 = vmatprep.mubr.msk.bf16.mxu1 %vm656_vm0, %v12065_v9  ;;  %v6078_v9 = vshrl.u32 %v12388_v21, 16 }
 0x21f   : > { %10040 = vmatmul.mubr.msk.bf16.gmra.mrb[52].mxu0 %vm656_vm0, %v12075_v53  ;;  %v6086_v53 = vshrl.u32 %v12392_v37, 16 }
 0x220   : > { %10043 = vmatprep.mubr.msk.bf16.mxu0 %vm656_vm0, %v12092_v8  ;;  %v6080_v8 = vor.u32 %v6078_v9, %v6076_v17  ;;  %v13620_v9 = vld [vmem:[#allocation39_spill] sm:$0xff] }
 0x225   : > { %9652 = vmatmul.mubr.msk.bf16.gmra.mrb[16].mxu1 %vm656_vm0, %v12085_v6  ;;  %v6090_v6 = vshll.u32 %v12401_v59, 16 }
 0x226   : > { %9655 = vmatprep.mubr.msk.bf16.mxu1 %vm656_vm0, %v12089_v20  ;;  %v6084_v20 = vrot.slane %v6082_v26, 1  ;;  %v6150_v26 = vshrl.u32 %v12443_v24, 16 }
 0x227   : > { %10044 = vmatmul.mubr.msk.bf16.gmra.mrb[56].mxu0 %vm656_vm0, %v12099_v12 }
 0x228   : > { %10047 = vmatprep.mubr.msk.bf16.mxu0 %vm656_vm0, %v12116_v35  ;;  %v6088_v12 = vor.u32 %v6086_v53, %v6084_v20  ;;  %v6085_v35 = vsel %vm1115_vm1, %v6080_v8, %v6084_v20  ;;  %v13621_v53 = vld [vmem:[#allocation27_spill] sm:$0xff]  ;;  %v6144_v20 = vor.u32 %v6142_v46, %v6140_v25 }
 0x22d   : > { %9656 = vmatmul.mubr.msk.bf16.gmra.mrb[20].mxu1 %vm656_vm0, %v12109_v29  ;;  %v6092_v29 = vrot.slane %v6090_v6, 1  ;;  %v6148_v6 = vrot.slane %v6146_v57, 1  ;;  %v13633_v57 = vld [vmem:[#allocation33_spill] sm:$0xff] }
 0x22e   : > { %9659 = vmatprep.mubr.msk.bf16.mxu1 %vm656_vm0, %v12113_v31  ;;  %v6098_v31 = vshll.u32 %v12405_v1, 16 }
 0x22f   : > { %10048 = vmatmul.mubr.msk.bf16.gmra.mrb[60].mxu0 %vm656_vm0, %v12125_v49  ;;  %v6094_v49 = vshrl.u32 %v12401_v59, 16  ;;  %v6152_v8 = vor.u32 %v6150_v26, %v6148_v6 }
 0x230   : > { %10051 = vmatprep.mubr.msk.bf16.mxu0 %vm656_vm0, %v12143_v45  ;;  %v6106_v45 = vshll.u32 %v12413_v44, 16 }
 0x235   : > { %9660 = vmatmul.mubr.msk.bf16.gmra.mrb[24].mxu1 %vm656_vm0, %v12136_v4  ;;  %v6093_v4 = vsel %vm1115_vm1, %v6088_v12, %v6092_v29 }
 0x236   : > { %9663 = vmatprep.mubr.msk.bf16.mxu1 %vm656_vm0, %v12140_v5  ;;  %v6102_v5 = vshrl.u32 %v12405_v1, 16 }
 0x237   : > { %10052 = vmatmul.mubr.msk.bf16.gmra.mrb[64].mxu0 %vm656_vm0, %v12150_v16  ;;  %v11123_v16 = vld [vmem:[#allocation8 + $0x108] sm:$0xff]  }
 0x238   : > { %10055 = vmatprep.mubr.msk.bf16.mxu0 %vm656_vm0, %v12167_v55 }
 0x23d   : > { %9664 = vmatmul.mubr.msk.bf16.gmra.mrb[28].mxu1 %vm656_vm0, %v12160_v38  ;;  %v6100_v38 = vrot.slane %v6098_v31, 1 }
 0x23e   : > { %9667 = vmatprep.mubr.msk.bf16.mxu1 %vm656_vm0, %v12164_v3  ;;  %v6096_v3 = vor.u32 %v6094_v49, %v6092_v29  ;;  %v13622_v29 = vld [vmem:[#allocation40_spill] sm:$0xff]  ;;  %v6158_v49 = vshrl.u32 %v13620_v9, 16 }
 0x23f   : > { %10056 = vmatmul.mubr.msk.bf16.gmra.mrb[68].mxu0 %vm656_vm0, %v12174_v61  ;;  %v6104_v55 = vor.u32 %v6102_v5, %v6100_v38  ;;  %v6108_v61 = vrot.slane %v6106_v45, 1  ;;  %v6162_v31 = vshll.u32 %v13622_v29, 16  ;;  %v6166_v45 = vshrl.u32 %v13622_v29, 16 }
 0x240   : > { %10059 = vmatprep.mubr.msk.bf16.mxu0 %vm656_vm0, %v12357_v60  ;;  %v6101_v51 = vsel %vm1115_vm1, %v6096_v3, %v6100_v38  ;;  %v13625_v3 = vld [vmem:[#allocation29_spill] sm:$0xff] }
 0x245   : > { %9668 = vmatmul.mubr.msk.bf16.gmra.mrb[32].mxu1 %vm656_vm0, %v12184_v22  ;;  %v11124_v22 = vld [vmem:[#allocation8 + $0x110] sm:$0xff]  }
 0x246   : > { %9671 = vmatprep.mubr.msk.bf16.mxu1 %vm656_vm0, %v12188_v27  ;;  %v6114_v27 = vshll.u32 %v12417_v47, 16 }
 0x247   : > { %10060 = vmatmul.mubr.msk.bf16.gmra.mrb[72].mxu0 %vm656_vm0, %v12361_v2  ;;  %v6130_v2 = vshll.u32 %v12431_v41, 16 }
 0x248   : > { %10063 = vmatprep.mubr.msk.bf16.mxu0 %vm656_vm0, %v12583_v54  ;;  %v6116_v50 = vrot.slane %v6114_v27, 1 }
 0x249   : > { %v6132_v23 = vrot.slane %v6130_v2, 1 }
 0x24b   : > { %v6136_v39 = vor.u32 %v6134_v7, %v6132_v23 }
 0x24d   : > { %9672 = vmatmul.mubr.msk.bf16.gmra.mrb[36].mxu1 %vm656_vm0, %v12204_v10  ;;  %v6110_v10 = vshrl.u32 %v12413_v44, 16  ;;  %v6141_v17 = vsel %vm1115_vm1, %v6136_v39, %v6140_v25  ;;  %v13632_v39 = vld [vmem:[#allocation45_spill] sm:$0xff] }
 0x24e   : > { %9675 = vmatprep.mubr.msk.bf16.mxu1 %vm656_vm0, %v12208_v11  ;;  %v6109_v11 = vsel %vm1115_vm1, %v6104_v55, %v6108_v61  ;;  %v6164_v55 = vrot.slane %v6162_v31, 1  ;;  %v6202_v25 = vshll.u32 %v13632_v39, 16 }
 0x24f   : > { %10064 = vmatmul.mubr.msk.bf16.gmra.mrb[76].mxu0 %vm656_vm0, %v12594_v40  ;;  %v6112_v28 = vor.u32 %v6110_v10, %v6108_v61 }
 0x250   : > { %10075 = vmatprep.mubr.msk.bf16.mxu0 %vm656_vm0, %v6077_v33  ;;  %v6154_v33 = vshll.u32 %v13620_v9, 16  ;;  %v6204_v26 = vrot.slane %v6202_v25, 1 }
 0x252   : > { %v6156_v12 = vrot.slane %v6154_v33, 1  ;;  %v12696_v33 = vld [vmem:[#allocation2 + $0xb8] sm:$0xff] }
 0x254   : > { %v6157_v5 = vsel %vm1115_vm1, %v6152_v8, %v6156_v12  ;;  %v6160_v61 = vor.u32 %v6158_v49, %v6156_v12  ;;  %v13634_v8 = vld [vmem:[#allocation34_spill] sm:$0xff]  ;;  %v13635_v49 = vld [vmem:[#allocation35_spill] sm:$0xff] }
 0x255   : > { %9676 = vmatmul.mubr.msk.bf16.gmra.mrb[40].mxu1 %vm656_vm0, %v12219_v34  ;;  %v6118_v34 = vshrl.u32 %v12417_v47, 16 }
 0x256   : > { %9679 = vmatprep.mubr.msk.bf16.mxu1 %vm656_vm0, %v12223_v48  ;;  %v6122_v48 = vshll.u32 %v12427_v0, 16 }
 0x257   : > { %10076 = vmatmul.mubr.msk.bf16.vlgmr.msra.gmra.mrb[0].mxu0 %vm656_vm0, %v6085_v35  ;;  %v6149_v35 = vsel %vm1115_vm1, %v6144_v20, %v6148_v6  ;;  %v6206_v20 = vshrl.u32 %v13632_v39, 16 }
 0x258   : > { %10156 = vmatpush3.bf16.msra.mxu0 %v12449_v42  ;;  %10079 = vmatprep.mubr.msk.bf16.mxu0 %vm656_vm0, %v6093_v4  ;;  %v6124_v60 = vrot.slane %v6122_v48, 1  ;;  %v6117_v42 = vsel %vm1115_vm1, %v6112_v28, %v6116_v50  ;;  %v13623_v4 = vld [vmem:[#allocation28_spill] sm:$0xff]  ;;  %v13627_v48 = vld [vmem:[#allocation30_spill] sm:$0xff]  ;;  %v13628_v28 = vld [vmem:[#allocation43_spill] sm:$0xff] }
 0x259   : > { %10157 = vmatprep.subr.bf16.mxu0 %v11123_v16  ;;  %v6186_v30 = vshll.u32 %v13628_v28, 16  ;;  %v6190_v13 = vshrl.u32 %v13628_v28, 16 }
 0x25a   : > { %v6128_v36 = vor.u32 %v6126_v62, %v6124_v60 }
 0x25b   : > { %v6188_v62 = vrot.slane %v6186_v30, 1 }
 0x25c   : > { %10158 = vmatpush3.bf16.msra.mxu0 %v11123_v16  ;;  %v6133_v63 = vsel %vm1115_vm1, %v6128_v36, %v6132_v23  ;;  %v13624_v16 = vld [vmem:[#allocation41_spill] sm:$0xff] }
 0x25d   : > { %9680 = vmatmul.mubr.msk.bf16.gmra.mrb[44].mxu1 %vm656_vm0, %v12233_v58  ;;  %10159 = vmatprep.subr.bf16.mxu0 %v11124_v22  ;;  %v6120_v58 = vor.u32 %v6118_v34, %v6116_v50  ;;  %v6170_v38 = vshll.u32 %v13624_v16, 16  ;;  %v6174_v34 = vshrl.u32 %v13624_v16, 16  ;;  %v6192_v46 = vor.u32 %v6190_v13, %v6188_v62  ;;  %v12731_v13 = vld [vmem:[#allocation2 + $0xd8] sm:$0xff] }
 0x25e   : > { %9683 = vmatprep.mubr.msk.bf16.mxu1 %vm656_vm0, %v12240_v14  ;;  %v13617_v14 = vld [vmem:[#allocation24_spill] sm:$0xff] }
 0x25f   : > { %10080 = vmatmul.mubr.msk.bf16.gmra.mrb[4].mxu0 %vm656_vm0, %v6101_v51  ;;  %v6125_v56 = vsel %vm1115_vm1, %v6120_v58, %v6124_v60  ;;  %v6172_v27 = vrot.slane %v6170_v38, 1  ;;  %v13626_v51 = vld [vmem:[#allocation42_spill] sm:$0xff]  ;;  %v13629_v58 = vld [vmem:[#allocation31_spill] sm:$0xff] }
 0x260   : > { %10083 = vmatprep.mubr.msk.bf16.mxu0 %vm656_vm0, %v6109_v11  ;;  %10160 = vmatpush3.bf16.msra.mxu0 %v11124_v22  ;;  %v6168_v22 = vor.u32 %v6166_v45, %v6164_v55  ;;  %v6178_v10 = vshll.u32 %v13626_v51, 16  ;;  %v6165_v11 = vsel %vm1115_vm1, %v6160_v61, %v6164_v55  ;;  %v6182_v50 = vshrl.u32 %v13626_v51, 16  ;;  %v12710_v45 = vld [vmem:[#allocation2 + $0xc0] sm:$0xff]  ;;  %v12712_v55 = vld [vmem:[#allocation2 + $0xc8] sm:$0xff] }
 0x261   : > { %10161 = vmatprep.subr.bf16.mxu0 %v11125_v19  ;;  %v6176_v2 = vor.u32 %v6174_v34, %v6172_v27  ;;  %v6226_v61 = vshll.u32 %v12710_v45, 16  ;;  %v6230_v34 = vshrl.u32 %v12710_v45, 16  ;;  %v6238_v25 = vshrl.u32 %v12712_v55, 16 }
 0x262   : > { %v6180_v60 = vrot.slane %v6178_v10, 1  ;;  %v13636_v10 = vld [vmem:[#allocation37_spill] sm:$0xff] }
 0x264   : > { %10162 = vmatpush3.bf16.msra.mxu0 %v11125_v19  ;;  %v6173_v19 = vsel %vm1115_vm1, %v6168_v22, %v6172_v27  ;;  %v6181_v7 = vsel %vm1115_vm1, %v6176_v2, %v6180_v60  ;;  %v6222_v27 = vshrl.u32 %v12696_v33, 16  ;;  %v12727_v2 = vld [vmem:[#allocation2 + $0xd0] sm:$0xff] }
 0x265   : > { %9684 = vmatmul.mubr.msk.bf16.gmra.mrb[48].mxu1 %vm656_vm0, %v13617_v14  ;;  %v13630_v14 = vld [vmem:[#allocation44_spill] sm:$0xff] }
 0x266   : > { %9687 = vmatprep.mubr.msk.bf16.mxu1 %vm656_vm0, %v13618_v18  ;;  %v13631_v18 = vld [vmem:[#allocation32_spill] sm:$0xff]  ;;  %v6198_v36 = vshrl.u32 %v13630_v14, 16 }
 0x267   : > { %10084 = vmatmul.mubr.msk.bf16.gmra.mrb[8].mxu0 %vm656_vm0, %v6117_v42  ;;  %v6184_v42 = vor.u32 %v6182_v50, %v6180_v60  ;;  %v13638_v50 = vld [vmem:[#allocation23_spill] sm:$0xff] }
 0x268   : > { %10087 = vmatprep.mubr.msk.bf16.mxu0 %vm656_vm0, %v6125_v56  ;;  %v6194_v56 = vshll.u32 %v13630_v14, 16  ;;  %v2525_v30 = vrot.slane %v13638_v50, 1 }
 0x269   : > { %v6189_v23 = vsel %vm1115_vm1, %v6184_v42, %v6188_v62 }
 0x26d   : > { %9688 = vmatmul.mubr.msk.bf16.gmra.mrb[52].mxu1 %vm656_vm0, %v13619_v52  ;;  %v12694_v52 = vld [vmem:[#allocation2 + $0xb0] sm:$0xff] }
 0x26e   : > { %9691 = vmatprep.mubr.msk.bf16.mxu1 %vm656_vm0, %v13621_v53  ;;  %v6210_v53 = vshll.u32 %v12694_v52, 16  ;;  %v6214_v31 = vshrl.u32 %v12694_v52, 16 }
 0x26f   : > { %10088 = vmatmul.mubr.msk.bf16.gmra.mrb[12].mxu0 %vm656_vm0, %v6133_v63  ;;  %v6196_v63 = vrot.slane %v6194_v56, 1  ;;  %v13639_v56 = vld [vmem:[#allocation36_spill] sm:$0xff] }
 0x270   : > { %10091 = vmatprep.mubr.msk.bf16.mxu0 %vm656_vm0, %v6141_v17 }
 0x271   : > { %v6200_v17 = vor.u32 %v6198_v36, %v6196_v63  ;;  %v6197_v6 = vsel %vm1115_vm1, %v6192_v46, %v6196_v63  ;;  %v6246_v63 = vshrl.u32 %v12727_v2, 16  ;;  %v6250_v46 = vshll.u32 %v12731_v13, 16 }
 0x273   : > { %v6205_v12 = vsel %vm1115_vm1, %v6200_v17, %v6204_v26 }
 0x275   : > { %9692 = vmatmul.mubr.msk.bf16.gmra.mrb[56].mxu1 %vm656_vm0, %v13623_v4  ;;  %v6212_v4 = vrot.slane %v6210_v53, 1  ;;  %v12743_v53 = vld [vmem:[#allocation2 + $0xe0] sm:$0xff] }
 0x276   : > { %9695 = vmatprep.mubr.msk.bf16.mxu1 %vm656_vm0, %v13625_v3 }
 0x277   : > { %10092 = vmatmul.mubr.msk.bf16.gmra.mrb[16].mxu0 %vm656_vm0, %v6149_v35  ;;  %v6218_v35 = vshll.u32 %v12696_v33, 16  ;;  %v6216_v38 = vor.u32 %v6214_v31, %v6212_v4  ;;  %v6258_v31 = vshll.u32 %v12743_v53, 16 }
 0x278   : > { %10095 = vmatprep.mubr.msk.bf16.mxu0 %vm656_vm0, %v6157_v5  ;;  %v6208_v5 = vor.u32 %v6206_v20, %v6204_v26  ;;  %v6252_v20 = vrot.slane %v6250_v46, 1 }
 0x279   : > { %v6220_v3 = vrot.slane %v6218_v35, 1 }
 0x27a   : > { %v6213_v22 = vsel %vm1115_vm1, %v6208_v5, %v6212_v4  ;;  %v6262_v5 = vshrl.u32 %v12743_v53, 16 }
 0x27b   : > { %v6224_v60 = vor.u32 %v6222_v27, %v6220_v3  ;;  %v12759_v27 = vld [vmem:[#allocation2 + $0xf0] sm:$0xff] }
 0x27d   : > { %9696 = vmatmul.mubr.msk.bf16.gmra.mrb[60].mxu1 %vm656_vm0, %v13627_v48  ;;  %v6234_v48 = vshll.u32 %v12712_v55, 16 }
 0x27e   : > { %9699 = vmatprep.mubr.msk.bf16.mxu1 %vm656_vm0, %v13629_v58  ;;  %v6228_v58 = vrot.slane %v6226_v61, 1  ;;  %v11140_v61 = vld [vmem:[#allocation8 + $0x88] sm:$0xff]  }
 0x27f   : > { %10096 = vmatmul.mubr.msk.bf16.gmra.mrb[20].mxu0 %vm656_vm0, %v6165_v11  ;;  %v6221_v11 = vsel %vm1115_vm1, %v6216_v38, %v6220_v3  ;;  %v6236_v62 = vrot.slane %v6234_v48, 1  ;;  %v6260_v3 = vrot.slane %v6258_v31, 1  ;;  %v11141_v48 = vld [vmem:[#allocation8 + $0x90] sm:$0xff]  }
 0x280   : > { %10099 = vmatprep.mubr.msk.bf16.mxu0 %vm656_vm0, %v6173_v19  ;;  %v13637_v19 = vld [vmem:[#allocation38_spill] sm:$0xff]  ;;  %v6232_v42 = vor.u32 %v6230_v34, %v6228_v58  ;;  %v6229_v36 = vsel %vm1115_vm1, %v6224_v60, %v6228_v58  ;;  %v12761_v34 = vld [vmem:[#allocation2 + $0xf8] sm:$0xff] }
 0x281   : > { %v6240_v26 = vor.u32 %v6238_v25, %v6236_v62  ;;  %v6282_v58 = vshll.u32 %v12761_v34, 16 }
 0x285   : > { %9700 = vmatmul.mubr.msk.bf16.gmra.mrb[64].mxu1 %vm656_vm0, %v13631_v18  ;;  %v3104_v18 = vld [vmem:[#allocation2 + $0x10] sm:$0xff] }
 0x286   : > { %9703 = vmatprep.mubr.msk.bf16.mxu1 %vm656_vm0, %v13633_v57  ;;  %v6237_v57 = vsel %vm1115_vm1, %v6232_v42, %v6236_v62  ;;  %v11142_v42 = vld [vmem:[#allocation8 + $0x98] sm:$0xff]  }
 0x287   : > { %10100 = vmatmul.mubr.msk.bf16.gmra.mrb[24].mxu0 %vm656_vm0, %v6181_v7  ;;  %v2526_v7 = vsel %vm2445_vm2, %v13639_v56, %v2525_v30  ;;  %v6278_v30 = vshrl.u32 %v12759_v27, 16  ;;  %v12775_v56 = vld [vmem:[#allocation2 + $0x100] sm:$0xff] }
 0x288   : > { %10103 = vmatprep.mubr.msk.bf16.mxu0 %vm656_vm0, %v6189_v23  ;;  %v6242_v23 = vshll.u32 %v12727_v2, 16  ;;  %v6294_v46 = vshrl.u32 %v12775_v56, 16 }
 0x28a   : > { %v6244_v17 = vrot.slane %v6242_v23, 1  ;;  %v12777_v23 = vld [vmem:[#allocation2 + $0x108] sm:$0xff] }
 0x28c   : > { %v6245_v35 = vsel %vm1115_vm1, %v6240_v26, %v6244_v17 }
 0x28d   : > { %9704 = vmatmul.mubr.msk.bf16.gmra.mrb[68].mxu1 %vm656_vm0, %v13634_v8  ;;  %v3105_v8 = vld [vmem:[#allocation2 + $0x18] sm:$0xff] }
 0x28e   : > { %9707 = vmatprep.mubr.msk.bf16.mxu1 %vm656_vm0, %v13635_v49  ;;  %v6254_v49 = vshrl.u32 %v12731_v13, 16 }
 0x28f   : > { %10104 = vmatmul.mubr.msk.bf16.gmra.mrb[28].mxu0 %vm656_vm0, %v6197_v6  ;;  %v6248_v6 = vor.u32 %v6246_v63, %v6244_v17  ;;  %v6298_v17 = vshll.u32 %v12777_v23, 16 }
 0x290   : > { %10107 = vmatprep.mubr.msk.bf16.mxu0 %vm656_vm0, %v6205_v12  ;;  %v12745_v12 = vld [vmem:[#allocation2 + $0xe8] sm:$0xff] }
 0x291   : > { %v6253_v4 = vsel %vm1115_vm1, %v6248_v6, %v6252_v20  ;;  %v6266_v38 = vshll.u32 %v12745_v12, 16  ;;  %v6300_v31 = vrot.slane %v6298_v17, 1 }
 0x295   : > { %9708 = vmatmul.mubr.msk.bf16.gmra.mrb[72].mxu1 %vm656_vm0, %v13636_v10  ;;  %v6264_v10 = vor.u32 %v6262_v5, %v6260_v3  ;;  %v6302_v5 = vshrl.u32 %v12777_v23, 16 }
 0x296   : > { %9711 = vmatprep.mubr.msk.bf16.mxu1 %vm656_vm0, %v13637_v19  ;;  %v6270_v19 = vshrl.u32 %v12745_v12, 16 }
 0x297   : > { %10108 = vmatmul.mubr.msk.bf16.gmra.mrb[32].mxu0 %vm656_vm0, %v6213_v22  ;;  %v6256_v22 = vor.u32 %v6254_v49, %v6252_v20  ;;  %v12791_v20 = vld [vmem:[#allocation2 + $0x110] sm:$0xff] }
 0x298   : > { %10111 = vmatprep.mubr.msk.bf16.mxu0 %vm656_vm0, %v6221_v11  ;;  %v6268_v11 = vrot.slane %v6266_v38, 1  ;;  %v6306_v49 = vshll.u32 %v12791_v20, 16 }
 0x29a   : > { %v6269_v50 = vsel %vm1115_vm1, %v6264_v10, %v6268_v11  ;;  %v6272_v62 = vor.u32 %v6270_v19, %v6268_v11  ;;  %v6304_v10 = vor.u32 %v6302_v5, %v6300_v31  ;;  %v12807_v11 = vld [vmem:[#allocation2 + $0x120] sm:$0xff] }
 0x29b   : > { %v6322_v19 = vshll.u32 %v12807_v11, 16 }
 0x29d   : > { %9712 = vmatmul.mubr.msk.bf16.gmra.mrb[76].mxu1 %vm656_vm0, %v2526_v7 }
 0x29e   : > { %9723 = vmatprep.mubr.msk.bf16.mxu1 %vm656_vm0, %v3104_v18  ;;  %v6284_v18 = vrot.slane %v6282_v58, 1 }
 0x29f   : > { %10112 = vmatmul.mubr.msk.bf16.gmra.mrb[36].mxu0 %vm656_vm0, %v6229_v36  ;;  %v6290_v36 = vshll.u32 %v12775_v56, 16 }
 0x2a0   : > { %10115 = vmatprep.mubr.msk.bf16.mxu0 %vm656_vm0, %v6237_v57  ;;  %v6286_v57 = vshrl.u32 %v12761_v34, 16 }
 0x2a1   : > { %v6292_v26 = vrot.slane %v6290_v36, 1 }
 0x2a2   : > { %v6288_v6 = vor.u32 %v6286_v57, %v6284_v18  ;;  %v12825_v57 = vld [vmem:[#allocation2 + $0x138] sm:$0xff] }
 0x2a5   : > { %9724 = vmatmul.mubr.msk.bf16.vlgmr.msra.gmra.mrb[0].mxu1 %vm656_vm0, %v3105_v8  ;;  %v6296_v8 = vor.u32 %v6294_v46, %v6292_v26 }
 0x2a6   : > { %10247 = vmatpush3.bf16.msra.mxu1 %v12529_v43  ;;  %9727 = vmatprep.mubr.msk.bf16.mxu1 %vm656_vm0, %v12381_v32  ;;  %v6274_v43 = vshll.u32 %v12759_v27, 16  ;;  %v6261_v32 = vsel %vm1115_vm1, %v6256_v22, %v6260_v3  ;;  %v6310_v3 = vshrl.u32 %v12791_v20, 16  ;;  %v6308_v22 = vrot.slane %v6306_v49, 1 }
 0x2a7   : > { %10116 = vmatmul.mubr.msk.bf16.gmra.mrb[40].mxu0 %vm656_vm0, %v6245_v35  ;;  %10244 = vmatprep.subr.bf16.mxu1 %v11140_v61  ;;  %v12793_v35 = vld [vmem:[#allocation2 + $0x118] sm:$0xff]  ;;  %v6301_v38 = vsel %vm1115_vm1, %v6296_v8, %v6300_v31  ;;  %v6346_v8 = vshll.u32 %v12825_v57, 16 }
 0x2a8   : > { %10119 = vmatprep.mubr.msk.bf16.mxu0 %vm656_vm0, %v6253_v4  ;;  %v6276_v60 = vrot.slane %v6274_v43, 1  ;;  %v6293_v4 = vsel %vm1115_vm1, %v6288_v6, %v6292_v26  ;;  %v6312_v43 = vor.u32 %v6310_v3, %v6308_v22  ;;  %v12841_v3 = vld [vmem:[#allocation2 + $0x148] sm:$0xff] }
 0x2aa   : > { %10248 = vmatpush3.bf16.msra.mxu1 %v11140_v61  ;;  %v6280_v7 = vor.u32 %v6278_v30, %v6276_v60  ;;  %v6277_v25 = vsel %vm1115_vm1, %v6272_v62, %v6276_v60  ;;  %v6314_v61 = vshll.u32 %v12793_v35, 16  ;;  %v6318_v30 = vshrl.u32 %v12793_v35, 16 }
 0x2ab   : > { %10245 = vmatprep.subr.bf16.mxu1 %v11141_v48  ;;  %v6326_v60 = vshrl.u32 %v12807_v11, 16  ;;  %v6324_v62 = vrot.slane %v6322_v19, 1  ;;  %v6362_v19 = vshll.u32 %v12841_v3, 16 }
 0x2ac   : > { %v6285_v63 = vsel %vm1115_vm1, %v6280_v7, %v6284_v18  ;;  %v12823_v18 = vld [vmem:[#allocation2 + $0x130] sm:$0xff] }
 0x2ad   : > { %9728 = vmatmul.mubr.msk.bf16.gmra.mrb[4].mxu1 %vm656_vm0, %v12388_v21  ;;  %v6328_v36 = vor.u32 %v6326_v60, %v6324_v62  ;;  %v6342_v6 = vshrl.u32 %v12823_v18, 16  ;;  %v6364_v60 = vrot.slane %v6362_v19, 1 }
 0x2ae   : > { %9731 = vmatprep.mubr.msk.bf16.mxu1 %vm656_vm0, %v12392_v37  ;;  %10249 = vmatpush3.bf16.msra.mxu1 %v11141_v48  ;;  %v6316_v48 = vrot.slane %v6314_v61, 1 }
 0x2af   : > { %10120 = vmatmul.mubr.msk.bf16.gmra.mrb[44].mxu0 %vm656_vm0, %v6261_v32  ;;  %10246 = vmatprep.subr.bf16.mxu1 %v11142_v42  ;;  %v12809_v32 = vld [vmem:[#allocation2 + $0x128] sm:$0xff] }
 0x2b0   : > { %10123 = vmatprep.mubr.msk.bf16.mxu0 %vm656_vm0, %v6269_v50  ;;  %v6309_v50 = vsel %vm1115_vm1, %v6304_v10, %v6308_v22  ;;  %v6317_v58 = vsel %vm1115_vm1, %v6312_v43, %v6316_v48  ;;  %v6320_v7 = vor.u32 %v6318_v30, %v6316_v48  ;;  %v6334_v17 = vshrl.u32 %v12809_v32, 16 }
 0x2b1   : > { %v6350_v10 = vshrl.u32 %v12825_v57, 16 }
 0x2b2   : > { %10250 = vmatpush3.bf16.msra.mxu1 %v11142_v42  ;;  %v6330_v42 = vshll.u32 %v12809_v32, 16  ;;  %v6325_v46 = vsel %vm1115_vm1, %v6320_v7, %v6324_v62  ;;  %v3120_v62 = vld [vmem:[#allocation2 + $0x90] sm:$0xff]  ;;  %v6370_v7 = vshll.u32 %v12583_v54, 16 }
 0x2b5   : > { %9732 = vmatmul.mubr.msk.bf16.gmra.mrb[8].mxu1 %vm656_vm0, %v12401_v59 }
 0x2b6   : > { %9735 = vmatprep.mubr.msk.bf16.mxu1 %vm656_vm0, %v12405_v1 }
 0x2b7   : > { %10124 = vmatmul.mubr.msk.bf16.gmra.mrb[48].mxu0 %vm656_vm0, %v6277_v25  ;;  %v6332_v25 = vrot.slane %v6330_v42, 1  ;;  %v3119_v42 = vld [vmem:[#allocation2 + $0x88] sm:$0xff] }
 0x2b8   : > { %10127 = vmatprep.mubr.msk.bf16.mxu0 %vm656_vm0, %v6285_v63  ;;  %v6338_v63 = vshll.u32 %v12823_v18, 16 }
 0x2b9   : > { %v6333_v26 = vsel %vm1115_vm1, %v6328_v36, %v6332_v25  ;;  %v6336_v49 = vor.u32 %v6334_v17, %v6332_v25  ;;  %v6366_v25 = vshrl.u32 %v12841_v3, 16  ;;  %v6378_v17 = vshll.u32 %v12594_v40, 16 }
 0x2ba   : > { %v6340_v31 = vrot.slane %v6338_v63, 1 }
 0x2bc   : > { %v6344_v5 = vor.u32 %v6342_v6, %v6340_v31  ;;  %v6341_v22 = vsel %vm1115_vm1, %v6336_v49, %v6340_v31  ;;  %v6368_v6 = vor.u32 %v6366_v25, %v6364_v60  ;;  %v6380_v31 = vrot.slane %v6378_v17, 1  ;;  %v12865_v49 = vld [vmem:[#allocation2 + $0x160] sm:$0x1] }
 0x2bd   : > { %9736 = vmatmul.mubr.msk.bf16.gmra.mrb[12].mxu1 %vm656_vm0, %v12413_v44  ;;  %v7033_v17 = vrot.slane %v12431_v41, 1 }
 0x2be   : > { %9739 = vmatprep.mubr.msk.bf16.mxu1 %vm656_vm0, %v12417_v47 }
 0x2bf   : > { %10128 = vmatmul.mubr.msk.bf16.gmra.mrb[52].mxu0 %vm656_vm0, %v6293_v4  ;;  %v12839_v4 = vld [vmem:[#allocation2 + $0x140] sm:$0xff] }
 0x2c0   : > { %10131 = vmatprep.mubr.msk.bf16.mxu0 %vm656_vm0, %v6301_v38  ;;  %v6348_v38 = vrot.slane %v6346_v8, 1  ;;  %v6354_v61 = vshll.u32 %v12839_v4, 16  ;;  %v6358_v48 = vshrl.u32 %v12839_v4, 16 }
 0x2c2   : > { %v6349_v43 = vsel %vm1115_vm1, %v6344_v5, %v6348_v38  ;;  %v6352_v30 = vor.u32 %v6350_v10, %v6348_v38  ;;  %v3121_v5 = vld [vmem:[#allocation2 + $0x98] sm:$0xff]  ;;  %v3122_v38 = vld [vmem:[#allocation2 + $0xa0] sm:$0xff] }
 0x2c5   : > { %9740 = vmatmul.mubr.msk.bf16.gmra.mrb[16].mxu1 %vm656_vm0, %v12427_v0 }
 0x2c6   : > { %9743 = vmatprep.mubr.msk.bf16.mxu1 %vm656_vm0, %v12431_v41  ;;  %v7039_v41 = vrot.slane %v13620_v9, 1 }
 0x2c7   : > { %10132 = vmatmul.mubr.msk.bf16.gmra.mrb[56].mxu0 %vm656_vm0, %v6309_v50  ;;  %v6356_v50 = vrot.slane %v6354_v61, 1 }
 0x2c8   : > { %10135 = vmatprep.mubr.msk.bf16.mxu0 %vm656_vm0, %v6317_v58 }
 0x2c9   : > { %v6360_v58 = vor.u32 %v6358_v48, %v6356_v50  ;;  %v6357_v36 = vsel %vm1115_vm1, %v6352_v30, %v6356_v50  ;;  %v7019_v30 = vrot.slane %v12388_v21, 1 }
 0x2cb   : > { %v6365_v63 = vsel %vm1115_vm1, %v6360_v58, %v6364_v60  ;;  %v3123_v58 = vld [vmem:[#allocation2 + $0xa8] sm:$0xff] }
 0x2cd   : > { %9744 = vmatmul.mubr.msk.bf16.gmra.mrb[20].mxu1 %vm656_vm0, %v12439_v15 }
 0x2ce   : > { %9747 = vmatprep.mubr.msk.bf16.mxu1 %vm656_vm0, %v12443_v24 }
 0x2cf   : > { %10136 = vmatmul.mubr.msk.bf16.gmra.mrb[60].mxu0 %vm656_vm0, %v6325_v46  ;;  %v6374_v46 = vshrl.u32 %v12583_v54, 16  ;;  %v6382_v54 = vshrl.u32 %v12594_v40, 16 }
 0x2d0   : > { %10139 = vmatprep.mubr.msk.bf16.mxu0 %vm656_vm0, %v6333_v26  ;;  %v6372_v26 = vrot.slane %v6370_v7, 1 }
 0x2d1   : > { %v6384_v48 = vor.u32 %v6382_v54, %v6380_v31  ;;  %v7049_v54 = vrot.slane %v13630_v14, 1  ;;  %v7055_v14 = vrot.slane %v12696_v33, 1 }
 0x2d2   : > { %v6376_v8 = vor.u32 %v6374_v46, %v6372_v26  ;;  %v6373_v61 = vsel %vm1115_vm1, %v6368_v6, %v6372_v26  ;;  %v7037_v6 = vrot.slane %v12443_v24, 1  ;;  %v7043_v24 = vrot.slane %v13624_v16, 1 }
 0x2d4   : > { %v6381_v10 = vsel %vm1115_vm1, %v6376_v8, %v6380_v31  ;;  %v7040_v8 = vsel %vm2445_vm2, %v7037_v6, %v7039_v41  ;;  %v7041_v31 = vrot.slane %v13622_v29, 1 }
 0x2d5   : > { %9748 = vmatmul.mubr.msk.bf16.gmra.mrb[24].mxu1 %vm656_vm0, %v13620_v9 }
 0x2d6   : > { %9751 = vmatprep.mubr.msk.bf16.mxu1 %vm656_vm0, %v13622_v29  ;;  %v7042_v9 = vsel %vm2445_vm2, %v7039_v41, %v7041_v31  ;;  %v7047_v29 = vrot.slane %v13628_v28, 1 }
 0x2d7   : > { %10140 = vmatmul.mubr.msk.bf16.gmra.mrb[64].mxu0 %vm656_vm0, %v6341_v22  ;;  %v6386_v22 = vshll.u32 %v12865_v49, 16 }
 0x2d8   : > { %10143 = vmatprep.mubr.msk.bf16.mxu0 %vm656_vm0, %v6349_v43  ;;  %v6967_v43 = vld [vmem:[#allocation2 + $0x20] sm:$0xfe]  ;;  %v7050_v28 = vsel %vm2445_vm2, %v7047_v29, %v7049_v54 }
 0x2d9   : > { %v6388_v19 = vrot.slane %v6386_v22, 1  ;;  %v7018_v50 = vrot.slane %v6967_v43, 1  ;;  %v11143_v43 = vld [vmem:[#allocation2 + $0xb0] sm:$0xff] }
 0x2db   : > { %v6389_v40 = vsel %vm1115_vm1, %v6384_v48, %v6388_v19  ;;  %v7020_v60 = vsel %vm2445_vm2, %v7018_v50, %v7019_v30  ;;  %v11144_v48 = vld [vmem:[#allocation2 + $0xb8] sm:$0xff] }
 0x2dc   : > { %v3948_v19 = vshll.u32 %v11144_v48, 16 }
 0x2dd   : > { %9752 = vmatmul.mubr.msk.bf16.gmra.mrb[28].mxu1 %vm656_vm0, %v3119_v42  ;;  %v7021_v42 = vrot.slane %v12392_v37, 1  ;;  %v7027_v37 = vrot.slane %v12413_v44, 1 }
 0x2de   : > { %9755 = vmatprep.mubr.msk.bf16.mxu1 %vm656_vm0, %v3120_v62  ;;  %v7023_v62 = vrot.slane %v12401_v59, 1 }
 0x2df   : > { %10144 = vmatmul.mubr.msk.bf16.gmra.mrb[68].mxu0 %vm656_vm0, %v6357_v36  ;;  %v7022_v21 = vsel %vm2445_vm2, %v7019_v30, %v7021_v42  ;;  %v7025_v36 = vrot.slane %v12405_v1, 1  ;;  %v7031_v1 = vrot.slane %v12427_v0, 1 }
 0x2e0   : > { %10147 = vmatprep.mubr.msk.bf16.mxu0 %vm656_vm0, %v6365_v63  ;;  %v7024_v7 = vsel %vm2445_vm2, %v7021_v42, %v7023_v62  ;;  %v7029_v63 = vrot.slane %v12417_v47, 1  ;;  %v7035_v47 = vrot.slane %v12439_v15, 1  ;;  %v3952_v42 = vshrl.u32 %v11144_v48, 16 }
 0x2e1   : > { %v7026_v59 = vsel %vm2445_vm2, %v7023_v62, %v7025_v36  ;;  %v7028_v25 = vsel %vm2445_vm2, %v7025_v36, %v7027_v37  ;;  %v7034_v0 = vsel %vm2445_vm2, %v7031_v1, %v7033_v17  ;;  %v11146_v36 = vld [vmem:[#allocation2 + $0xc8] sm:$0xff] }
 0x2e2   : > { %v7030_v44 = vsel %vm2445_vm2, %v7027_v37, %v7029_v63  ;;  %v7032_v46 = vsel %vm2445_vm2, %v7029_v63, %v7031_v1  ;;  %v7036_v26 = vsel %vm2445_vm2, %v7033_v17, %v7035_v47  ;;  %v7038_v15 = vsel %vm2445_vm2, %v7035_v47, %v7037_v6  ;;  %v11147_v17 = vld [vmem:[#allocation2 + $0xd0] sm:$0xff] }
 0x2e3   : > { %v3964_v37 = vshll.u32 %v11146_v36, 16  ;;  %v3972_v47 = vshll.u32 %v11147_v17, 16  ;;  %v3976_v41 = vshrl.u32 %v11147_v17, 16 }
 0x2e5   : > { %9756 = vmatmul.mubr.msk.bf16.gmra.mrb[32].mxu1 %vm656_vm0, %v3121_v5  ;;  %v7044_v5 = vsel %vm2445_vm2, %v7041_v31, %v7043_v24  ;;  %v3966_v1 = vrot.slane %v3964_v37, 1 }
 0x2e6   : > { %9759 = vmatprep.mubr.msk.bf16.mxu1 %vm656_vm0, %v3122_v38  ;;  %v7045_v38 = vrot.slane %v13626_v51, 1  ;;  %v7051_v51 = vrot.slane %v13632_v39, 1  ;;  %v3944_v39 = vshrl.u32 %v11143_v43, 16 }
 0x2e7   : > { %10148 = vmatmul.mubr.msk.bf16.gmra.mrb[72].mxu0 %vm656_vm0, %v6373_v61 }
 0x2e8   : > { %10151 = vmatprep.mubr.msk.bf16.mxu0 %vm656_vm0, %v6381_v10  ;;  %v7046_v16 = vsel %vm2445_vm2, %v7043_v24, %v7045_v38  ;;  %v7048_v61 = vsel %vm2445_vm2, %v7045_v38, %v7047_v29  ;;  %v7052_v22 = vsel %vm2445_vm2, %v7049_v54, %v7051_v51  ;;  %v7053_v10 = vrot.slane %v12694_v52, 1 }
 0x2e9   : > { %v7065_v38 = vrot.slane %v12743_v53, 1  ;;  %v7067_v29 = vrot.slane %v12745_v12, 1 }
 0x2ea   : > { %v7054_v50 = vsel %vm2445_vm2, %v7051_v51, %v7053_v10  ;;  %v7056_v30 = vsel %vm2445_vm2, %v7053_v10, %v7055_v14  ;;  %v11150_v10 = vld [vmem:[#allocation2 + $0xe8] sm:$0xff] }
 0x2ed   : > { %9760 = vmatmul.mubr.msk.bf16.gmra.mrb[36].mxu1 %vm656_vm0, %v3123_v58  ;;  %v13640_v58 = vld [vmem:[#allocation21_spill] sm:$0xff] }
 0x2ee   : > { %9763 = vmatprep.mubr.msk.bf16.mxu1 %vm656_vm0, %v12694_v52  ;;  %v3946_v52 = vor.u32 %v3944_v39, %v13640_v58  ;;  %v7068_v39 = vsel %vm2445_vm2, %v7065_v38, %v7067_v29  ;;  %v11151_v58 = vld [vmem:[#allocation2 + $0xf0] sm:$0xff] }
 0x2ef   : > { %10152 = vmatmul.mubr.msk.bf16.gmra.mrb[76].mxu0 %vm656_vm0, %v6389_v40  ;;  %v3950_v40 = vrot.slane %v3948_v19, 1 }
 0x2f0   : > { %10163 = vmatprep.mubr.msk.bf16.mxu0 %vm656_vm0, %v7020_v60  ;;  %v7059_v60 = vrot.slane %v12712_v55, 1 }
 0x2f1   : > { %v3951_v62 = vsel %vm1115_vm1, %v3946_v52, %v3950_v40  ;;  %v3954_v63 = vor.u32 %v3952_v42, %v3950_v40  ;;  %v4004_v52 = vshll.u32 %v11151_v58, 16  ;;  %v4008_v42 = vshrl.u32 %v11151_v58, 16 }
 0x2f3   : > { %v4006_v37 = vrot.slane %v4004_v52, 1 }
 0x2f5   : > { %9764 = vmatmul.mubr.msk.bf16.gmra.mrb[40].mxu1 %vm656_vm0, %v12696_v33  ;;  %v7057_v33 = vrot.slane %v12710_v45, 1 }
 0x2f6   : > { %9767 = vmatprep.mubr.msk.bf16.mxu1 %vm656_vm0, %v12710_v45  ;;  %v13641_v45 = vld [vmem:[#allocation22_spill] sm:$0xff] }
 0x2f7   : > { %10164 = vmatmul.mubr.msk.bf16.vlgmr.msra.gmra.mrb[0].mxu0 %vm656_vm0, %v7022_v21  ;;  %v11145_v21 = vld [vmem:[#allocation2 + $0xc0] sm:$0xff] }
 0x2f8   : > { %10167 = vmatprep.mubr.msk.bf16.mxu0 %vm656_vm0, %v7024_v7  ;;  %v3960_v7 = vshrl.u32 %v11145_v21, 16 }
 0x2fd   : > { %9768 = vmatmul.mubr.msk.bf16.gmra.mrb[44].mxu1 %vm656_vm0, %v12712_v55  ;;  %v3962_v55 = vor.u32 %v3960_v7, %v13641_v45 }
 0x2fe   : > { %9771 = vmatprep.mubr.msk.bf16.mxu1 %vm656_vm0, %v12727_v2 }
 0x2ff   : > { %10168 = vmatmul.mubr.msk.bf16.gmra.mrb[4].mxu0 %vm656_vm0, %v7026_v59  ;;  %v7058_v59 = vsel %vm2445_vm2, %v7055_v14, %v7057_v33  ;;  %v3967_v6 = vsel %vm1115_vm1, %v3962_v55, %v3966_v1  ;;  %v3996_v14 = vshll.u32 %v11150_v10, 16 }
 0x300   : > { %10171 = vmatprep.mubr.msk.bf16.mxu0 %vm656_vm0, %v7028_v25  ;;  %v7060_v25 = vsel %vm2445_vm2, %v7057_v33, %v7059_v60  ;;  %v4000_v33 = vshrl.u32 %v11150_v10, 16  ;;  %v7083_v10 = vrot.slane %v12809_v32, 1 }
 0x301   : > { %v3998_v19 = vrot.slane %v3996_v14, 1  ;;  %v11157_v14 = vld [vmem:[#allocation2 + $0x120] sm:$0xff] }
 0x305   : > { %9772 = vmatmul.mubr.msk.bf16.gmra.mrb[48].mxu1 %vm656_vm0, %v12731_v13 }
 0x306   : > { %9775 = vmatprep.mubr.msk.bf16.mxu1 %vm656_vm0, %v12743_v53 }
 0x307   : > { %10172 = vmatmul.mubr.msk.bf16.gmra.mrb[8].mxu0 %vm656_vm0, %v7030_v44  ;;  %v7061_v44 = vrot.slane %v12727_v2, 1  ;;  %v3974_v2 = vrot.slane %v3972_v47, 1  ;;  %v11154_v47 = vld [vmem:[#allocation2 + $0x108] sm:$0xff] }
 0x308   : > { %10175 = vmatprep.mubr.msk.bf16.mxu0 %vm656_vm0, %v7032_v46  ;;  %v7063_v46 = vrot.slane %v12731_v13, 1 }
 0x309   : > { %v7062_v31 = vsel %vm2445_vm2, %v7059_v60, %v7061_v44 }
 0x30a   : > { %v7064_v24 = vsel %vm2445_vm2, %v7061_v44, %v7063_v46  ;;  %v7066_v43 = vsel %vm2445_vm2, %v7063_v46, %v7065_v38 }
 0x30d   : > { %9776 = vmatmul.mubr.msk.bf16.gmra.mrb[52].mxu1 %vm656_vm0, %v12745_v12 }
 0x30e   : > { %9779 = vmatprep.mubr.msk.bf16.mxu1 %vm656_vm0, %v12759_v27 }
 0x30f   : > { %10176 = vmatmul.mubr.msk.bf16.gmra.mrb[12].mxu0 %vm656_vm0, %v7034_v0  ;;  %v3959_v0 = vsel %vm1115_vm1, %v3954_v63, %v13641_v45  ;;  %v7075_v63 = vrot.slane %v12777_v23, 1  ;;  %v11153_v45 = vld [vmem:[#allocation2 + $0x100] sm:$0xff] }
 0x310   : > { %10179 = vmatprep.mubr.msk.bf16.mxu0 %vm656_vm0, %v7036_v26  ;;  %v3968_v26 = vshrl.u32 %v11146_v36, 16  ;;  %v4020_v55 = vshll.u32 %v11153_v45, 16  ;;  %v4024_v17 = vshrl.u32 %v11153_v45, 16 }
 0x312   : > { %v3970_v13 = vor.u32 %v3968_v26, %v3966_v1 }
 0x314   : > { %v3975_v54 = vsel %vm1115_vm1, %v3970_v13, %v3974_v2 }
 0x315   : > { %9780 = vmatmul.mubr.msk.bf16.gmra.mrb[56].mxu1 %vm656_vm0, %v12761_v34 }
 0x316   : > { %9783 = vmatprep.mubr.msk.bf16.mxu1 %vm656_vm0, %v12775_v56 }
 0x317   : > { %10180 = vmatmul.mubr.msk.bf16.gmra.mrb[16].mxu0 %vm656_vm0, %v7038_v15  ;;  %v11148_v15 = vld [vmem:[#allocation2 + $0xd8] sm:$0xff] }
 0x318   : > { %10183 = vmatprep.mubr.msk.bf16.mxu0 %vm656_vm0, %v7040_v8  ;;  %v3980_v8 = vshll.u32 %v11148_v15, 16  ;;  %v3984_v51 = vshrl.u32 %v11148_v15, 16 }
 0x31d   : > { %9784 = vmatmul.mubr.msk.bf16.gmra.mrb[60].mxu1 %vm656_vm0, %v12777_v23 }
 0x31e   : > { %9787 = vmatprep.mubr.msk.bf16.mxu1 %vm656_vm0, %v12791_v20 }
 0x31f   : > { %10184 = vmatmul.mubr.msk.bf16.gmra.mrb[20].mxu0 %vm656_vm0, %v7042_v9  ;;  %v3978_v9 = vor.u32 %v3976_v41, %v3974_v2  ;;  %v4022_v41 = vrot.slane %v4020_v55, 1 }
 0x320   : > { %10187 = vmatprep.mubr.msk.bf16.mxu0 %vm656_vm0, %v7044_v5  ;;  %v3982_v5 = vrot.slane %v3980_v8, 1  ;;  %v7077_v8 = vrot.slane %v12791_v20, 1 }
 0x321   : > { %v4026_v23 = vor.u32 %v4024_v17, %v4022_v41  ;;  %v11161_v17 = vld [vmem:[#allocation2 + $0x140] sm:$0xff] }
 0x322   : > { %v3986_v53 = vor.u32 %v3984_v51, %v3982_v5 }
 0x325   : > { %9788 = vmatmul.mubr.msk.bf16.gmra.mrb[64].mxu1 %vm656_vm0, %v12793_v35 }
 0x326   : > { %9791 = vmatprep.mubr.msk.bf16.mxu1 %vm656_vm0, %v12807_v11 }
 0x327   : > { %10188 = vmatmul.mubr.msk.bf16.gmra.mrb[24].mxu0 %vm656_vm0, %v7046_v16  ;;  %v11149_v16 = vld [vmem:[#allocation2 + $0xe0] sm:$0xff] }
 0x328   : > { %10191 = vmatprep.mubr.msk.bf16.mxu0 %vm656_vm0, %v7048_v61  ;;  %v3988_v61 = vshll.u32 %v11149_v16, 16 }
 0x32a   : > { %v3990_v48 = vrot.slane %v3988_v61, 1  ;;  %v7078_v61 = vsel %vm2445_vm2, %v7075_v63, %v7077_v8 }
 0x32c   : > { %v3991_v40 = vsel %vm1115_vm1, %v3986_v53, %v3990_v48 }
 0x32d   : > { %9792 = vmatmul.mubr.msk.bf16.gmra.mrb[68].mxu1 %vm656_vm0, %v12809_v32 }
 0x32e   : > { %9795 = vmatprep.mubr.msk.bf16.mxu1 %vm656_vm0, %v12823_v18 }
 0x32f   : > { %10192 = vmatmul.mubr.msk.bf16.gmra.mrb[28].mxu0 %vm656_vm0, %v7050_v28  ;;  %v3983_v28 = vsel %vm1115_vm1, %v3978_v9, %v3982_v5  ;;  %v4032_v9 = vshrl.u32 %v11154_v47, 16 }
 0x330   : > { %10195 = vmatprep.mubr.msk.bf16.mxu0 %vm656_vm0, %v7052_v22  ;;  %v3992_v22 = vshrl.u32 %v11149_v16, 16 }
 0x332   : > { %v3994_v12 = vor.u32 %v3992_v22, %v3990_v48  ;;  %v7081_v22 = vrot.slane %v12807_v11, 1 }
 0x334   : > { %v3999_v60 = vsel %vm1115_vm1, %v3994_v12, %v3998_v19  ;;  %v4056_v12 = vshrl.u32 %v11157_v14, 16  ;;  %v7084_v58 = vsel %vm2445_vm2, %v7081_v22, %v7083_v10 }
 0x335   : > { %9796 = vmatmul.mubr.msk.bf16.gmra.mrb[72].mxu1 %vm656_vm0, %v12825_v57 }
 0x336   : > { %9799 = vmatprep.mubr.msk.bf16.mxu1 %vm656_vm0, %v12839_v4 }
 0x337   : > { %10196 = vmatmul.mubr.msk.bf16.gmra.mrb[32].mxu0 %vm656_vm0, %v7054_v50  ;;  %v7069_v50 = vrot.slane %v12759_v27, 1  ;;  %v4002_v27 = vor.u32 %v4000_v33, %v3998_v19  ;;  %v11158_v19 = vld [vmem:[#allocation2 + $0x128] sm:$0xff]  ;;  %v7085_v33 = vrot.slane %v12823_v18, 1 }
 0x338   : > { %10199 = vmatprep.mubr.msk.bf16.mxu0 %vm656_vm0, %v7056_v30  ;;  %v7071_v30 = vrot.slane %v12761_v34, 1  ;;  %v4010_v34 = vor.u32 %v4008_v42, %v4006_v37  ;;  %v11159_v42 = vld [vmem:[#allocation2 + $0x130] sm:$0xff] }
 0x339   : > { %v7070_v7 = vsel %vm2445_vm2, %v7067_v29, %v7069_v50  ;;  %v4007_v1 = vsel %vm1115_vm1, %v4002_v27, %v4006_v37  ;;  %v11156_v29 = vld [vmem:[#allocation2 + $0x118] sm:$0xff]  ;;  %v4072_v37 = vshrl.u32 %v11159_v42, 16 }
 0x33a   : > { %v7072_v36 = vsel %vm2445_vm2, %v7069_v50, %v7071_v30  ;;  %v4044_v16 = vshll.u32 %v11156_v29, 16  ;;  %v4048_v48 = vshrl.u32 %v11156_v29, 16  ;;  %v4060_v50 = vshll.u32 %v11158_v19, 16  ;;  %v11160_v27 = vld [vmem:[#allocation2 + $0x138] sm:$0xff] }
 0x33d   : > { %9800 = vmatmul.mubr.msk.bf16.gmra.mrb[76].mxu1 %vm656_vm0, %v12841_v3 }
 0x33e   : > { %9851 = vmatprep.mubr.msk.bf16.mxu1 %vm656_vm0, %v3951_v62  ;;  %v11152_v62 = vld [vmem:[#allocation2 + $0xf8] sm:$0xff] }
 0x33f   : > { %10200 = vmatmul.mubr.msk.bf16.gmra.mrb[36].mxu0 %vm656_vm0, %v7058_v59  ;;  %v4012_v21 = vshll.u32 %v11152_v62, 16  ;;  %v4016_v44 = vshrl.u32 %v11152_v62, 16  ;;  %v4068_v62 = vshll.u32 %v11159_v42, 16 }
 0x340   : > { %10203 = vmatprep.mubr.msk.bf16.mxu0 %vm656_vm0, %v7060_v25  ;;  %v7073_v25 = vrot.slane %v12775_v56, 1 }
 0x341   : > { %v4014_v59 = vrot.slane %v4012_v21, 1 }
 0x342   : > { %v7074_v26 = vsel %vm2445_vm2, %v7071_v30, %v7073_v25 }
 0x343   : > { %v4015_v46 = vsel %vm1115_vm1, %v4010_v34, %v4014_v59  ;;  %v4018_v56 = vor.u32 %v4016_v44, %v4014_v59  ;;  %v4076_v34 = vshll.u32 %v11160_v27, 16  ;;  %v7086_v59 = vsel %vm2445_vm2, %v7083_v10, %v7085_v33 }
 0x345   : > { %9852 = vmatmul.mubr.msk.bf16.vlgmr.msra.gmra.mrb[40].mxu1 %vm656_vm0, %v3959_v0  ;;  %v4028_v0 = vshll.u32 %v11154_v47, 16  ;;  %v4023_v13 = vsel %vm1115_vm1, %v4018_v56, %v4022_v41  ;;  %v4078_v45 = vrot.slane %v4076_v34, 1  ;;  %v4084_v47 = vshll.u32 %v11161_v17, 16 }
 0x346   : > { %9855 = vmatprep.mubr.msk.bf16.mxu1 %vm656_vm0, %v3967_v6  ;;  %v7076_v6 = vsel %vm2445_vm2, %v7073_v25, %v7075_v63  ;;  %v4070_v63 = vrot.slane %v4068_v62, 1 }
 0x347   : > { %10204 = vmatmul.mubr.msk.bf16.gmra.mrb[40].mxu0 %vm656_vm0, %v7062_v31  ;;  %v4030_v15 = vrot.slane %v4028_v0, 1  ;;  %v7079_v31 = vrot.slane %v12793_v35, 1 }
 0x348   : > { %10207 = vmatprep.mubr.msk.bf16.mxu0 %vm656_vm0, %v7064_v24  ;;  %v11155_v24 = vld [vmem:[#allocation2 + $0x110] sm:$0xff] }
 0x349   : > { %v4036_v2 = vshll.u32 %v11155_v24, 16  ;;  %v4031_v5 = vsel %vm1115_vm1, %v4026_v23, %v4030_v15  ;;  %v4040_v38 = vshrl.u32 %v11155_v24, 16  ;;  %v4034_v20 = vor.u32 %v4032_v9, %v4030_v15  ;;  %v11162_v15 = vld [vmem:[#allocation2 + $0x148] sm:$0xff] }
 0x34a   : > { %v7082_v30 = vsel %vm2445_vm2, %v7079_v31, %v7081_v22  ;;  %v4088_v23 = vshrl.u32 %v11161_v17, 16 }
 0x34b   : > { %v4038_v51 = vrot.slane %v4036_v2, 1 }
 0x34d   : > { %9856 = vmatmul.mubr.msk.bf16.gmra.mrb[44].mxu1 %vm656_vm0, %v3975_v54  ;;  %v7080_v54 = vsel %vm2445_vm2, %v7077_v8, %v7079_v31  ;;  %v4042_v35 = vor.u32 %v4040_v38, %v4038_v51  ;;  %v4092_v8 = vshll.u32 %v11162_v15, 16  ;;  %v4086_v31 = vrot.slane %v4084_v47, 1 }
 0x34e   : > { %9859 = vmatprep.mubr.msk.bf16.mxu1 %vm656_vm0, %v3983_v28  ;;  %v4046_v28 = vrot.slane %v4044_v16, 1  ;;  %v11164_v16 = vld [vmem:[#allocation2 + $0x158] sm:$0xff] }
 0x34f   : > { %10208 = vmatmul.mubr.msk.bf16.gmra.mrb[44].mxu0 %vm656_vm0, %v7066_v43  ;;  %v4052_v43 = vshll.u32 %v11157_v14, 16  ;;  %v4090_v2 = vor.u32 %v4088_v23, %v4086_v31 }
 0x350   : > { %10211 = vmatprep.mubr.msk.bf16.mxu0 %vm656_vm0, %v7068_v39  ;;  %v4039_v39 = vsel %vm1115_vm1, %v4034_v20, %v4038_v51  ;;  %v4047_v53 = vsel %vm1115_vm1, %v4042_v35, %v4046_v28  ;;  %v4050_v11 = vor.u32 %v4048_v48, %v4046_v28  ;;  %v4096_v20 = vshrl.u32 %v11162_v15, 16  ;;  %v11165_v35 = vld [vmem:[#allocation2 + $0x150] sm:$0x1] }
 0x351   : > { %v4054_v52 = vrot.slane %v4052_v43, 1  ;;  %v4100_v28 = vshll.u32 %v11165_v35, 16 }
 0x353   : > { %v4058_v32 = vor.u32 %v4056_v12, %v4054_v52  ;;  %v4055_v21 = vsel %vm1115_vm1, %v4050_v11, %v4054_v52  ;;  %v4102_v48 = vrot.slane %v4100_v28, 1  ;;  %v7097_v12 = vrot.slane %v12865_v49, 1 }
 0x355   : > { %9860 = vmatmul.mubr.msk.bf16.gmra.mrb[48].mxu1 %vm656_vm0, %v3991_v40  ;;  %v4062_v40 = vrot.slane %v4060_v50, 1 }
 0x356   : > { %9863 = vmatprep.mubr.msk.bf16.mxu1 %vm656_vm0, %v3999_v60  ;;  %v7087_v60 = vrot.slane %v12825_v57, 1  ;;  %v4074_v57 = vor.u32 %v4072_v37, %v4070_v63 }
 0x357   : > { %10212 = vmatmul.mubr.msk.bf16.gmra.mrb[48].mxu0 %vm656_vm0, %v7070_v7  ;;  %v4064_v7 = vshrl.u32 %v11158_v19, 16 }
 0x358   : > { %10215 = vmatprep.mubr.msk.bf16.mxu0 %vm656_vm0, %v7072_v36  ;;  %v4063_v36 = vsel %vm1115_vm1, %v4058_v32, %v4062_v40  ;;  %v7088_v25 = vsel %vm2445_vm2, %v7085_v33, %v7087_v60  ;;  %v4079_v56 = vsel %vm1115_vm1, %v4074_v57, %v4078_v45 }
 0x359   : > { %v4066_v18 = vor.u32 %v4064_v7, %v4062_v40 }
 0x35d   : > { %9864 = vmatmul.mubr.msk.bf16.gmra.mrb[52].mxu1 %vm656_vm0, %v4007_v1  ;;  %v7089_v1 = vrot.slane %v12839_v4, 1 }
 0x35e   : > { %9867 = vmatprep.mubr.msk.bf16.mxu1 %vm656_vm0, %v4015_v46  ;;  %v7091_v46 = vrot.slane %v12841_v3, 1 }
 0x35f   : > { %10216 = vmatmul.mubr.msk.bf16.gmra.mrb[52].mxu0 %vm656_vm0, %v7074_v26  ;;  %v4071_v26 = vsel %vm1115_vm1, %v4066_v18, %v4070_v63  ;;  %v7090_v4 = vsel %vm2445_vm2, %v7087_v60, %v7089_v1 }
 0x360   : > { %10219 = vmatprep.mubr.msk.bf16.mxu0 %vm656_vm0, %v7076_v6  ;;  %v4080_v6 = vshrl.u32 %v11160_v27, 16  ;;  %v7092_v3 = vsel %vm2445_vm2, %v7089_v1, %v7091_v46 }
 0x362   : > { %v4082_v24 = vor.u32 %v4080_v6, %v4078_v45 }
 0x364   : > { %v4087_v51 = vsel %vm1115_vm1, %v4082_v24, %v4086_v31 }
 0x365   : > { %9868 = vmatmul.mubr.msk.bf16.gmra.mrb[56].mxu1 %vm656_vm0, %v4023_v13  ;;  %v4094_v13 = vrot.slane %v4092_v8, 1  ;;  %v13159_v8 = vld [vmem:[#allocation9] ss:$0 sm:$0xff] }
 0x366   : > { %9871 = vmatprep.mubr.msk.bf16.mxu1 %vm656_vm0, %v4031_v5  ;;  %v11163_v5 = vld [vmem:[#allocation2 + $0x150] sm:$0xff] }
 0x367   : > { %10220 = vmatmul.mubr.msk.bf16.gmra.mrb[56].mxu0 %vm656_vm0, %v7078_v61  ;;  %v7093_v38 = vrot.slane %v11163_v5, 1  ;;  %v7095_v61 = vrot.slane %v11164_v16, 1  ;;  %v4095_v10 = vsel %vm1115_vm1, %v4090_v2, %v4094_v13 }
 0x368   : > { %10223 = vmatprep.mubr.msk.bf16.mxu0 %vm656_vm0, %v7080_v54 }
 0x369   : > { %v7094_v14 = vsel %vm2445_vm2, %v7091_v46, %v7093_v38  ;;  %v7096_v43 = vsel %vm2445_vm2, %v7093_v38, %v7095_v61  ;;  %v7098_v52 = vsel %vm2445_vm2, %v7095_v61, %v7097_v12 }
 0x36d   : > { %9872 = vmatmul.mubr.msk.bf16.gmra.mrb[60].mxu1 %vm656_vm0, %v4039_v39  ;;  %v4098_v39 = vor.u32 %v4096_v20, %v4094_v13 }
 0x36e   : > { %9875 = vmatprep.mubr.msk.bf16.mxu1 %vm656_vm0, %v4047_v53 }
 0x36f   : > { %10224 = vmatmul.mubr.msk.bf16.gmra.mrb[60].mxu0 %vm656_vm0, %v7082_v30  ;;  %v4103_v30 = vsel %vm1115_vm1, %v4098_v39, %v4102_v48 }
 0x370   : > { %10227 = vmatprep.mubr.msk.bf16.mxu0 %vm656_vm0, %v7084_v58 }
 0x375   : > { %9876 = vmatmul.mubr.msk.bf16.gmra.mrb[64].mxu1 %vm656_vm0, %v4055_v21 }
 0x376   : > { %9879 = vmatprep.mubr.msk.bf16.mxu1 %vm656_vm0, %v4063_v36 }
 0x377   : > { %10228 = vmatmul.mubr.msk.bf16.gmra.mrb[64].mxu0 %vm656_vm0, %v7086_v59 }
 0x378   : > { %v13055_v55 = vpop.f32.mrb[0].mxu1  ;;  %10231 = vmatprep.mubr.msk.bf16.mxu0 %vm656_vm0, %v7088_v25 }
 0x379   : > { %v13059_v44 = vpop.f32.mrb[1].mxu1 }
 0x37a   : > { %v13062_v0 = vpop.f32.mrb[2].mxu1 }
 0x37b   : > { %v13065_v41 = vpop.f32.mrb[3].mxu1 }
 0x37d   : > { %9880 = vmatmul.mubr.msk.bf16.gmra.mrb[68].mxu1 %vm656_vm0, %v4071_v26 }
 0x37e   : > { %9883 = vmatprep.mubr.msk.bf16.mxu1 %vm656_vm0, %v4079_v56 }
 0x37f   : > { %10232 = vmatmul.mubr.msk.bf16.gmra.mrb[68].mxu0 %vm656_vm0, %v7090_v4 }
 0x380   : > { %v13073_v9 = vpop.f32.mrb[4].mxu1  ;;  %10235 = vmatprep.mubr.msk.bf16.mxu0 %vm656_vm0, %v7092_v3 }
 0x381   : > { %v13076_v29 = vpop.f32.mrb[5].mxu1 }
 0x382   : > { %v13078_v54 = vpop.f32.mrb[6].mxu1 }
 0x383   : > { %v13081_v22 = vpop.f32.mrb[7].mxu1 }
 0x385   : > { %9884 = vmatmul.mubr.msk.bf16.gmra.mrb[72].mxu1 %vm656_vm0, %v4087_v51 }
 0x386   : > { %9887 = vmatprep.mubr.msk.bf16.mxu1 %vm656_vm0, %v4095_v10 }
 0x387   : > { %10236 = vmatmul.mubr.msk.bf16.gmra.mrb[72].mxu0 %vm656_vm0, %v7094_v14 }
 0x388   : > { %v13089_v53 = vpop.f32.mrb[8].mxu1  ;;  %10239 = vmatprep.mubr.msk.bf16.mxu0 %vm656_vm0, %v7096_v43 }
 0x389   : > { %v13093_v19 = vpop.f32.mrb[9].mxu1 }
 0x38a   : > { %v13095_v50 = vpop.f32.mrb[10].mxu1 }
 0x38b   : > { %v13098_v58 = vpop.f32.mrb[11].mxu1 }
 0x38d   : > { %9888 = vmatmul.mubr.msk.bf16.gmra.mrb[76].mxu1 %vm656_vm0, %v4103_v30 }
 0x38f   : > { %10240 = vmatmul.mubr.msk.bf16.gmra.mrb[76].mxu0 %vm656_vm0, %v7098_v52 }
 0x390   : > { %v13103_v11 = vpop.f32.mrb[12].mxu1 }
 0x391   : > { %v13105_v32 = vpop.f32.mrb[13].mxu1 }
 0x392   : > { %v13107_v40 = vpop.f32.mrb[14].mxu1 }
 0x393   : > { %v13109_v49 = vpop.f32.mrb[15].mxu1 }
 0x398   : > { %v13111_v33 = vpop.f32.mrb[16].mxu1 }
 0x399   : > { %v13113_v60 = vpop.f32.mrb[17].mxu1 }
 0x39a   : > { %v13115_v42 = vpop.f32.mrb[18].mxu1 }
 0x39b   : > { %v13117_v62 = vpop.f32.mrb[19].mxu1 }
 0x3a0   : > { %v13119_v21 = vpop.f32.mrb[20].mxu1 }
 0x3a1   : > { %v13121_v7 = vpop.f32.mrb[21].mxu1 }
 0x3a2   : > { %v13123_v36 = vpop.f32.mrb[22].mxu1 }
 0x3a3   : > { %v13125_v37 = vpop.f32.mrb[23].mxu1 }
 0x3a8   : > { %v13127_v27 = vpop.f32.mrb[24].mxu1 }
 0x3a9   : > { %v13129_v34 = vpop.f32.mrb[25].mxu1 }
 0x3aa   : > { %v13131_v59 = vpop.f32.mrb[26].mxu1 }
 0x3ab   : > { %v13133_v25 = vpop.f32.mrb[27].mxu1 }
 0x3b0   : > { %v13135_v63 = vpop.f32.mrb[28].mxu1 }
 0x3b1   : > { %v13137_v18 = vpop.f32.mrb[29].mxu1 }
 0x3b2   : > { %v13139_v57 = vpop.f32.mrb[30].mxu1 }
 0x3b3   : > { %v13141_v45 = vpop.f32.mrb[31].mxu1 }
 0x3b8   : > { %v13143_v1 = vpop.f32.mrb[32].mxu1 }
 0x3b9   : > { %v13145_v46 = vpop.f32.mrb[33].mxu1 }
 0x3ba   : > { %v13147_v17 = vpop.f32.mrb[34].mxu1 }
 0x3bb   : > { %v13149_v47 = vpop.f32.mrb[35].mxu1 }
 0x3c0   : > { %v13151_v26 = vpop.f32.mrb[36].mxu1 }
 0x3c1   : > { %v13153_v6 = vpop.f32.mrb[37].mxu1 }
 0x3c2   : > { %v13155_v56 = vpop.f32.mrb[38].mxu1 }
 0x3c3   : > { %v13157_v23 = vpop.f32.mrb[39].mxu1 }
 0x3ca   : > { %v10165_v15 = vpop.f32.mrb[0].mxu0 }
 0x3cb   : > { %v10251_v4 = vadd.f32 %v10165_v15, %v13055_v55  ;;  %v7277_v3 = vpop.f32.mrb[1].mxu0 }
 0x3cc   : > { %v10252_v31 = vadd.f32 %v7277_v3, %v13059_v44  ;;  %v10166_v24 = vpop.f32.mrb[2].mxu0 }
 0x3cd   : > { %v7685_v2 = vadd.f32 %v10251_v4, %v13159_v8  ;;  %v10253_v13 = vadd.f32 %v10166_v24, %v13062_v0  ;;  %v7280_v5 = vpop.f32.mrb[3].mxu0 }
 0x3ce   : > { %v7683_v38 = vadd.f32 %v10252_v31, %v13159_v8  ;;  %v10254_v16 = vadd.f32 %v7280_v5, %v13065_v41 }
 0x3cf   : > { %v7765_v61 = vmax.f32 %v7685_v2, 0.0  ;;  %v7686_v51 = vadd.f32 %v10253_v13, %v13159_v8 }
 0x3d0   : > { %v7763_v20 = vmax.f32 %v7683_v38, 0.0  ;;  %v7684_v55 = vadd.f32 %v10254_v16, %v13159_v8 }
 0x3d1   : > { %v8976_v35 = vpack.c.bf16 %v7765_v61, %v7765_v61  ;;  %v7766_v44 = vmax.f32 %v7686_v51, 0.0 }
 0x3d2   : > { %v8974_v28 = vpack.c.bf16 %v7763_v20, %v7763_v20  ;;  %v7764_v10 = vmax.f32 %v7684_v55, 0.0  ;;  %v10169_v14 = vpop.f32.mrb[4].mxu0 }
 0x3d3   : > { %8166 = vst.msk [vmem:[%s13171_s24 + $0x8] sm:$0xf] %vm8163_vm3, %v8976_v35  ;;  %v8977_v0 = vpack.c.bf16 %v7766_v44, %v7766_v44  ;;  %v10255_v41 = vadd.f32 %v10169_v14, %v13073_v9  ;;  %v7293_v43 = vpop.f32.mrb[5].mxu0 }
 0x3d4   : > { %8164 = vst.msk [vmem:[%s13171_s24] sm:$0xf] %vm8163_vm3, %v8974_v28  ;;  %v8975_v39 = vpack.c.bf16 %v7764_v10, %v7764_v10  ;;  %v10256_v48 = vadd.f32 %v7293_v43, %v13076_v29  ;;  %v10170_v12 = vpop.f32.mrb[6].mxu0 }
 0x3d5   : > { %8167 = vst.msk [vmem:[%s13171_s24 + $0xc] sm:$0xf] %vm8163_vm3, %v8977_v0  ;;  %v7689_v30 = vadd.f32 %v10255_v41, %v13159_v8  ;;  %v10257_v52 = vadd.f32 %v10170_v12, %v13078_v54  ;;  %v7296_v15 = vpop.f32.mrb[7].mxu0 }
 0x3d6   : > { %8165 = vst.msk [vmem:[%s13171_s24 + $0x4] sm:$0xf] %vm8163_vm3, %v8975_v39  ;;  %v7687_v9 = vadd.f32 %v10256_v48, %v13159_v8  ;;  %v10258_v4 = vadd.f32 %v7296_v15, %v13081_v22 }
 0x3d7   : > { %v7769_v3 = vmax.f32 %v7689_v30, 0.0  ;;  %v7690_v31 = vadd.f32 %v10257_v52, %v13159_v8 }
 0x3d8   : > { %v7767_v29 = vmax.f32 %v7687_v9, 0.0  ;;  %v7688_v24 = vadd.f32 %v10258_v4, %v13159_v8 }
 0x3d9   : > { %v8980_v2 = vpack.c.bf16 %v7769_v3, %v7769_v3  ;;  %v7770_v13 = vmax.f32 %v7690_v31, 0.0 }
 0x3da   : > { %v8978_v5 = vpack.c.bf16 %v7767_v29, %v7767_v29  ;;  %v7768_v54 = vmax.f32 %v7688_v24, 0.0  ;;  %v10173_v38 = vpop.f32.mrb[8].mxu0 }
 0x3db   : > { %8170 = vst.msk [vmem:[%s13171_s24 + $0x18] sm:$0xf] %vm8163_vm3, %v8980_v2  ;;  %v8981_v16 = vpack.c.bf16 %v7770_v13, %v7770_v13  ;;  %v10259_v61 = vadd.f32 %v10173_v38, %v13089_v53  ;;  %v7309_v51 = vpop.f32.mrb[9].mxu0 }
 0x3dc   : > { %8168 = vst.msk [vmem:[%s13171_s24 + $0x10] sm:$0xf] %vm8163_vm3, %v8978_v5  ;;  %v8979_v22 = vpack.c.bf16 %v7768_v54, %v7768_v54  ;;  %v10260_v20 = vadd.f32 %v7309_v51, %v13093_v19  ;;  %v10174_v55 = vpop.f32.mrb[10].mxu0 }
 0x3dd   : > { %8171 = vst.msk [vmem:[%s13171_s24 + $0x1c] sm:$0xf] %vm8163_vm3, %v8981_v16  ;;  %v7693_v35 = vadd.f32 %v10259_v61, %v13159_v8  ;;  %v10261_v44 = vadd.f32 %v10174_v55, %v13095_v50  ;;  %v7312_v28 = vpop.f32.mrb[11].mxu0 }
 0x3de   : > { %8169 = vst.msk [vmem:[%s13171_s24 + $0x14] sm:$0xf] %vm8163_vm3, %v8979_v22  ;;  %v7691_v53 = vadd.f32 %v10260_v20, %v13159_v8  ;;  %v10262_v10 = vadd.f32 %v7312_v28, %v13098_v58 }
 0x3df   : > { %v7773_v14 = vmax.f32 %v7693_v35, 0.0  ;;  %v7694_v0 = vadd.f32 %v10261_v44, %v13159_v8 }
 0x3e0   : > { %v7771_v19 = vmax.f32 %v7691_v53, 0.0  ;;  %v7692_v41 = vadd.f32 %v10262_v10, %v13159_v8 }
 0x3e1   : > { %v8984_v43 = vpack.c.bf16 %v7773_v14, %v7773_v14  ;;  %v7774_v39 = vmax.f32 %v7694_v0, 0.0 }
 0x3e2   : > { %v8982_v48 = vpack.c.bf16 %v7771_v19, %v7771_v19  ;;  %v7772_v50 = vmax.f32 %v7692_v41, 0.0  ;;  %v10177_v12 = vpop.f32.mrb[12].mxu0 }
 0x3e3   : > { %8174 = vst.msk [vmem:[%s13171_s24 + $0x28] sm:$0xf] %vm8163_vm3, %v8984_v43  ;;  %v8985_v30 = vpack.c.bf16 %v7774_v39, %v7774_v39  ;;  %v10263_v52 = vadd.f32 %v10177_v12, %v13103_v11  ;;  %v7325_v15 = vpop.f32.mrb[13].mxu0 }
 0x3e4   : > { %8172 = vst.msk [vmem:[%s13171_s24 + $0x20] sm:$0xf] %vm8163_vm3, %v8982_v48  ;;  %v8983_v58 = vpack.c.bf16 %v7772_v50, %v7772_v50  ;;  %v10264_v9 = vadd.f32 %v7325_v15, %v13105_v32  ;;  %v10178_v4 = vpop.f32.mrb[14].mxu0 }
 0x3e5   : > { %8175 = vst.msk [vmem:[%s13171_s24 + $0x2c] sm:$0xf] %vm8163_vm3, %v8985_v30  ;;  %v7697_v3 = vadd.f32 %v10263_v52, %v13159_v8  ;;  %v10265_v31 = vadd.f32 %v10178_v4, %v13107_v40  ;;  %v7328_v29 = vpop.f32.mrb[15].mxu0 }
 0x3e6   : > { %8173 = vst.msk [vmem:[%s13171_s24 + $0x24] sm:$0xf] %vm8163_vm3, %v8983_v58  ;;  %v7695_v11 = vadd.f32 %v10264_v9, %v13159_v8  ;;  %v10266_v24 = vadd.f32 %v7328_v29, %v13109_v49 }
 0x3e7   : > { %v7777_v2 = vmax.f32 %v7697_v3, 0.0  ;;  %v7698_v13 = vadd.f32 %v10265_v31, %v13159_v8 }
 0x3e8   : > { %v7775_v32 = vmax.f32 %v7695_v11, 0.0  ;;  %v7696_v5 = vadd.f32 %v10266_v24, %v13159_v8 }
 0x3e9   : > { %v8988_v54 = vpack.c.bf16 %v7777_v2, %v7777_v2  ;;  %v7778_v38 = vmax.f32 %v7698_v13, 0.0 }
 0x3ea   : > { %v8986_v16 = vpack.c.bf16 %v7775_v32, %v7775_v32  ;;  %v7776_v40 = vmax.f32 %v7696_v5, 0.0  ;;  %v10181_v61 = vpop.f32.mrb[16].mxu0 }
 0x3eb   : > { %8178 = vst.msk [vmem:[%s13171_s24 + $0x38] sm:$0xf] %vm8163_vm3, %v8988_v54  ;;  %v8989_v51 = vpack.c.bf16 %v7778_v38, %v7778_v38  ;;  %v10267_v22 = vadd.f32 %v10181_v61, %v13111_v33  ;;  %v7341_v20 = vpop.f32.mrb[17].mxu0 }
 0x3ec   : > { %8176 = vst.msk [vmem:[%s13171_s24 + $0x30] sm:$0xf] %vm8163_vm3, %v8986_v16  ;;  %v8987_v49 = vpack.c.bf16 %v7776_v40, %v7776_v40  ;;  %v10268_v55 = vadd.f32 %v7341_v20, %v13113_v60  ;;  %v10182_v35 = vpop.f32.mrb[18].mxu0 }
 0x3ed   : > { %8179 = vst.msk [vmem:[%s13171_s24 + $0x3c] sm:$0xf] %vm8163_vm3, %v8989_v51  ;;  %v7701_v44 = vadd.f32 %v10267_v22, %v13159_v8  ;;  %v10269_v28 = vadd.f32 %v10182_v35, %v13115_v42  ;;  %v7344_v53 = vpop.f32.mrb[19].mxu0 }
 0x3ee   : > { %8177 = vst.msk [vmem:[%s13171_s24 + $0x34] sm:$0xf] %vm8163_vm3, %v8987_v49  ;;  %v7699_v33 = vadd.f32 %v10268_v55, %v13159_v8  ;;  %v10270_v10 = vadd.f32 %v7344_v53, %v13117_v62 }
 0x3ef   : > { %v7781_v14 = vmax.f32 %v7701_v44, 0.0  ;;  %v7702_v0 = vadd.f32 %v10269_v28, %v13159_v8 }
 0x3f0   : > { %v7779_v60 = vmax.f32 %v7699_v33, 0.0  ;;  %v7700_v19 = vadd.f32 %v10270_v10, %v13159_v8 }
 0x3f1   : > { %v8992_v41 = vpack.c.bf16 %v7781_v14, %v7781_v14  ;;  %v7782_v43 = vmax.f32 %v7702_v0, 0.0 }
 0x3f2   : > { %v8990_v39 = vpack.c.bf16 %v7779_v60, %v7779_v60  ;;  %v7780_v42 = vmax.f32 %v7700_v19, 0.0  ;;  %v10185_v48 = vpop.f32.mrb[20].mxu0 }
 0x3f3   : > { %8182 = vst.msk [vmem:[%s13171_s24 + $0x48] sm:$0xf] %vm8163_vm3, %v8992_v41  ;;  %v8993_v50 = vpack.c.bf16 %v7782_v43, %v7782_v43  ;;  %v10271_v12 = vadd.f32 %v10185_v48, %v13119_v21  ;;  %v7357_v30 = vpop.f32.mrb[21].mxu0 }
 0x3f4   : > { %8180 = vst.msk [vmem:[%s13171_s24 + $0x40] sm:$0xf] %vm8163_vm3, %v8990_v39  ;;  %v8991_v62 = vpack.c.bf16 %v7780_v42, %v7780_v42  ;;  %v10272_v52 = vadd.f32 %v7357_v30, %v13121_v7  ;;  %v10186_v15 = vpop.f32.mrb[22].mxu0 }
 0x3f5   : > { %8183 = vst.msk [vmem:[%s13171_s24 + $0x4c] sm:$0xf] %vm8163_vm3, %v8993_v50  ;;  %v7705_v58 = vadd.f32 %v10271_v12, %v13159_v8  ;;  %v10273_v9 = vadd.f32 %v10186_v15, %v13123_v36  ;;  %v7360_v4 = vpop.f32.mrb[23].mxu0 }
 0x3f6   : > { %8181 = vst.msk [vmem:[%s13171_s24 + $0x44] sm:$0xf] %vm8163_vm3, %v8991_v62  ;;  %v7703_v21 = vadd.f32 %v10272_v52, %v13159_v8  ;;  %v10274_v3 = vadd.f32 %v7360_v4, %v13125_v37 }
 0x3f7   : > { %v7785_v31 = vmax.f32 %v7705_v58, 0.0  ;;  %v7706_v29 = vadd.f32 %v10273_v9, %v13159_v8 }
 0x3f8   : > { %v7783_v7 = vmax.f32 %v7703_v21, 0.0  ;;  %v7704_v11 = vadd.f32 %v10274_v3, %v13159_v8 }
 0x3f9   : > { %v8996_v24 = vpack.c.bf16 %v7785_v31, %v7785_v31  ;;  %v7786_v2 = vmax.f32 %v7706_v29, 0.0 }
 0x3fa   : > { %v8994_v13 = vpack.c.bf16 %v7783_v7, %v7783_v7  ;;  %v7784_v36 = vmax.f32 %v7704_v11, 0.0  ;;  %v10189_v32 = vpop.f32.mrb[24].mxu0 }
 0x3fb   : > { %8186 = vst.msk [vmem:[%s13171_s24 + $0x58] sm:$0xf] %vm8163_vm3, %v8996_v24  ;;  %v8997_v5 = vpack.c.bf16 %v7786_v2, %v7786_v2  ;;  %v10275_v54 = vadd.f32 %v10189_v32, %v13127_v27  ;;  %v7373_v38 = vpop.f32.mrb[25].mxu0 }
 0x3fc   : > { %8184 = vst.msk [vmem:[%s13171_s24 + $0x50] sm:$0xf] %vm8163_vm3, %v8994_v13  ;;  %v8995_v37 = vpack.c.bf16 %v7784_v36, %v7784_v36  ;;  %v10276_v16 = vadd.f32 %v7373_v38, %v13129_v34  ;;  %v10190_v40 = vpop.f32.mrb[26].mxu0 }
 0x3fd   : > { %8187 = vst.msk [vmem:[%s13171_s24 + $0x5c] sm:$0xf] %vm8163_vm3, %v8997_v5  ;;  %v7709_v61 = vadd.f32 %v10275_v54, %v13159_v8  ;;  %v10277_v51 = vadd.f32 %v10190_v40, %v13131_v59  ;;  %v7376_v22 = vpop.f32.mrb[27].mxu0 }
 0x3fe   : > { %8185 = vst.msk [vmem:[%s13171_s24 + $0x54] sm:$0xf] %vm8163_vm3, %v8995_v37  ;;  %v7707_v27 = vadd.f32 %v10276_v16, %v13159_v8  ;;  %v10278_v20 = vadd.f32 %v7376_v22, %v13133_v25 }
 0x3ff   : > { %v7789_v49 = vmax.f32 %v7709_v61, 0.0  ;;  %v7710_v55 = vadd.f32 %v10277_v51, %v13159_v8 }
 0x400   : > { %v7787_v34 = vmax.f32 %v7707_v27, 0.0  ;;  %v7708_v35 = vadd.f32 %v10278_v20, %v13159_v8 }
 0x401   : > { %v9000_v44 = vpack.c.bf16 %v7789_v49, %v7789_v49  ;;  %v7790_v28 = vmax.f32 %v7710_v55, 0.0 }
 0x402   : > { %v8998_v53 = vpack.c.bf16 %v7787_v34, %v7787_v34  ;;  %v7788_v59 = vmax.f32 %v7708_v35, 0.0  ;;  %v10193_v33 = vpop.f32.mrb[28].mxu0 }
 0x403   : > { %8190 = vst.msk [vmem:[%s13171_s24 + $0x68] sm:$0xf] %vm8163_vm3, %v9000_v44  ;;  %v9001_v10 = vpack.c.bf16 %v7790_v28, %v7790_v28  ;;  %v10279_v14 = vadd.f32 %v10193_v33, %v13135_v63  ;;  %v7389_v0 = vpop.f32.mrb[29].mxu0 }
 0x404   : > { %8188 = vst.msk [vmem:[%s13171_s24 + $0x60] sm:$0xf] %vm8163_vm3, %v8998_v53  ;;  %v8999_v25 = vpack.c.bf16 %v7788_v59, %v7788_v59  ;;  %v10280_v60 = vadd.f32 %v7389_v0, %v13137_v18  ;;  %v10194_v19 = vpop.f32.mrb[30].mxu0 }
 0x405   : > { %8191 = vst.msk [vmem:[%s13171_s24 + $0x6c] sm:$0xf] %vm8163_vm3, %v9001_v10  ;;  %v7713_v41 = vadd.f32 %v10279_v14, %v13159_v8  ;;  %v10281_v43 = vadd.f32 %v10194_v19, %v13139_v57  ;;  %v7392_v39 = vpop.f32.mrb[31].mxu0 }
 0x406   : > { %8189 = vst.msk [vmem:[%s13171_s24 + $0x64] sm:$0xf] %vm8163_vm3, %v8999_v25  ;;  %v7711_v63 = vadd.f32 %v10280_v60, %v13159_v8  ;;  %v10282_v42 = vadd.f32 %v7392_v39, %v13141_v45 }
 0x407   : > { %v7793_v48 = vmax.f32 %v7713_v41, 0.0  ;;  %v7714_v50 = vadd.f32 %v10281_v43, %v13159_v8 }
 0x408   : > { %v7791_v18 = vmax.f32 %v7711_v63, 0.0  ;;  %v7712_v12 = vadd.f32 %v10282_v42, %v13159_v8 }
 0x409   : > { %v9004_v30 = vpack.c.bf16 %v7793_v48, %v7793_v48  ;;  %v7794_v62 = vmax.f32 %v7714_v50, 0.0 }
 0x40a   : > { %v9002_v52 = vpack.c.bf16 %v7791_v18, %v7791_v18  ;;  %v7792_v57 = vmax.f32 %v7712_v12, 0.0  ;;  %v10197_v15 = vpop.f32.mrb[32].mxu0 }
 0x40b   : > { %8194 = vst.msk [vmem:[%s13171_s24 + $0x78] sm:$0xf] %vm8163_vm3, %v9004_v30  ;;  %v9005_v58 = vpack.c.bf16 %v7794_v62, %v7794_v62  ;;  %v10283_v9 = vadd.f32 %v10197_v15, %v13143_v1  ;;  %v7405_v4 = vpop.f32.mrb[33].mxu0 }
 0x40c   : > { %8192 = vst.msk [vmem:[%s13171_s24 + $0x70] sm:$0xf] %vm8163_vm3, %v9002_v52  ;;  %v9003_v45 = vpack.c.bf16 %v7792_v57, %v7792_v57  ;;  %v10284_v21 = vadd.f32 %v7405_v4, %v13145_v46  ;;  %v10198_v3 = vpop.f32.mrb[34].mxu0 }
 0x40d   : > { %8195 = vst.msk [vmem:[%s13171_s24 + $0x7c] sm:$0xf] %vm8163_vm3, %v9005_v58  ;;  %v7717_v31 = vadd.f32 %v10283_v9, %v13159_v8  ;;  %v10285_v29 = vadd.f32 %v10198_v3, %v13147_v17  ;;  %v7408_v7 = vpop.f32.mrb[35].mxu0 }
 0x40e   : > { %8193 = vst.msk [vmem:[%s13171_s24 + $0x74] sm:$0xf] %vm8163_vm3, %v9003_v45  ;;  %v7715_v1 = vadd.f32 %v10284_v21, %v13159_v8  ;;  %v10286_v11 = vadd.f32 %v7408_v7, %v13149_v47 }
 0x40f   : > { %v7797_v24 = vmax.f32 %v7717_v31, 0.0  ;;  %v7718_v2 = vadd.f32 %v10285_v29, %v13159_v8 }
 0x410   : > { %v7795_v46 = vmax.f32 %v7715_v1, 0.0  ;;  %v7716_v13 = vadd.f32 %v10286_v11, %v13159_v8 }
 0x411   : > { %v9008_v36 = vpack.c.bf16 %v7797_v24, %v7797_v24  ;;  %v7798_v32 = vmax.f32 %v7718_v2, 0.0 }
 0x412   : > { %v9006_v5 = vpack.c.bf16 %v7795_v46, %v7795_v46  ;;  %v7796_v17 = vmax.f32 %v7716_v13, 0.0  ;;  %v10201_v54 = vpop.f32.mrb[36].mxu0 }
 0x413   : > { %8198 = vst.msk [vmem:[%s13171_s24 + $0x88] sm:$0xf] %vm8163_vm3, %v9008_v36  ;;  %v9009_v38 = vpack.c.bf16 %v7798_v32, %v7798_v32  ;;  %v10287_v37 = vadd.f32 %v10201_v54, %v13151_v26  ;;  %v7421_v16 = vpop.f32.mrb[37].mxu0 }
 0x414   : > { %8196 = vst.msk [vmem:[%s13171_s24 + $0x80] sm:$0xf] %vm8163_vm3, %v9006_v5  ;;  %v9007_v47 = vpack.c.bf16 %v7796_v17, %v7796_v17  ;;  %v10288_v40 = vadd.f32 %v7421_v16, %v13153_v6  ;;  %v10202_v61 = vpop.f32.mrb[38].mxu0 }
 0x415   : > { %8199 = vst.msk [vmem:[%s13171_s24 + $0x8c] sm:$0xf] %vm8163_vm3, %v9009_v38  ;;  %v7721_v51 = vadd.f32 %v10287_v37, %v13159_v8  ;;  %v10289_v22 = vadd.f32 %v10202_v61, %v13155_v56  ;;  %v7424_v27 = vpop.f32.mrb[39].mxu0 }
 0x416   : > { %8197 = vst.msk [vmem:[%s13171_s24 + $0x84] sm:$0xf] %vm8163_vm3, %v9007_v47  ;;  %v7719_v20 = vadd.f32 %v10288_v40, %v13159_v8  ;;  %v10290_v26 = vadd.f32 %v7424_v27, %v13157_v23 }
 0x417   : > { %v7801_v49 = vmax.f32 %v7721_v51, 0.0  ;;  %v7722_v55 = vadd.f32 %v10289_v22, %v13159_v8 }
 0x418   : > { %v7799_v6 = vmax.f32 %v7719_v20, 0.0  ;;  %v7720_v34 = vadd.f32 %v10290_v26, %v13159_v8  ;;  %v9853_v35 = vpop.f32.mrb[40].mxu1 }
 0x419   : > { %v9012_v44 = vpack.c.bf16 %v7801_v49, %v7801_v49  ;;  %v7802_v28 = vmax.f32 %v7722_v55, 0.0  ;;  %v4442_v56 = vpop.f32.mrb[41].mxu1 }
 0x41a   : > { %v9010_v53 = vpack.c.bf16 %v7799_v6, %v7799_v6  ;;  %v7800_v59 = vmax.f32 %v7720_v34, 0.0  ;;  %v10205_v33 = vpop.f32.mrb[40].mxu0  ;;  %v9854_v10 = vpop.f32.mrb[42].mxu1 }
 0x41b   : > { %8202 = vst.msk [vmem:[%s13171_s24 + $0x98] sm:$0xf] %vm8163_vm3, %v9012_v44  ;;  %v9013_v23 = vpack.c.bf16 %v7802_v28, %v7802_v28  ;;  %v10291_v14 = vadd.f32 %v10205_v33, %v9853_v35  ;;  %v7437_v0 = vpop.f32.mrb[41].mxu0  ;;  %v4445_v25 = vpop.f32.mrb[43].mxu1 }
 0x41c   : > { %8200 = vst.msk [vmem:[%s13171_s24 + $0x90] sm:$0xf] %vm8163_vm3, %v9010_v53  ;;  %v9011_v60 = vpack.c.bf16 %v7800_v59, %v7800_v59  ;;  %v10292_v19 = vadd.f32 %v7437_v0, %v4442_v56  ;;  %v10206_v41 = vpop.f32.mrb[42].mxu0 }
 0x41d   : > { %8203 = vst.msk [vmem:[%s13171_s24 + $0x9c] sm:$0xf] %vm8163_vm3, %v9013_v23  ;;  %v7725_v43 = vadd.f32 %v10291_v14, %v13159_v8  ;;  %v10293_v39 = vadd.f32 %v10206_v41, %v9854_v10  ;;  %v7440_v63 = vpop.f32.mrb[43].mxu0 }
 0x41e   : > { %8201 = vst.msk [vmem:[%s13171_s24 + $0x94] sm:$0xf] %vm8163_vm3, %v9011_v60  ;;  %v7723_v42 = vadd.f32 %v10292_v19, %v13159_v8  ;;  %v10294_v48 = vadd.f32 %v7440_v63, %v4445_v25 }
 0x41f   : > { %v7805_v50 = vmax.f32 %v7725_v43, 0.0  ;;  %v7726_v18 = vadd.f32 %v10293_v39, %v13159_v8 }
 0x420   : > { %v7803_v12 = vmax.f32 %v7723_v42, 0.0  ;;  %v7724_v30 = vadd.f32 %v10294_v48, %v13159_v8  ;;  %v9857_v62 = vpop.f32.mrb[44].mxu1 }
 0x421   : > { %v9016_v52 = vpack.c.bf16 %v7805_v50, %v7805_v50  ;;  %v7806_v57 = vmax.f32 %v7726_v18, 0.0  ;;  %v4458_v15 = vpop.f32.mrb[45].mxu1 }
 0x422   : > { %v9014_v58 = vpack.c.bf16 %v7803_v12, %v7803_v12  ;;  %v7804_v9 = vmax.f32 %v7724_v30, 0.0  ;;  %v10209_v4 = vpop.f32.mrb[44].mxu0  ;;  %v9858_v45 = vpop.f32.mrb[46].mxu1 }
 0x423   : > { %8206 = vst.msk [vmem:[%s13171_s24 + $0xa8] sm:$0xf] %vm8163_vm3, %v9016_v52  ;;  %v9017_v21 = vpack.c.bf16 %v7806_v57, %v7806_v57  ;;  %v10295_v3 = vadd.f32 %v10209_v4, %v9857_v62  ;;  %v7453_v31 = vpop.f32.mrb[45].mxu0  ;;  %v4461_v29 = vpop.f32.mrb[47].mxu1 }
 0x424   : > { %8204 = vst.msk [vmem:[%s13171_s24 + $0xa0] sm:$0xf] %vm8163_vm3, %v9014_v58  ;;  %v9015_v7 = vpack.c.bf16 %v7804_v9, %v7804_v9  ;;  %v10296_v1 = vadd.f32 %v7453_v31, %v4458_v15  ;;  %v10210_v11 = vpop.f32.mrb[46].mxu0 }
 0x425   : > { %8207 = vst.msk [vmem:[%s13171_s24 + $0xac] sm:$0xf] %vm8163_vm3, %v9017_v21  ;;  %v7729_v24 = vadd.f32 %v10295_v3, %v13159_v8  ;;  %v10297_v2 = vadd.f32 %v10210_v11, %v9858_v45  ;;  %v7456_v46 = vpop.f32.mrb[47].mxu0 }
 0x426   : > { %8205 = vst.msk [vmem:[%s13171_s24 + $0xa4] sm:$0xf] %vm8163_vm3, %v9015_v7  ;;  %v7727_v13 = vadd.f32 %v10296_v1, %v13159_v8  ;;  %v10298_v36 = vadd.f32 %v7456_v46, %v4461_v29 }
 0x427   : > { %v7809_v32 = vmax.f32 %v7729_v24, 0.0  ;;  %v7730_v5 = vadd.f32 %v10297_v2, %v13159_v8 }
 0x428   : > { %v7807_v17 = vmax.f32 %v7727_v13, 0.0  ;;  %v7728_v54 = vadd.f32 %v10298_v36, %v13159_v8  ;;  %v9861_v38 = vpop.f32.mrb[48].mxu1 }
 0x429   : > { %v9020_v37 = vpack.c.bf16 %v7809_v32, %v7809_v32  ;;  %v7810_v16 = vmax.f32 %v7730_v5, 0.0  ;;  %v4474_v47 = vpop.f32.mrb[49].mxu1 }
 0x42a   : > { %v9018_v40 = vpack.c.bf16 %v7807_v17, %v7807_v17  ;;  %v7808_v61 = vmax.f32 %v7728_v54, 0.0  ;;  %v10213_v51 = vpop.f32.mrb[48].mxu0  ;;  %v9862_v22 = vpop.f32.mrb[50].mxu1 }
 0x42b   : > { %8210 = vst.msk [vmem:[%s13171_s24 + $0xb8] sm:$0xf] %vm8163_vm3, %v9020_v37  ;;  %v9021_v27 = vpack.c.bf16 %v7810_v16, %v7810_v16  ;;  %v10299_v20 = vadd.f32 %v10213_v51, %v9861_v38  ;;  %v7469_v26 = vpop.f32.mrb[49].mxu0  ;;  %v4477_v49 = vpop.f32.mrb[51].mxu1 }
 0x42c   : > { %8208 = vst.msk [vmem:[%s13171_s24 + $0xb0] sm:$0xf] %vm8163_vm3, %v9018_v40  ;;  %v9019_v55 = vpack.c.bf16 %v7808_v61, %v7808_v61  ;;  %v10300_v6 = vadd.f32 %v7469_v26, %v4474_v47  ;;  %v10214_v34 = vpop.f32.mrb[50].mxu0 }
 0x42d   : > { %8211 = vst.msk [vmem:[%s13171_s24 + $0xbc] sm:$0xf] %vm8163_vm3, %v9021_v27  ;;  %v7733_v35 = vadd.f32 %v10299_v20, %v13159_v8  ;;  %v10301_v44 = vadd.f32 %v10214_v34, %v9862_v22  ;;  %v7472_v28 = vpop.f32.mrb[51].mxu0 }
 0x42e   : > { %8209 = vst.msk [vmem:[%s13171_s24 + $0xb4] sm:$0xf] %vm8163_vm3, %v9019_v55  ;;  %v7731_v56 = vadd.f32 %v10300_v6, %v13159_v8  ;;  %v10302_v53 = vadd.f32 %v7472_v28, %v4477_v49 }
 0x42f   : > { %v7813_v59 = vmax.f32 %v7733_v35, 0.0  ;;  %v7734_v33 = vadd.f32 %v10301_v44, %v13159_v8 }
 0x430   : > { %v7811_v10 = vmax.f32 %v7731_v56, 0.0  ;;  %v7732_v23 = vadd.f32 %v10302_v53, %v13159_v8  ;;  %v9865_v14 = vpop.f32.mrb[52].mxu1 }
 0x431   : > { %v9024_v0 = vpack.c.bf16 %v7813_v59, %v7813_v59  ;;  %v7814_v25 = vmax.f32 %v7734_v33, 0.0  ;;  %v4490_v60 = vpop.f32.mrb[53].mxu1 }
 0x432   : > { %v9022_v19 = vpack.c.bf16 %v7811_v10, %v7811_v10  ;;  %v7812_v41 = vmax.f32 %v7732_v23, 0.0  ;;  %v10217_v43 = vpop.f32.mrb[52].mxu0  ;;  %v9866_v39 = vpop.f32.mrb[54].mxu1 }
 0x433   : > { %8214 = vst.msk [vmem:[%s13171_s24 + $0xc8] sm:$0xf] %vm8163_vm3, %v9024_v0  ;;  %v9025_v63 = vpack.c.bf16 %v7814_v25, %v7814_v25  ;;  %v10303_v42 = vadd.f32 %v10217_v43, %v9865_v14  ;;  %v7485_v48 = vpop.f32.mrb[53].mxu0  ;;  %v4493_v50 = vpop.f32.mrb[55].mxu1 }
 0x434   : > { %8212 = vst.msk [vmem:[%s13171_s24 + $0xc0] sm:$0xf] %vm8163_vm3, %v9022_v19  ;;  %v9023_v18 = vpack.c.bf16 %v7812_v41, %v7812_v41  ;;  %v10304_v12 = vadd.f32 %v7485_v48, %v4490_v60  ;;  %v10218_v30 = vpop.f32.mrb[54].mxu0 }
 0x435   : > { %8215 = vst.msk [vmem:[%s13171_s24 + $0xcc] sm:$0xf] %vm8163_vm3, %v9025_v63  ;;  %v7737_v62 = vadd.f32 %v10303_v42, %v13159_v8  ;;  %v10305_v52 = vadd.f32 %v10218_v30, %v9866_v39  ;;  %v7488_v57 = vpop.f32.mrb[55].mxu0 }
 0x436   : > { %8213 = vst.msk [vmem:[%s13171_s24 + $0xc4] sm:$0xf] %vm8163_vm3, %v9023_v18  ;;  %v7735_v15 = vadd.f32 %v10304_v12, %v13159_v8  ;;  %v10306_v58 = vadd.f32 %v7488_v57, %v4493_v50 }
 0x437   : > { %v7817_v9 = vmax.f32 %v7737_v62, 0.0  ;;  %v7738_v4 = vadd.f32 %v10305_v52, %v13159_v8 }
 0x438   : > { %v7815_v45 = vmax.f32 %v7735_v15, 0.0  ;;  %v7736_v21 = vadd.f32 %v10306_v58, %v13159_v8  ;;  %v9869_v3 = vpop.f32.mrb[56].mxu1 }
 0x439   : > { %v9028_v31 = vpack.c.bf16 %v7817_v9, %v7817_v9  ;;  %v7818_v29 = vmax.f32 %v7738_v4, 0.0  ;;  %v4506_v7 = vpop.f32.mrb[57].mxu1 }
 0x43a   : > { %v9026_v1 = vpack.c.bf16 %v7815_v45, %v7815_v45  ;;  %v7816_v11 = vmax.f32 %v7736_v21, 0.0  ;;  %v10221_v24 = vpop.f32.mrb[56].mxu0  ;;  %v9870_v2 = vpop.f32.mrb[58].mxu1 }
 0x43b   : > { %8218 = vst.msk [vmem:[%s13171_s24 + $0xd8] sm:$0xf] %vm8163_vm3, %v9028_v31  ;;  %v9029_v46 = vpack.c.bf16 %v7818_v29, %v7818_v29  ;;  %v10307_v13 = vadd.f32 %v10221_v24, %v9869_v3  ;;  %v7501_v36 = vpop.f32.mrb[57].mxu0  ;;  %v4509_v32 = vpop.f32.mrb[59].mxu1 }
 0x43c   : > { %8216 = vst.msk [vmem:[%s13171_s24 + $0xd0] sm:$0xf] %vm8163_vm3, %v9026_v1  ;;  %v9027_v5 = vpack.c.bf16 %v7816_v11, %v7816_v11  ;;  %v10308_v17 = vadd.f32 %v7501_v36, %v4506_v7  ;;  %v10222_v54 = vpop.f32.mrb[58].mxu0 }
 0x43d   : > { %8219 = vst.msk [vmem:[%s13171_s24 + $0xdc] sm:$0xf] %vm8163_vm3, %v9029_v46  ;;  %v7741_v38 = vadd.f32 %v10307_v13, %v13159_v8  ;;  %v10309_v37 = vadd.f32 %v10222_v54, %v9870_v2  ;;  %v7504_v16 = vpop.f32.mrb[59].mxu0 }
 0x43e   : > { %8217 = vst.msk [vmem:[%s13171_s24 + $0xd4] sm:$0xf] %vm8163_vm3, %v9027_v5  ;;  %v7739_v47 = vadd.f32 %v10308_v17, %v13159_v8  ;;  %v10310_v40 = vadd.f32 %v7504_v16, %v4509_v32 }
 0x43f   : > { %v7821_v61 = vmax.f32 %v7741_v38, 0.0  ;;  %v7742_v51 = vadd.f32 %v10309_v37, %v13159_v8 }
 0x440   : > { %v7819_v22 = vmax.f32 %v7739_v47, 0.0  ;;  %v7740_v27 = vadd.f32 %v10310_v40, %v13159_v8  ;;  %v9873_v20 = vpop.f32.mrb[60].mxu1 }
 0x441   : > { %v9032_v26 = vpack.c.bf16 %v7821_v61, %v7821_v61  ;;  %v7822_v49 = vmax.f32 %v7742_v51, 0.0  ;;  %v4522_v55 = vpop.f32.mrb[61].mxu1 }
 0x442   : > { %v9030_v6 = vpack.c.bf16 %v7819_v22, %v7819_v22  ;;  %v7820_v34 = vmax.f32 %v7740_v27, 0.0  ;;  %v10225_v35 = vpop.f32.mrb[60].mxu0  ;;  %v9874_v44 = vpop.f32.mrb[62].mxu1 }
 0x443   : > { %8222 = vst.msk [vmem:[%s13171_s24 + $0xe8] sm:$0xf] %vm8163_vm3, %v9032_v26  ;;  %v9033_v28 = vpack.c.bf16 %v7822_v49, %v7822_v49  ;;  %v10311_v56 = vadd.f32 %v10225_v35, %v9873_v20  ;;  %v7517_v53 = vpop.f32.mrb[61].mxu0  ;;  %v4525_v59 = vpop.f32.mrb[63].mxu1 }
 0x444   : > { %8220 = vst.msk [vmem:[%s13171_s24 + $0xe0] sm:$0xf] %vm8163_vm3, %v9030_v6  ;;  %v9031_v33 = vpack.c.bf16 %v7820_v34, %v7820_v34  ;;  %v10312_v10 = vadd.f32 %v7517_v53, %v4522_v55  ;;  %v10226_v23 = vpop.f32.mrb[62].mxu0 }
 0x445   : > { %8223 = vst.msk [vmem:[%s13171_s24 + $0xec] sm:$0xf] %vm8163_vm3, %v9033_v28  ;;  %v7745_v14 = vadd.f32 %v10311_v56, %v13159_v8  ;;  %v10313_v0 = vadd.f32 %v10226_v23, %v9874_v44  ;;  %v7520_v25 = vpop.f32.mrb[63].mxu0 }
 0x446   : > { %8221 = vst.msk [vmem:[%s13171_s24 + $0xe4] sm:$0xf] %vm8163_vm3, %v9031_v33  ;;  %v7743_v60 = vadd.f32 %v10312_v10, %v13159_v8  ;;  %v10314_v19 = vadd.f32 %v7520_v25, %v4525_v59 }
 0x447   : > { %v7825_v41 = vmax.f32 %v7745_v14, 0.0  ;;  %v7746_v43 = vadd.f32 %v10313_v0, %v13159_v8 }
 0x448   : > { %v7823_v39 = vmax.f32 %v7743_v60, 0.0  ;;  %v7744_v63 = vadd.f32 %v10314_v19, %v13159_v8  ;;  %v9877_v42 = vpop.f32.mrb[64].mxu1 }
 0x449   : > { %v9036_v48 = vpack.c.bf16 %v7825_v41, %v7825_v41  ;;  %v7826_v50 = vmax.f32 %v7746_v43, 0.0  ;;  %v4538_v18 = vpop.f32.mrb[65].mxu1 }
 0x44a   : > { %v9034_v12 = vpack.c.bf16 %v7823_v39, %v7823_v39  ;;  %v7824_v30 = vmax.f32 %v7744_v63, 0.0  ;;  %v10229_v62 = vpop.f32.mrb[64].mxu0  ;;  %v9878_v52 = vpop.f32.mrb[66].mxu1 }
 0x44b   : > { %8226 = vst.msk [vmem:[%s13171_s24 + $0xf8] sm:$0xf] %vm8163_vm3, %v9036_v48  ;;  %v9037_v57 = vpack.c.bf16 %v7826_v50, %v7826_v50  ;;  %v10315_v15 = vadd.f32 %v10229_v62, %v9877_v42  ;;  %v7533_v58 = vpop.f32.mrb[65].mxu0  ;;  %v4541_v9 = vpop.f32.mrb[67].mxu1 }
 0x44c   : > { %8224 = vst.msk [vmem:[%s13171_s24 + $0xf0] sm:$0xf] %vm8163_vm3, %v9034_v12  ;;  %v9035_v4 = vpack.c.bf16 %v7824_v30, %v7824_v30  ;;  %v10316_v45 = vadd.f32 %v7533_v58, %v4538_v18  ;;  %v10230_v21 = vpop.f32.mrb[66].mxu0 }
 0x44d   : > { %8227 = vst.msk [vmem:[%s13171_s24 + $0xfc] sm:$0xf] %vm8163_vm3, %v9037_v57  ;;  %v7749_v3 = vadd.f32 %v10315_v15, %v13159_v8  ;;  %v10317_v31 = vadd.f32 %v10230_v21, %v9878_v52  ;;  %v7536_v29 = vpop.f32.mrb[67].mxu0 }
 0x44e   : > { %8225 = vst.msk [vmem:[%s13171_s24 + $0xf4] sm:$0xf] %vm8163_vm3, %v9035_v4  ;;  %v7747_v7 = vadd.f32 %v10316_v45, %v13159_v8  ;;  %v10318_v1 = vadd.f32 %v7536_v29, %v4541_v9 }
 0x44f   : > { %v7829_v11 = vmax.f32 %v7749_v3, 0.0  ;;  %v7750_v24 = vadd.f32 %v10317_v31, %v13159_v8 }
 0x450   : > { %v7827_v2 = vmax.f32 %v7747_v7, 0.0  ;;  %v7748_v46 = vadd.f32 %v10318_v1, %v13159_v8  ;;  %v9881_v13 = vpop.f32.mrb[68].mxu1 }
 0x451   : > { %v9040_v36 = vpack.c.bf16 %v7829_v11, %v7829_v11  ;;  %v7830_v32 = vmax.f32 %v7750_v24, 0.0  ;;  %v4554_v5 = vpop.f32.mrb[69].mxu1 }
 0x452   : > { %v9038_v17 = vpack.c.bf16 %v7827_v2, %v7827_v2  ;;  %v7828_v54 = vmax.f32 %v7748_v46, 0.0  ;;  %v10233_v38 = vpop.f32.mrb[68].mxu0  ;;  %v9882_v37 = vpop.f32.mrb[70].mxu1 }
 0x453   : > { %8230 = vst.msk [vmem:[%s13171_s24 + $0x108] sm:$0xf] %vm8163_vm3, %v9040_v36  ;;  %v9041_v16 = vpack.c.bf16 %v7830_v32, %v7830_v32  ;;  %v10319_v47 = vadd.f32 %v10233_v38, %v9881_v13  ;;  %v7549_v40 = vpop.f32.mrb[69].mxu0  ;;  %v4557_v61 = vpop.f32.mrb[71].mxu1 }
 0x454   : > { %8228 = vst.msk [vmem:[%s13171_s24 + $0x100] sm:$0xf] %vm8163_vm3, %v9038_v17  ;;  %v9039_v51 = vpack.c.bf16 %v7828_v54, %v7828_v54  ;;  %v10320_v22 = vadd.f32 %v7549_v40, %v4554_v5  ;;  %v10234_v27 = vpop.f32.mrb[70].mxu0 }
 0x455   : > { %8231 = vst.msk [vmem:[%s13171_s24 + $0x10c] sm:$0xf] %vm8163_vm3, %v9041_v16  ;;  %v7753_v20 = vadd.f32 %v10319_v47, %v13159_v8  ;;  %v10321_v26 = vadd.f32 %v10234_v27, %v9882_v37  ;;  %v7552_v49 = vpop.f32.mrb[71].mxu0  ;;  %v11166_v16 = vld [vmem:[#allocation9] ss:$0 sm:$0xff] }
 0x456   : > { %8229 = vst.msk [vmem:[%s13171_s24 + $0x104] sm:$0xf] %vm8163_vm3, %v9039_v51  ;;  %v7751_v55 = vadd.f32 %v10320_v22, %v13159_v8  ;;  %v10322_v6 = vadd.f32 %v7552_v49, %v4557_v61 }
 0x457   : > { %v7833_v34 = vmax.f32 %v7753_v20, 0.0  ;;  %v7754_v35 = vadd.f32 %v10321_v26, %v13159_v8 }
 0x458   : > { %v7831_v44 = vmax.f32 %v7751_v55, 0.0  ;;  %v7752_v28 = vadd.f32 %v10322_v6, %v13159_v8  ;;  %v9885_v56 = vpop.f32.mrb[72].mxu1 }
 0x459   : > { %v9044_v53 = vpack.c.bf16 %v7833_v34, %v7833_v34  ;;  %v7834_v59 = vmax.f32 %v7754_v35, 0.0  ;;  %v4570_v33 = vpop.f32.mrb[73].mxu1 }
 0x45a   : > { %v9042_v10 = vpack.c.bf16 %v7831_v44, %v7831_v44  ;;  %v7832_v23 = vmax.f32 %v7752_v28, 0.0  ;;  %v10237_v14 = vpop.f32.mrb[72].mxu0  ;;  %v9886_v0 = vpop.f32.mrb[74].mxu1 }
 0x45b   : > { %8234 = vst.msk [vmem:[%s13171_s24 + $0x118] sm:$0xf] %vm8163_vm3, %v9044_v53  ;;  %v9045_v25 = vpack.c.bf16 %v7834_v59, %v7834_v59  ;;  %v10323_v60 = vadd.f32 %v10237_v14, %v9885_v56  ;;  %v7565_v19 = vpop.f32.mrb[73].mxu0  ;;  %v4573_v41 = vpop.f32.mrb[75].mxu1 }
 0x45c   : > { %8232 = vst.msk [vmem:[%s13171_s24 + $0x110] sm:$0xf] %vm8163_vm3, %v9042_v10  ;;  %v9043_v43 = vpack.c.bf16 %v7832_v23, %v7832_v23  ;;  %v10324_v39 = vadd.f32 %v7565_v19, %v4570_v33  ;;  %v10238_v63 = vpop.f32.mrb[74].mxu0 }
 0x45d   : > { %8235 = vst.msk [vmem:[%s13171_s24 + $0x11c] sm:$0xf] %vm8163_vm3, %v9045_v25  ;;  %v7757_v42 = vadd.f32 %v10323_v60, %v13159_v8  ;;  %v10325_v48 = vadd.f32 %v10238_v63, %v9886_v0  ;;  %v7568_v50 = vpop.f32.mrb[75].mxu0 }
 0x45e   : > { %8233 = vst.msk [vmem:[%s13171_s24 + $0x114] sm:$0xf] %vm8163_vm3, %v9043_v43  ;;  %v7755_v18 = vadd.f32 %v10324_v39, %v13159_v8  ;;  %v10326_v12 = vadd.f32 %v7568_v50, %v4573_v41 }
 0x45f   : > { %v7837_v30 = vmax.f32 %v7757_v42, 0.0  ;;  %v7758_v62 = vadd.f32 %v10325_v48, %v13159_v8 }
 0x460   : > { %v7835_v52 = vmax.f32 %v7755_v18, 0.0  ;;  %v7756_v57 = vadd.f32 %v10326_v12, %v13159_v8  ;;  %v9889_v15 = vpop.f32.mrb[76].mxu1 }
 0x461   : > { %v9048_v58 = vpack.c.bf16 %v7837_v30, %v7837_v30  ;;  %v7838_v9 = vmax.f32 %v7758_v62, 0.0  ;;  %v4586_v4 = vpop.f32.mrb[77].mxu1 }
 0x462   : > { %v9046_v45 = vpack.c.bf16 %v7835_v52, %v7835_v52  ;;  %v7836_v21 = vmax.f32 %v7756_v57, 0.0  ;;  %v10241_v3 = vpop.f32.mrb[76].mxu0  ;;  %v9890_v31 = vpop.f32.mrb[78].mxu1 }
 0x463   : > { %8238 = vst.msk [vmem:[%s13171_s24 + $0x128] sm:$0xf] %vm8163_vm3, %v9048_v58  ;;  %v9049_v29 = vpack.c.bf16 %v7838_v9, %v7838_v9  ;;  %v10327_v7 = vadd.f32 %v10241_v3, %v9889_v15  ;;  %v7581_v1 = vpop.f32.mrb[77].mxu0  ;;  %v4589_v11 = vpop.f32.mrb[79].mxu1 }
 0x464   : > { %8236 = vst.msk [vmem:[%s13171_s24 + $0x120] sm:$0xf] %vm8163_vm3, %v9046_v45  ;;  %v9047_v24 = vpack.c.bf16 %v7836_v21, %v7836_v21  ;;  %v10328_v2 = vadd.f32 %v7581_v1, %v4586_v4  ;;  %v10242_v46 = vpop.f32.mrb[78].mxu0 }
 0x465   : > { %8239 = vst.msk [vmem:[%s13171_s24 + $0x12c] sm:$0xf] %vm8163_vm3, %v9049_v29  ;;  %v7761_v13 = vadd.f32 %v10327_v7, %v13159_v8  ;;  %v10329_v36 = vadd.f32 %v10242_v46, %v9890_v31  ;;  %v7584_v32 = vpop.f32.mrb[79].mxu0 }
 0x466   : > { %8237 = vst.msk [vmem:[%s13171_s24 + $0x124] sm:$0xf] %vm8163_vm3, %v9047_v24  ;;  %v7759_v5 = vadd.f32 %v10328_v2, %v13159_v8  ;;  %v10330_v17 = vadd.f32 %v7584_v32, %v4589_v11 }
 0x467   : > { %v7841_v54 = vmax.f32 %v7761_v13, 0.0  ;;  %v7762_v38 = vadd.f32 %v10329_v36, %v13159_v8 }
 0x468   : > { %v7839_v37 = vmax.f32 %v7759_v5, 0.0  ;;  %v7760_v47 = vadd.f32 %v11166_v16, %v10330_v17 }
 0x469   : > { %v9052_v40 = vpack.c.bf16 %v7841_v54, %v7841_v54  ;;  %v7842_v61 = vmax.f32 %v7762_v38, 0.0 }
 0x46a   : > { %v9050_v51 = vpack.c.bf16 %v7839_v37, %v7839_v37  ;;  %v7840_v22 = vmax.f32 %v7760_v47, 0.0 }
 0x46b   : > { %8242 = vst.msk [vmem:[%s13171_s24 + $0x138] sm:$0xf] %vm8163_vm3, %v9052_v40  ;;  %v9053_v27 = vpack.c.bf16 %v7842_v61, %v7842_v61 }
 0x46c   : > { %8240 = vst.msk [vmem:[%s13171_s24 + $0x130] sm:$0xf] %vm8163_vm3, %v9050_v51  ;;  %v9051_v8 = vpack.c.bf16 %v7840_v22, %v7840_v22 }
 0x46d   : > { %8243 = vst.msk [vmem:[%s13171_s24 + $0x13c] sm:$0xf] %vm8163_vm3, %v9053_v27 }
 0x46e   : > { %8241 = vst.msk [vmem:[%s13171_s24 + $0x134] sm:$0xf] %vm8163_vm3, %v9051_v8 }
 0x46f   : > { %11297 = shalt.err (!%p11294_p12)
}
 0x470   : > { %s11298_s22 = scalar_lea.hbm %s13443_s9, 5120  ;;  %s11302_s5 = scalar_lea.hbm %s13513_s4, 10240 }
 0x471   : > { %p11299_p13 = scmp.ne.s32.totalorder %s13443_s9, %s11298_s22  ;;  %p11303_p2 = scmp.lt.u32.totalorder %s13443_s9, %s13513_s4 }
 0x472   : > { %p11304_p4 = scmp.lt.u32.totalorder %s11302_s5, %s11298_s22  ;;  %p11306_p11 = scmp.lt.u32.totalorder %s11298_s22, %s13443_s9 }
 0x473   : > { %p11300_p10 = pnand %p11299_p13, %p13642_p0 }
 0x474   : > { %p11305_p8 = por %p11304_p4, %p11303_p2 }
 0x475   : > { %p11301_p6 = pneg %p11300_p10 }
 0x476   : > { %p11307_p3 = por %p11306_p11, %p11305_p8 }
 0x478   : > { %p11308_p5 = pnand %p11307_p3, %p11301_p6 }
 0x47a   : > { %11311 = shalt.err (!%p11308_p5)
}
 0x47b   : > { %s11411_s6 = smov 64   ;;  %s11412_s15 = smov 4  }
 0x47c   : > { %10907 = dma.vmem_to_hbm [thread:$0]  (%p13642_p0), %s13445_s27, 5120, %s13443_s9, %s8245_s21, %s11411_s6, %s11411_s6, %s11412_s15  }
 0x47d PF: > { %s13643_s8 = sld [smem:[#allocation18_spill]]  ;;  %s8276_s24 = sand.u32 1, %s11382_s18  }
 0x47e   : > { %p13645_p7 = scmp.ge.s32.totalorder %s11402_s23, 2  ;;  %s8277_s26 = scalar_lea.sflag [#allocation5], %s8276_s24 }
 0x483   : > { %p13644_p1 = scmp.ne.s32.totalorder %s13643_s8, 0 }
 0x485   : > { %p10924_p9 = pnand %p13645_p7, %p13644_p1 }
 0x487   : > { %11365 = dma.done.wait (!%p10924_p9), %s8277_s26, 5120  }
 0x488   : > { %11367 = vsyncadd (!%p10924_p9), %s8277_s26, 4294962176  ;;  %s24_s23 = sadd.s32 1, %s11402_s23   ;;  %s13646_s13 = sld [smem:[#allocation20_spill]] }
 0x489   : > { %p21_p12 = scmp.ge.s32.totalorder %s24_s23, 4   ;;  %s13647_s21 = sld [smem:[#allocation17_spill]] }
 0x48a   : > { %s13648_s22 = sld [smem:[#allocation19_spill]]  ;;  %s13649_s15 = smov %s11374_s16 }
 0x48b   : > { %s13650_s16 = smov %s11378_s17  ;;  %s13651_s17 = smov %s11660_s10 }
 0x48c   : > { %s13652_s18 = smov %s11386_s19  ;;  %s13653_s19 = smov %s11390_s20 }
 0x48d   :  { %23 = sbr.rel (!%p21_p12) target bundleno = 15 (0xf), region = 112 }
 0x48e   : > { %s13654_s20 = smov %s13646_s13 }
 0x494   :  { %8282 = vsyncpa [#allocation4], 1 }
 0x495   :  { %8284 = vsyncpa [#allocation4 + $0x1], 1 }
 0x496   :  { %8285 = vsyncpa [#allocation7], 1 }
 0x497   :  { %8287 = vsyncpa [#allocation7 + $0x1], 1 }
 0x498   :  { %8288 = vsyncpa [#allocation10], 1 }
 0x499   :  { %8289 = vsyncpa [#allocation5], 1 }
 0x49a   :  { %8291 = vsyncpa [#allocation5 + $0x1], 1 }

</bundles_post_ra>
